<compile_context>
chip_gen: v7x
topology: tpu7x:2x2x1
jax: 0.10.0
libtpu: 0.0.40
codegen_flags: <defaults>
</compile_context>

<pallas_src>
import functools

import jax
import jax.numpy as jnp
from jax import lax
from jax.experimental import pallas as pl
from jax.experimental.pallas import tpu as pltpu

EPS = 1e-5
LANES = 128
_REF_PREC = lax.Precision.HIGHEST        # reference (ground truth) only


def _ru(x, m):
    return (x + m - 1) // m * m


# ----------------------------------------------------------------------------
# In-kernel helpers
# ----------------------------------------------------------------------------
def _conv3x3(a1, wc_ref, cbuf, lbuf, rbuf, *, h, w, gap):
    """3x3 'same' conv of one image's activations (a1: (H*W, CP) f32).

    a1 (and its two dx-shifted, horizontally masked copies) are written in
    bf16 into three VMEM buffers with `gap` zero rows above and below, so
    every one of the nine tap windows is a plain aligned read at a static
    offset gap + dy*w -- no per-tap masking, casting or iota.
    """
    hw = h * w
    cp = a1.shape[1]
    col = lax.broadcasted_iota(jnp.int32, (hw, 1), 0) % w
    # dx = -1 neighbour (value one row earlier, zero at x == 0)
    left = jnp.where(col >= 1, pltpu.roll(a1, 1, axis=0), 0.0)
    # dx = +1 neighbour (value one row later, zero at x == w-1)
    right = jnp.where(col <= w - 2, pltpu.roll(a1, hw - 1, axis=0), 0.0)
    zrow = jnp.zeros((gap, cp), jnp.bfloat16)
    for buf, val in ((cbuf, a1), (lbuf, left), (rbuf, right)):
        # Gap rows re-zeroed every step: the grid axis is "parallel", so there
        # is no per-core "first iteration" predicate for a one-time init.
        buf[pl.ds(0, gap), :] = zrow
        buf[pl.ds(gap + hw, gap), :] = zrow
        buf[pl.ds(gap, hw), :] = val.astype(jnp.bfloat16)   # bf16 scratch
    bufs = (lbuf, cbuf, rbuf)                               # indexed by kx
    acc = jnp.zeros((hw, cp), jnp.float32)
    for ky in range(3):
        start = gap + (ky - 1) * w        # static; 8-aligned when w % 8 == 0
        for kx in range(3):
            win = bufs[kx][pl.ds(start, hw), :]             # aligned, mask-free
            acc = acc + jnp.dot(win, wc_ref[ky * 3 + kx],
                                preferred_element_type=jnp.float32)
    return acc


def _tile_stats(st_ref, y):
    """One-pass per-tile BN statistics: row 0 = sum, row 1 = sum of squares."""
    st_ref[0, 0:1, :] = jnp.sum(y, axis=0, keepdims=True)
    st_ref[0, 1:2, :] = jnp.sum(y * y, axis=0, keepdims=True)


# ----------------------------------------------------------------------------
# Kernels
# ----------------------------------------------------------------------------
def _stage1_kernel(x_ref, wd_ref, st_ref):
    # 1x1 down conv (bias dropped: a per-channel constant cancels in
    # training-mode BN).  Only the BN0 batch statistics are emitted; y1 is
    # cheap to recompute in stage 2, so it never round-trips HBM.
    y1 = jnp.dot(x_ref[...].astype(jnp.bfloat16), wd_ref[...],
                 preferred_element_type=jnp.float32)
    _tile_stats(st_ref, y1)


def _stage2_kernel(x_ref, wd_ref, wc_ref, s0_ref, t0_ref,
                   y2_ref, st_ref, cbuf, lbuf, rbuf, *, h, w, gap):
    y1 = jnp.dot(x_ref[...].astype(jnp.bfloat16), wd_ref[...],
                 preferred_element_type=jnp.float32)
    a1 = jnp.maximum(y1 * s0_ref[...] + t0_ref[...], 0.0)        # BN0 + ReLU
    y2 = _conv3x3(a1, wc_ref, cbuf, lbuf, rbuf, h=h, w=w, gap=gap)
    y2_ref[...] = y2                                             # lane-dense store
    _tile_stats(st_ref, y2)


def _stage3_kernel(y2_ref, x_ref, wu_ref, wr_ref, s1_ref, t1_ref,
                   y3_ref, st_ref):
    a2 = jnp.maximum(y2_ref[...] * s1_ref[...] + t1_ref[...], 0.0)   # BN1 + ReLU
    y3 = jnp.dot(a2.astype(jnp.bfloat16), wu_ref[...],
                 preferred_element_type=jnp.float32)
    y3 = y3 + jnp.dot(x_ref[...].astype(jnp.bfloat16), wr_ref[...],
                      preferred_element_type=jnp.float32)            # residual
    y3_ref[...] = y3
    _tile_stats(st_ref, y3)


def _stage4_kernel(y3_ref, s2_ref, t2_ref, o_ref, *, cout):
    y = jnp.maximum(y3_ref[...] * s2_ref[...] + t2_ref[...], 0.0)    # BN2 + ReLU
    o_ref[...] = y[:, :cout]                                         # unpadded HBM write


def _fused_nobn_kernel(x_ref, wdr_ref, wc_ref, wu_ref,
                       bd_ref, bc_ref, bu_ref, br_ref,
                       o_ref, cbuf, lbuf, rbuf, *, h, w, gap, cout):
    # use_bn=False: all three stages fused; a1/a2 never leave VMEM.
    cp = wu_ref.shape[0]
    # down-conv and residual(trans/identity) fused into one 256-wide matmul
    ycat = jnp.dot(x_ref[...].astype(jnp.bfloat16), wdr_ref[...],
                   preferred_element_type=jnp.float32)               # (hw, 2*CP)
    a1 = jnp.maximum(ycat[:, :cp] + bd_ref[...], 0.0)
    r = ycat[:, cp:] + br_ref[...]
    y2 = _conv3x3(a1, wc_ref, cbuf, lbuf, rbuf, h=h, w=w, gap=gap)
    a2 = jnp.maximum(y2 + bc_ref[...], 0.0)
    y3 = jnp.dot(a2.astype(jnp.bfloat16), wu_ref[...],
                 preferred_element_type=jnp.float32) + bu_ref[...]
    o_ref[...] = jnp.maximum(y3 + r, 0.0)[:, :cout]


# ----------------------------------------------------------------------------
# XLA-side BN fold (tiny (1, CP) math between tiled passes)
# ----------------------------------------------------------------------------
def _fold_bn(stats, gamma_row, beta_row, m):
    tot = jnp.sum(stats, axis=0)                         # (2, CP)
    mean = tot[0:1, :] / m
    # one-pass variance; the clamp guards f32 cancellation for large means
    var = jnp.maximum(tot[1:2, :] / m - mean * mean, 0.0)
    scale = gamma_row * lax.rsqrt(var + EPS)
    shift = beta_row - mean * scale
    return scale, shift


# ----------------------------------------------------------------------------
# Wrapper
# ----------------------------------------------------------------------------
def residual_forward(x_nchw, params, use_bn=True):
    N, Cin, H, W = x_nchw.shape
    Cmid = params["w_down"].shape[0]
    Cout = params["w_up"].shape[0]
    use_trans = Cin != Cout
    HW, M = H * W, N * H * W
    assert HW % 8 == 0, "H*W must be a multiple of 8 (TPU sublane tiling)"
    CP = _ru(max(Cmid, Cout), LANES)      # lane-dense padded channel width
    GAP = _ru(W, 8)                       # zero halo rows around each image
    n_tiles = N                           # one image per grid step (halo-free)
    f32, bf16 = jnp.float32, jnp.bfloat16

    # ---- layout glue (wrapper side; activations stay UNPADDED in HBM) -----
    def padlane(a):
        return jnp.pad(a, ((0, 0), (0, CP - a.shape[1])))

    row = lambda v: padlane(v.reshape(1, -1).astype(f32))            # (1, CP)

    x2d = jnp.transpose(x_nchw, (0, 2, 3, 1)).reshape(M, Cin).astype(f32)

    wd = padlane(params["w_down"][:, :, 0, 0].T).astype(bf16)        # (Cin, CP)
    wc = jnp.transpose(params["w_conv"], (2, 3, 1, 0)).reshape(9, Cmid, Cmid)
    wc = jnp.pad(wc, ((0, 0), (0, CP - Cmid), (0, CP - Cmid))).astype(bf16)
    wu = jnp.pad(params["w_up"][:, :, 0, 0].T,
                 ((0, CP - Cmid), (0, CP - Cout))).astype(bf16)      # (CP, CP)
    if use_trans:
        wr = padlane(params["w_trans"][:, :, 0, 0].T).astype(bf16)   # (Cin, CP)
        br = row(params["b_trans"])
    else:   # identity residual expressed as x @ I -> one code path in-kernel
        wr = padlane(jnp.eye(Cin, dtype=f32)).astype(bf16)
        br = jnp.zeros((1, CP), f32)

    # ---- shared specs ------------------------------------------------------
    def tile_spec(cols):
        return pl.BlockSpec((HW, cols), lambda i: (i, 0))

    def const_spec(shape):
        nd = len(shape)
        return pl.BlockSpec(shape, lambda i, _nd=nd: (0,) * _nd)     # VMEM-resident

    stats_spec = pl.BlockSpec((1, 2, CP), lambda i: (i, 0, 0))
    stats_shape = jax.ShapeDtypeStruct((n_tiles, 2, CP), f32)
    scratch = lambda: [pltpu.VMEM((GAP + HW + GAP, CP), bf16) for _ in range(3)]

    # VMEM budget: bf16 halo buffers + resident weights + double-buffered tiles
    resident = 3 * (GAP + HW + GAP) * CP * 2 + wc.size * 2 + 2 * CP * CP * 2
    pipelined = 2 * (2 * HW * CP * 4 + HW * (Cin + Cout) * 4)
    vmem_lim = int(min(64 * 2**20, max(32 * 2**20, 2 * (resident + pipelined))))
    cparams = pltpu.CompilerParams(dimension_semantics=("parallel",),
                                   vmem_limit_bytes=vmem_lim)

    def cost(flops, nbytes):                 # real (unpadded) channel counts
        return pl.CostEstimate(flops=int(flops), transcendentals=0,
                               bytes_accessed=int(nbytes))

    wbytes = (wd.size + wc.size + wu.size + wr.size) * 2

    if not use_bn:
        wdr = jnp.concatenate([wd, wr], axis=1)          # (Cin, 2*CP)
        out2d = pl.pallas_call(
            functools.partial(_fused_nobn_kernel, h=H, w=W, gap=GAP, cout=Cout),
            out_shape=jax.ShapeDtypeStruct((M, Cout), f32),
            grid=(n_tiles,),
            in_specs=[tile_spec(Cin), const_spec((Cin, 2 * CP)),
                      const_spec((9, CP, CP)), const_spec((CP, CP)),
                      const_spec((1, CP)), const_spec((1, CP)),
                      const_spec((1, CP)), const_spec((1, CP))],
            out_specs=tile_spec(Cout),
            scratch_shapes=scratch(),
            compiler_params=cparams,
            cost_estimate=cost(
                2 * M * (Cin * (Cmid + Cout) + 9 * Cmid * Cmid + Cmid * Cout),
                M * (Cin + Cout) * 4 + wbytes),
        )(x2d, wdr, wc, wu,
          row(params["b_down"]), row(params["b_conv"]), row(params["b_up"]), br)
        return jnp.transpose(out2d.reshape(N, H, W, Cout), (0, 3, 1, 2))

    # ---- use_bn=True: four tiled passes (training-mode BN needs global stats
    # of each stage's pre-BN activations before the next stage can run) ------
    stats0 = pl.pallas_call(
        _stage1_kernel,
        out_shape=stats_shape,
        grid=(n_tiles,),
        in_specs=[tile_spec(Cin), const_spec((Cin, CP))],
        out_specs=stats_spec,
        compiler_params=cparams,
        cost_estimate=cost(2 * M * Cin * Cmid, M * Cin * 4 + wd.size * 2),
    )(x2d, wd)
    s0, t0 = _fold_bn(stats0, row(params["gamma0"]), row(params["beta0"]), M)

    y2, stats1 = pl.pallas_call(
        functools.partial(_stage2_kernel, h=H, w=W, gap=GAP),
        out_shape=(jax.ShapeDtypeStruct((M, CP), f32), stats_shape),
        grid=(n_tiles,),
        in_specs=[tile_spec(Cin), const_spec((Cin, CP)), const_spec((9, CP, CP)),
                  const_spec((1, CP)), const_spec((1, CP))],
        out_specs=(tile_spec(CP), stats_spec),
        scratch_shapes=scratch(),
        compiler_params=cparams,
        cost_estimate=cost(2 * M * (Cin * Cmid + 9 * Cmid * Cmid),
                           M * (Cin + CP) * 4 + wbytes),
    )(x2d, wd, wc, s0, t0)
    s1, t1 = _fold_bn(stats1, row(params["gamma1"]), row(params["beta1"]), M)

    y3, stats2 = pl.pallas_call(
        _stage3_kernel,
        out_shape=(jax.ShapeDtypeStruct((M, CP), f32), stats_shape),
        grid=(n_tiles,),
        in_specs=[tile_spec(CP), tile_spec(Cin), const_spec((CP, CP)),
                  const_spec((Cin, CP)), const_spec((1, CP)), const_spec((1, CP))],
        out_specs=(tile_spec(CP), stats_spec),
        compiler_params=cparams,
        cost_estimate=cost(2 * M * (Cmid * Cout + Cin * Cout),
                           M * (2 * CP + Cin) * 4 + wbytes),
    )(y2, x2d, wu, wr, s1, t1)
    s2, t2 = _fold_bn(stats2, row(params["gamma2"]), row(params["beta2"]), M)

    out2d = pl.pallas_call(
        functools.partial(_stage4_kernel, cout=Cout),
        out_shape=jax.ShapeDtypeStruct((M, Cout), f32),
        grid=(n_tiles,),
        in_specs=[tile_spec(CP), const_spec((1, CP)), const_spec((1, CP))],
        out_specs=tile_spec(Cout),
        compiler_params=cparams,
        cost_estimate=cost(2 * M * Cout, M * (CP + Cout) * 4),
    )(y3, s2, t2)
    return jnp.transpose(out2d.reshape(N, H, W, Cout), (0, 3, 1, 2))


# ----------------------------------------------------------------------------
# Pure-JAX reference (mirrors the PyTorch module, BatchNorm in training mode)
# ----------------------------------------------------------------------------
def reference_forward(x, params, use_bn=True):
    dn = ("NCHW", "OIHW", "NCHW")

    def conv(inp, w, b, pad):
        y = lax.conv_general_dilated(inp, w, (1, 1), pad,
                                     dimension_numbers=dn, precision=_REF_PREC)
        return y + b[None, :, None, None]

    def bn(inp, g, bt):
        mean = jnp.mean(inp, axis=(0, 2, 3), keepdims=True)
        var = jnp.mean((inp - mean) ** 2, axis=(0, 2, 3), keepdims=True)
        return (inp - mean) * lax.rsqrt(var + EPS) * g[None, :, None, None] \
            + bt[None, :, None, None]

    relu = lambda v: jnp.maximum(v, 0.0)
    Cin, Cout = x.shape[1], params["w_up"].shape[0]

    h = conv(x, params["w_down"], params["b_down"], "VALID")
    if use_bn:
        h = bn(h, params["gamma0"], params["beta0"])
    h = relu(h)
    h = conv(h, params["w_conv"], params["b_conv"], [(1, 1), (1, 1)])
    if use_bn:
        h = bn(h, params["gamma1"], params["beta1"])
    h = relu(h)
    h = conv(h, params["w_up"], params["b_up"], "VALID")
    if Cin != Cout:
        h = h + conv(x, params["w_trans"], params["b_trans"], "VALID")
    else:
        h = h + x
    if use_bn:
        h = bn(h, params["gamma2"], params["beta2"])
    return relu(h)


# ----------------------------------------------------------------------------
# Deterministic parameter init (shapes follow the nn.Module __init__)
# ----------------------------------------------------------------------------
def init_params(key, cin, cmid, cout):
    ks = jax.random.split(key, 16)

    def u(k, shape, fan_in):
        bound = 1.0 / jnp.sqrt(float(fan_in))
        return jax.random.uniform(k, shape, jnp.float32, -bound, bound)

    params = {
        "w_down": u(ks[0], (cmid, cin, 1, 1), cin),
        "b_down": u(ks[1], (cmid,), cin),
        "w_conv": u(ks[2], (cmid, cmid, 3, 3), cmid * 9),
        "b_conv": u(ks[3], (cmid,), cmid * 9),
        "w_up":   u(ks[4], (cout, cmid, 1, 1), cmid),
        "b_up":   u(ks[5], (cout,), cmid),
        "gamma0": 1.0 + 0.1 * jax.random.normal(ks[6], (cmid,), jnp.float32),
        "beta0":  0.1 * jax.random.normal(ks[7], (cmid,), jnp.float32),
        "gamma1": 1.0 + 0.1 * jax.random.normal(ks[8], (cmid,), jnp.float32),
        "beta1":  0.1 * jax.random.normal(ks[9], (cmid,), jnp.float32),
        "gamma2": 1.0 + 0.1 * jax.random.normal(ks[10], (cout,), jnp.float32),
        "beta2":  0.1 * jax.random.normal(ks[11], (cout,), jnp.float32),
    }
    if cin != cout:
        params["w_trans"] = u(ks[12], (cout, cin, 1, 1), cin)
        params["b_trans"] = u(ks[13], (cout,), cin)
    return params


if __name__ == "__main__":
    key = jax.random.PRNGKey(0)
    k_p1, k_x1, k_p2, k_x2 = jax.random.split(key, 4)

    # Matmuls (and the identity/trans residual) run single-pass bf16 on the
    # MXU while the reference is f32 HIGHEST; across three conv(+BN) stages
    # this budgets a few bf16 ulps of divergence.
    TOL = 5e-2

    # config 1: input_channels != out_channels (trans path), BN on
    N, Cin, H, W = 2, 4, 16, 16
    Cmid, Cout = 8, 16
    params1 = init_params(k_p1, Cin, Cmid, Cout)
    x1 = jax.random.normal(k_x1, (N, Cin, H, W), jnp.float32)
    fwd1 = jax.jit(functools.partial(residual_forward, use_bn=True))
    out1 = jax.block_until_ready(fwd1(x1, params1))
    ref1 = reference_forward(x1, params1, use_bn=True)
    assert out1.shape == (N, Cout, H, W), out1.shape
    assert jnp.allclose(out1, ref1, atol=TOL, rtol=TOL), \
        float(jnp.max(jnp.abs(out1 - ref1)))

    # config 2: input_channels == out_channels (identity residual), BN off
    Cin2 = Cout2 = 8
    params2 = init_params(k_p2, Cin2, Cmid, Cout2)
    x2 = jax.random.normal(k_x2, (N, Cin2, H, W), jnp.float32)
    fwd2 = jax.jit(functools.partial(residual_forward, use_bn=False))
    out2 = jax.block_until_ready(fwd2(x2, params2))
    ref2 = reference_forward(x2, params2, use_bn=False)
    assert out2.shape == (N, Cout2, H, W), out2.shape
    assert jnp.allclose(out2, ref2, atol=TOL, rtol=TOL), \
        float(jnp.max(jnp.abs(out2 - ref2)))

    print("KERNEL_OK")
</pallas_src>

<mosaic_0001>
module attributes {stable_mosaic.version = 11 : i64} {
  func.func @_stage1_kernel(%arg0: i32, %arg1: memref<256x4xf32, #tpu.memory_space<vmem>>, %arg2: memref<4x128xbf16, #tpu.memory_space<vmem>>, %arg3: memref<1x2x128xf32, #tpu.memory_space<vmem>>) attributes {dimension_semantics = [#tpu.dimension_semantics<parallel>], iteration_bounds = array<i64: 2>, scalar_prefetch = 0 : i64, scratch_operands = 0 : i64, tpu.core_type = #tpu.core_type<tc>, window_params = [{transform_indices = @transform_0, window_bounds = array<i64: 256, 4>}, {pipeline_mode = #tpu.pipeline_mode<synchronous>, transform_indices = @transform_1, window_bounds = array<i64: 4, 128>}, {transform_indices = @transform_2, window_bounds = array<i64: 1, 2, 128>}]} {
    %c0 = arith.constant 0 : index
    %c0_0 = arith.constant 0 : index
    %0 = vector.load %arg1[%c0, %c0_0] : memref<256x4xf32, #tpu.memory_space<vmem>>, vector<256x4xf32>
    %1 = arith.truncf %0 : vector<256x4xf32> to vector<256x4xbf16>
    %c0_1 = arith.constant 0 : index
    %c0_2 = arith.constant 0 : index
    %2 = vector.load %arg2[%c0_1, %c0_2] : memref<4x128xbf16, #tpu.memory_space<vmem>>, vector<4x128xbf16>
    %cst = arith.constant dense<0.000000e+00> : vector<256x128xf32>
    %3 = tpu.matmul %1, %2, %cst {dimension_numbers = #tpu.dot_dimension_numbers<[1], [0], [0], [1], [0, 0, 1, 1], [], []>} : vector<256x4xbf16>, vector<4x128xbf16>, vector<256x128xf32> -> vector<256x128xf32>
    %cst_3 = arith.constant dense<0.000000e+00> : vector<128xf32>
    %4 = vector.multi_reduction <add>, %3, %cst_3 [0] : vector<256x128xf32> to vector<128xf32>
    %5 = vector.shape_cast %4 : vector<128xf32> to vector<1x128xf32>
    %c0_4 = arith.constant 0 : index
    %c0_5 = arith.constant 0 : index
    %c0_6 = arith.constant 0 : index
    %6 = vector.load %arg3[%c0_4, %c0_5, %c0_6] : memref<1x2x128xf32, #tpu.memory_space<vmem>>, vector<1x1x128xf32>
    %7 = vector.shape_cast %6 : vector<1x1x128xf32> to vector<1x128xf32>
    %8 = vector.shape_cast %5 : vector<1x128xf32> to vector<1x1x128xf32>
    tpu.vector_store %arg3[%c0_4, %c0_5, %c0_6], %8 {strides = array<i32>} : memref<1x2x128xf32, #tpu.memory_space<vmem>>, vector<1x1x128xf32>,
    %9 = arith.mulf %3, %3 : vector<256x128xf32>
    %cst_7 = arith.constant dense<0.000000e+00> : vector<128xf32>
    %10 = vector.multi_reduction <add>, %9, %cst_7 [0] : vector<256x128xf32> to vector<128xf32>
    %11 = vector.shape_cast %10 : vector<128xf32> to vector<1x128xf32>
    %c0_8 = arith.constant 0 : index
    %c1 = arith.constant 1 : index
    %c0_9 = arith.constant 0 : index
    %12 = vector.load %arg3[%c0_8, %c1, %c0_9] : memref<1x2x128xf32, #tpu.memory_space<vmem>>, vector<1x1x128xf32>
    %13 = vector.shape_cast %12 : vector<1x1x128xf32> to vector<1x128xf32>
    %14 = vector.shape_cast %11 : vector<1x128xf32> to vector<1x1x128xf32>
    tpu.vector_store %arg3[%c0_8, %c1, %c0_9], %14 {strides = array<i32>} : memref<1x2x128xf32, #tpu.memory_space<vmem>>, vector<1x1x128xf32>,
    return
  }
  func.func @transform_0(%arg0: i32) -> (i32, i32) {
    %c0_i32 = arith.constant 0 : i32
    %c0_i32_0 = arith.constant 0 : i32
    return %arg0, %c0_i32 : i32, i32
  }
  func.func @transform_1(%arg0: i32) -> (i32, i32) {
    %c0_i32 = arith.constant 0 : i32
    %c0_i32_0 = arith.constant 0 : i32
    %c0_i32_1 = arith.constant 0 : i32
    return %c0_i32, %c0_i32_0 : i32, i32
  }
  func.func @transform_2(%arg0: i32) -> (i32, i32, i32) {
    %c0_i32 = arith.constant 0 : i32
    %c0_i32_0 = arith.constant 0 : i32
    %c0_i32_1 = arith.constant 0 : i32
    return %arg0, %c0_i32, %c0_i32_0 : i32, i32, i32
  }
}

module attributes {stable_mosaic.version = 11 : i64} {
  func.func @_stage2_kernel(%arg0: i32, %arg1: memref<256x4xf32, #tpu.memory_space<vmem>>, %arg2: memref<4x128xbf16, #tpu.memory_space<vmem>>, %arg3: memref<9x128x128xbf16, #tpu.memory_space<vmem>>, %arg4: memref<1x128xf32, #tpu.memory_space<vmem>>, %arg5: memref<1x128xf32, #tpu.memory_space<vmem>>, %arg6: memref<256x128xf32, #tpu.memory_space<vmem>>, %arg7: memref<1x2x128xf32, #tpu.memory_space<vmem>>, %arg8: memref<288x128xbf16, #tpu.memory_space<vmem>>, %arg9: memref<288x128xbf16, #tpu.memory_space<vmem>>, %arg10: memref<288x128xbf16, #tpu.memory_space<vmem>>) attributes {dimension_semantics = [#tpu.dimension_semantics<parallel>], iteration_bounds = array<i64: 2>, scalar_prefetch = 0 : i64, scratch_operands = 3 : i64, tpu.core_type = #tpu.core_type<tc>, window_params = [{transform_indices = @transform_0, window_bounds = array<i64: 256, 4>}, {pipeline_mode = #tpu.pipeline_mode<synchronous>, transform_indices = @transform_1, window_bounds = array<i64: 4, 128>}, {pipeline_mode = #tpu.pipeline_mode<synchronous>, transform_indices = @transform_2, window_bounds = array<i64: 9, 128, 128>}, {pipeline_mode = #tpu.pipeline_mode<synchronous>, transform_indices = @transform_3, window_bounds = array<i64: 1, 128>}, {pipeline_mode = #tpu.pipeline_mode<synchronous>, transform_indices = @transform_4, window_bounds = array<i64: 1, 128>}, {transform_indices = @transform_5, window_bounds = array<i64: 256, 128>}, {transform_indices = @transform_6, window_bounds = array<i64: 1, 2, 128>}]} {
    %c0 = arith.constant 0 : index
    %c0_0 = arith.constant 0 : index
    %0 = vector.load %arg1[%c0, %c0_0] : memref<256x4xf32, #tpu.memory_space<vmem>>, vector<256x4xf32>
    %1 = arith.truncf %0 : vector<256x4xf32> to vector<256x4xbf16>
    %c0_1 = arith.constant 0 : index
    %c0_2 = arith.constant 0 : index
    %2 = vector.load %arg2[%c0_1, %c0_2] : memref<4x128xbf16, #tpu.memory_space<vmem>>, vector<4x128xbf16>
    %cst = arith.constant dense<0.000000e+00> : vector<256x128xf32>
    %3 = tpu.matmul %1, %2, %cst {dimension_numbers = #tpu.dot_dimension_numbers<[1], [0], [0], [1], [0, 0, 1, 1], [], []>} : vector<256x4xbf16>, vector<4x128xbf16>, vector<256x128xf32> -> vector<256x128xf32>
    %c0_3 = arith.constant 0 : index
    %c0_4 = arith.constant 0 : index
    %4 = vector.load %arg4[%c0_3, %c0_4] : memref<1x128xf32, #tpu.memory_space<vmem>>, vector<1x128xf32>
    %5 = vector.broadcast %4 : vector<1x128xf32> to vector<256x128xf32>
    %6 = arith.mulf %3, %5 : vector<256x128xf32>
    %c0_5 = arith.constant 0 : index
    %c0_6 = arith.constant 0 : index
    %7 = vector.load %arg5[%c0_5, %c0_6] : memref<1x128xf32, #tpu.memory_space<vmem>>, vector<1x128xf32>
    %8 = vector.broadcast %7 : vector<1x128xf32> to vector<256x128xf32>
    %9 = arith.addf %6, %8 : vector<256x128xf32>
    %cst_7 = arith.constant 0.000000e+00 : f32
    %10 = vector.broadcast %cst_7 : f32 to vector<256x128xf32>
    %11 = arith.maximumf %9, %10 : vector<256x128xf32>
    %12 = tpu.iota {dimensions = array<i32: 0>} : vector<256x1xi32>
    %c16_i32 = arith.constant 16 : i32
    %c0_i32 = arith.constant 0 : i32
    %13 = arith.cmpi eq, %c16_i32, %c0_i32 : i32
    %c1_i32 = arith.constant 1 : i32
    %14 = arith.select %13, %c1_i32, %c16_i32 : i32
    %15 = vector.broadcast %14 : i32 to vector<256x1xi32>
    %16 = arith.remsi %12, %15 : vector<256x1xi32>
    %c0_i32_8 = arith.constant 0 : i32
    %17 = vector.broadcast %c0_i32_8 : i32 to vector<256x1xi32>
    %18 = arith.cmpi ne, %16, %17 : vector<256x1xi32>
    %c0_i32_9 = arith.constant 0 : i32
    %19 = vector.broadcast %c0_i32_9 : i32 to vector<256x1xi32>
    %20 = arith.cmpi slt, %16, %19 : vector<256x1xi32>
    %c0_i32_10 = arith.constant 0 : i32
    %21 = arith.cmpi slt, %14, %c0_i32_10 : i32
    %22 = vector.broadcast %21 : i1 to vector<256x1xi1>
    %23 = vector.broadcast %22 : vector<256x1xi1> to vector<256x1xi1>
    %24 = arith.xori %20, %23 : vector<256x1xi1>
    %25 = arith.andi %24, %18 : vector<256x1xi1>
    %26 = vector.broadcast %14 : i32 to vector<256x1xi32>
    %27 = arith.addi %16, %26 : vector<256x1xi32>
    %28 = arith.select %25, %27, %16 : vector<256x1xi1>, vector<256x1xi32>
    %c1_i32_11 = arith.constant 1 : i32
    %29 = vector.broadcast %c1_i32_11 : i32 to vector<256x1xi32>
    %30 = arith.cmpi sge, %28, %29 : vector<256x1xi32>
    %c1_i32_12 = arith.constant 1 : i32
    %31 = tpu.dynamic_rotate %11 by %c1_i32_12 dim 0 : vector<256x128xf32>, i32 -> vector<256x128xf32>
    %cst_13 = arith.constant 0.000000e+00 : f32
    %32 = vector.shape_cast %30 : vector<256x1xi1> to vector<256x1xi1>
    %33 = vector.broadcast %32 : vector<256x1xi1> to vector<256x128xi1>
    %34 = vector.broadcast %cst_13 : f32 to vector<256x128xf32>
    %35 = arith.select %33, %31, %34 : vector<256x128xi1>, vector<256x128xf32>
    %c14_i32 = arith.constant 14 : i32
    %36 = vector.broadcast %c14_i32 : i32 to vector<256x1xi32>
    %37 = arith.cmpi sle, %28, %36 : vector<256x1xi32>
    %c255_i32 = arith.constant 255 : i32
    %38 = tpu.dynamic_rotate %11 by %c255_i32 dim 0 : vector<256x128xf32>, i32 -> vector<256x128xf32>
    %cst_14 = arith.constant 0.000000e+00 : f32
    %39 = vector.shape_cast %37 : vector<256x1xi1> to vector<256x1xi1>
    %40 = vector.broadcast %39 : vector<256x1xi1> to vector<256x128xi1>
    %41 = vector.broadcast %cst_14 : f32 to vector<256x128xf32>
    %42 = arith.select %40, %38, %41 : vector<256x128xi1>, vector<256x128xf32>
    %cst_15 = arith.constant 0.000000e+00 : bf16
    %43 = vector.broadcast %cst_15 : bf16 to vector<16x128xbf16>
    %c0_16 = arith.constant 0 : index
    %c0_17 = arith.constant 0 : index
    %44 = vector.load %arg8[%c0_16, %c0_17] : memref<288x128xbf16, #tpu.memory_space<vmem>>, vector<16x128xbf16>
    tpu.vector_store %arg8[%c0_16, %c0_17], %43 {strides = array<i32>} : memref<288x128xbf16, #tpu.memory_space<vmem>>, vector<16x128xbf16>,
    %c272 = arith.constant 272 : index
    %c0_18 = arith.constant 0 : index
    %45 = vector.load %arg8[%c272, %c0_18] : memref<288x128xbf16, #tpu.memory_space<vmem>>, vector<16x128xbf16>
    tpu.vector_store %arg8[%c272, %c0_18], %43 {strides = array<i32>} : memref<288x128xbf16, #tpu.memory_space<vmem>>, vector<16x128xbf16>,
    %46 = arith.truncf %11 : vector<256x128xf32> to vector<256x128xbf16>
    %c16 = arith.constant 16 : index
    %c0_19 = arith.constant 0 : index
    %47 = vector.load %arg8[%c16, %c0_19] : memref<288x128xbf16, #tpu.memory_space<vmem>>, vector<256x128xbf16>
    tpu.vector_store %arg8[%c16, %c0_19], %46 {strides = array<i32>} : memref<288x128xbf16, #tpu.memory_space<vmem>>, vector<256x128xbf16>,
    %c0_20 = arith.constant 0 : index
    %c0_21 = arith.constant 0 : index
    %48 = vector.load %arg9[%c0_20, %c0_21] : memref<288x128xbf16, #tpu.memory_space<vmem>>, vector<16x128xbf16>
    tpu.vector_store %arg9[%c0_20, %c0_21], %43 {strides = array<i32>} : memref<288x128xbf16, #tpu.memory_space<vmem>>, vector<16x128xbf16>,
    %c272_22 = arith.constant 272 : index
    %c0_23 = arith.constant 0 : index
    %49 = vector.load %arg9[%c272_22, %c0_23] : memref<288x128xbf16, #tpu.memory_space<vmem>>, vector<16x128xbf16>
    tpu.vector_store %arg9[%c272_22, %c0_23], %43 {strides = array<i32>} : memref<288x128xbf16, #tpu.memory_space<vmem>>, vector<16x128xbf16>,
    %50 = arith.truncf %35 : vector<256x128xf32> to vector<256x128xbf16>
    %c16_24 = arith.constant 16 : index
    %c0_25 = arith.constant 0 : index
    %51 = vector.load %arg9[%c16_24, %c0_25] : memref<288x128xbf16, #tpu.memory_space<vmem>>, vector<256x128xbf16>
    tpu.vector_store %arg9[%c16_24, %c0_25], %50 {strides = array<i32>} : memref<288x128xbf16, #tpu.memory_space<vmem>>, vector<256x128xbf16>,
    %c0_26 = arith.constant 0 : index
    %c0_27 = arith.constant 0 : index
    %52 = vector.load %arg10[%c0_26, %c0_27] : memref<288x128xbf16, #tpu.memory_space<vmem>>, vector<16x128xbf16>
    tpu.vector_store %arg10[%c0_26, %c0_27], %43 {strides = array<i32>} : memref<288x128xbf16, #tpu.memory_space<vmem>>, vector<16x128xbf16>,
    %c272_28 = arith.constant 272 : index
    %c0_29 = arith.constant 0 : index
    %53 = vector.load %arg10[%c272_28, %c0_29] : memref<288x128xbf16, #tpu.memory_space<vmem>>, vector<16x128xbf16>
    tpu.vector_store %arg10[%c272_28, %c0_29], %43 {strides = array<i32>} : memref<288x128xbf16, #tpu.memory_space<vmem>>, vector<16x128xbf16>,
    %54 = arith.truncf %42 : vector<256x128xf32> to vector<256x128xbf16>
    %c16_30 = arith.constant 16 : index
    %c0_31 = arith.constant 0 : index
    %55 = vector.load %arg10[%c16_30, %c0_31] : memref<288x128xbf16, #tpu.memory_space<vmem>>, vector<256x128xbf16>
    tpu.vector_store %arg10[%c16_30, %c0_31], %54 {strides = array<i32>} : memref<288x128xbf16, #tpu.memory_space<vmem>>, vector<256x128xbf16>,
    %cst_32 = arith.constant 0.000000e+00 : f32
    %56 = vector.broadcast %cst_32 : f32 to vector<256x128xf32>
    %c0_33 = arith.constant 0 : index
    %c0_34 = arith.constant 0 : index
    %57 = vector.load %arg9[%c0_33, %c0_34] : memref<288x128xbf16, #tpu.memory_space<vmem>>, vector<256x128xbf16>
    %c0_35 = arith.constant 0 : index
    %c0_36 = arith.constant 0 : index
    %c0_37 = arith.constant 0 : index
    %58 = vector.load %arg3[%c0_35, %c0_36, %c0_37] : memref<9x128x128xbf16, #tpu.memory_space<vmem>>, vector<1x128x128xbf16>
    %59 = vector.shape_cast %58 : vector<1x128x128xbf16> to vector<128x128xbf16>
    %cst_38 = arith.constant dense<0.000000e+00> : vector<256x128xf32>
    %60 = tpu.matmul %57, %59, %cst_38 {dimension_numbers = #tpu.dot_dimension_numbers<[1], [0], [0], [1], [0, 0, 1, 1], [], []>} : vector<256x128xbf16>, vector<128x128xbf16>, vector<256x128xf32> -> vector<256x128xf32>
    %61 = arith.addf %56, %60 : vector<256x128xf32>
    %c0_39 = arith.constant 0 : index
    %c0_40 = arith.constant 0 : index
    %62 = vector.load %arg8[%c0_39, %c0_40] : memref<288x128xbf16, #tpu.memory_space<vmem>>, vector<256x128xbf16>
    %c1 = arith.constant 1 : index
    %c0_41 = arith.constant 0 : index
    %c0_42 = arith.constant 0 : index
    %63 = vector.load %arg3[%c1, %c0_41, %c0_42] : memref<9x128x128xbf16, #tpu.memory_space<vmem>>, vector<1x128x128xbf16>
    %64 = vector.shape_cast %63 : vector<1x128x128xbf16> to vector<128x128xbf16>
    %cst_43 = arith.constant dense<0.000000e+00> : vector<256x128xf32>
    %65 = tpu.matmul %62, %64, %cst_43 {dimension_numbers = #tpu.dot_dimension_numbers<[1], [0], [0], [1], [0, 0, 1, 1], [], []>} : vector<256x128xbf16>, vector<128x128xbf16>, vector<256x128xf32> -> vector<256x128xf32>
    %66 = arith.addf %61, %65 : vector<256x128xf32>
    %c0_44 = arith.constant 0 : index
    %c0_45 = arith.constant 0 : index
    %67 = vector.load %arg10[%c0_44, %c0_45] : memref<288x128xbf16, #tpu.memory_space<vmem>>, vector<256x128xbf16>
    %c2 = arith.constant 2 : index
    %c0_46 = arith.constant 0 : index
    %c0_47 = arith.constant 0 : index
    %68 = vector.load %arg3[%c2, %c0_46, %c0_47] : memref<9x128x128xbf16, #tpu.memory_space<vmem>>, vector<1x128x128xbf16>
    %69 = vector.shape_cast %68 : vector<1x128x128xbf16> to vector<128x128xbf16>
    %cst_48 = arith.constant dense<0.000000e+00> : vector<256x128xf32>
    %70 = tpu.matmul %67, %69, %cst_48 {dimension_numbers = #tpu.dot_dimension_numbers<[1], [0], [0], [1], [0, 0, 1, 1], [], []>} : vector<256x128xbf16>, vector<128x128xbf16>, vector<256x128xf32> -> vector<256x128xf32>
    %71 = arith.addf %66, %70 : vector<256x128xf32>
    %c16_49 = arith.constant 16 : index
    %c0_50 = arith.constant 0 : index
    %72 = vector.load %arg9[%c16_49, %c0_50] : memref<288x128xbf16, #tpu.memory_space<vmem>>, vector<256x128xbf16>
    %c3 = arith.constant 3 : index
    %c0_51 = arith.constant 0 : index
    %c0_52 = arith.constant 0 : index
    %73 = vector.load %arg3[%c3, %c0_51, %c0_52] : memref<9x128x128xbf16, #tpu.memory_space<vmem>>, vector<1x128x128xbf16>
    %74 = vector.shape_cast %73 : vector<1x128x128xbf16> to vector<128x128xbf16>
    %cst_53 = arith.constant dense<0.000000e+00> : vector<256x128xf32>
    %75 = tpu.matmul %72, %74, %cst_53 {dimension_numbers = #tpu.dot_dimension_numbers<[1], [0], [0], [1], [0, 0, 1, 1], [], []>} : vector<256x128xbf16>, vector<128x128xbf16>, vector<256x128xf32> -> vector<256x128xf32>
    %76 = arith.addf %71, %75 : vector<256x128xf32>
    %c16_54 = arith.constant 16 : index
    %c0_55 = arith.constant 0 : index
    %77 = vector.load %arg8[%c16_54, %c0_55] : memref<288x128xbf16, #tpu.memory_space<vmem>>, vector<256x128xbf16>
    %c4 = arith.constant 4 : index
    %c0_56 = arith.constant 0 : index
    %c0_57 = arith.constant 0 : index
    %78 = vector.load %arg3[%c4, %c0_56, %c0_57] : memref<9x128x128xbf16, #tpu.memory_space<vmem>>, vector<1x128x128xbf16>
    %79 = vector.shape_cast %78 : vector<1x128x128xbf16> to vector<128x128xbf16>
    %cst_58 = arith.constant dense<0.000000e+00> : vector<256x128xf32>
    %80 = tpu.matmul %77, %79, %cst_58 {dimension_numbers = #tpu.dot_dimension_numbers<[1], [0], [0], [1], [0, 0, 1, 1], [], []>} : vector<256x128xbf16>, vector<128x128xbf16>, vector<256x128xf32> -> vector<256x128xf32>
    %81 = arith.addf %76, %80 : vector<256x128xf32>
    %c16_59 = arith.constant 16 : index
    %c0_60 = arith.constant 0 : index
    %82 = vector.load %arg10[%c16_59, %c0_60] : memref<288x128xbf16, #tpu.memory_space<vmem>>, vector<256x128xbf16>
    %c5 = arith.constant 5 : index
    %c0_61 = arith.constant 0 : index
    %c0_62 = arith.constant 0 : index
    %83 = vector.load %arg3[%c5, %c0_61, %c0_62] : memref<9x128x128xbf16, #tpu.memory_space<vmem>>, vector<1x128x128xbf16>
    %84 = vector.shape_cast %83 : vector<1x128x128xbf16> to vector<128x128xbf16>
    %cst_63 = arith.constant dense<0.000000e+00> : vector<256x128xf32>
    %85 = tpu.matmul %82, %84, %cst_63 {dimension_numbers = #tpu.dot_dimension_numbers<[1], [0], [0], [1], [0, 0, 1, 1], [], []>} : vector<256x128xbf16>, vector<128x128xbf16>, vector<256x128xf32> -> vector<256x128xf32>
    %86 = arith.addf %81, %85 : vector<256x128xf32>
    %c32 = arith.constant 32 : index
    %c0_64 = arith.constant 0 : index
    %87 = vector.load %arg9[%c32, %c0_64] : memref<288x128xbf16, #tpu.memory_space<vmem>>, vector<256x128xbf16>
    %c6 = arith.constant 6 : index
    %c0_65 = arith.constant 0 : index
    %c0_66 = arith.constant 0 : index
    %88 = vector.load %arg3[%c6, %c0_65, %c0_66] : memref<9x128x128xbf16, #tpu.memory_space<vmem>>, vector<1x128x128xbf16>
    %89 = vector.shape_cast %88 : vector<1x128x128xbf16> to vector<128x128xbf16>
    %cst_67 = arith.constant dense<0.000000e+00> : vector<256x128xf32>
    %90 = tpu.matmul %87, %89, %cst_67 {dimension_numbers = #tpu.dot_dimension_numbers<[1], [0], [0], [1], [0, 0, 1, 1], [], []>} : vector<256x128xbf16>, vector<128x128xbf16>, vector<256x128xf32> -> vector<256x128xf32>
    %91 = arith.addf %86, %90 : vector<256x128xf32>
    %c32_68 = arith.constant 32 : index
    %c0_69 = arith.constant 0 : index
    %92 = vector.load %arg8[%c32_68, %c0_69] : memref<288x128xbf16, #tpu.memory_space<vmem>>, vector<256x128xbf16>
    %c7 = arith.constant 7 : index
    %c0_70 = arith.constant 0 : index
    %c0_71 = arith.constant 0 : index
    %93 = vector.load %arg3[%c7, %c0_70, %c0_71] : memref<9x128x128xbf16, #tpu.memory_space<vmem>>, vector<1x128x128xbf16>
    %94 = vector.shape_cast %93 : vector<1x128x128xbf16> to vector<128x128xbf16>
    %cst_72 = arith.constant dense<0.000000e+00> : vector<256x128xf32>
    %95 = tpu.matmul %92, %94, %cst_72 {dimension_numbers = #tpu.dot_dimension_numbers<[1], [0], [0], [1], [0, 0, 1, 1], [], []>} : vector<256x128xbf16>, vector<128x128xbf16>, vector<256x128xf32> -> vector<256x128xf32>
    %96 = arith.addf %91, %95 : vector<256x128xf32>
    %c32_73 = arith.constant 32 : index
    %c0_74 = arith.constant 0 : index
    %97 = vector.load %arg10[%c32_73, %c0_74] : memref<288x128xbf16, #tpu.memory_space<vmem>>, vector<256x128xbf16>
    %c8 = arith.constant 8 : index
    %c0_75 = arith.constant 0 : index
    %c0_76 = arith.constant 0 : index
    %98 = vector.load %arg3[%c8, %c0_75, %c0_76] : memref<9x128x128xbf16, #tpu.memory_space<vmem>>, vector<1x128x128xbf16>
    %99 = vector.shape_cast %98 : vector<1x128x128xbf16> to vector<128x128xbf16>
    %cst_77 = arith.constant dense<0.000000e+00> : vector<256x128xf32>
    %100 = tpu.matmul %97, %99, %cst_77 {dimension_numbers = #tpu.dot_dimension_numbers<[1], [0], [0], [1], [0, 0, 1, 1], [], []>} : vector<256x128xbf16>, vector<128x128xbf16>, vector<256x128xf32> -> vector<256x128xf32>
    %101 = arith.addf %96, %100 : vector<256x128xf32>
    %c0_78 = arith.constant 0 : index
    %c0_79 = arith.constant 0 : index
    %102 = vector.load %arg6[%c0_78, %c0_79] : memref<256x128xf32, #tpu.memory_space<vmem>>, vector<256x128xf32>
    tpu.vector_store %arg6[%c0_78, %c0_79], %101 {strides = array<i32>} : memref<256x128xf32, #tpu.memory_space<vmem>>, vector<256x128xf32>,
    %cst_80 = arith.constant dense<0.000000e+00> : vector<128xf32>
    %103 = vector.multi_reduction <add>, %101, %cst_80 [0] : vector<256x128xf32> to vector<128xf32>
    %104 = vector.shape_cast %103 : vector<128xf32> to vector<1x128xf32>
    %c0_81 = arith.constant 0 : index
    %c0_82 = arith.constant 0 : index
    %c0_83 = arith.constant 0 : index
    %105 = vector.load %arg7[%c0_81, %c0_82, %c0_83] : memref<1x2x128xf32, #tpu.memory_space<vmem>>, vector<1x1x128xf32>
    %106 = vector.shape_cast %105 : vector<1x1x128xf32> to vector<1x128xf32>
    %107 = vector.shape_cast %104 : vector<1x128xf32> to vector<1x1x128xf32>
    tpu.vector_store %arg7[%c0_81, %c0_82, %c0_83], %107 {strides = array<i32>} : memref<1x2x128xf32, #tpu.memory_space<vmem>>, vector<1x1x128xf32>,
    %108 = arith.mulf %101, %101 : vector<256x128xf32>
    %cst_84 = arith.constant dense<0.000000e+00> : vector<128xf32>
    %109 = vector.multi_reduction <add>, %108, %cst_84 [0] : vector<256x128xf32> to vector<128xf32>
    %110 = vector.shape_cast %109 : vector<128xf32> to vector<1x128xf32>
    %c0_85 = arith.constant 0 : index
    %c1_86 = arith.constant 1 : index
    %c0_87 = arith.constant 0 : index
    %111 = vector.load %arg7[%c0_85, %c1_86, %c0_87] : memref<1x2x128xf32, #tpu.memory_space<vmem>>, vector<1x1x128xf32>
    %112 = vector.shape_cast %111 : vector<1x1x128xf32> to vector<1x128xf32>
    %113 = vector.shape_cast %110 : vector<1x128xf32> to vector<1x1x128xf32>
    tpu.vector_store %arg7[%c0_85, %c1_86, %c0_87], %113 {strides = array<i32>} : memref<1x2x128xf32, #tpu.memory_space<vmem>>, vector<1x1x128xf32>,
    return
  }
  func.func @transform_0(%arg0: i32) -> (i32, i32) {
    %c0_i32 = arith.constant 0 : i32
    %c0_i32_0 = arith.constant 0 : i32
    return %arg0, %c0_i32 : i32, i32
  }
  func.func @transform_1(%arg0: i32) -> (i32, i32) {
    %c0_i32 = arith.constant 0 : i32
    %c0_i32_0 = arith.constant 0 : i32
    %c0_i32_1 = arith.constant 0 : i32
    return %c0_i32, %c0_i32_0 : i32, i32
  }
  func.func @transform_2(%arg0: i32) -> (i32, i32, i32) {
    %c0_i32 = arith.constant 0 : i32
    %c0_i32_0 = arith.constant 0 : i32
    %c0_i32_1 = arith.constant 0 : i32
    %c0_i32_2 = arith.constant 0 : i32
    return %c0_i32, %c0_i32_0, %c0_i32_1 : i32, i32, i32
  }
  func.func @transform_3(%arg0: i32) -> (i32, i32) {
    %c0_i32 = arith.constant 0 : i32
    %c0_i32_0 = arith.constant 0 : i32
    %c0_i32_1 = arith.constant 0 : i32
    return %c0_i32, %c0_i32_0 : i32, i32
  }
  func.func @transform_4(%arg0: i32) -> (i32, i32) {
    %c0_i32 = arith.constant 0 : i32
    %c0_i32_0 = arith.constant 0 : i32
    %c0_i32_1 = arith.constant 0 : i32
    return %c0_i32, %c0_i32_0 : i32, i32
  }
  func.func @transform_5(%arg0: i32) -> (i32, i32) {
    %c0_i32 = arith.constant 0 : i32
    %c0_i32_0 = arith.constant 0 : i32
    return %arg0, %c0_i32 : i32, i32
  }
  func.func @transform_6(%arg0: i32) -> (i32, i32, i32) {
    %c0_i32 = arith.constant 0 : i32
    %c0_i32_0 = arith.constant 0 : i32
    %c0_i32_1 = arith.constant 0 : i32
    return %arg0, %c0_i32, %c0_i32_0 : i32, i32, i32
  }
}

module attributes {stable_mosaic.version = 11 : i64} {
  func.func @_stage3_kernel(%arg0: i32, %arg1: memref<256x128xf32, #tpu.memory_space<vmem>>, %arg2: memref<256x4xf32, #tpu.memory_space<vmem>>, %arg3: memref<128x128xbf16, #tpu.memory_space<vmem>>, %arg4: memref<4x128xbf16, #tpu.memory_space<vmem>>, %arg5: memref<1x128xf32, #tpu.memory_space<vmem>>, %arg6: memref<1x128xf32, #tpu.memory_space<vmem>>, %arg7: memref<256x128xf32, #tpu.memory_space<vmem>>, %arg8: memref<1x2x128xf32, #tpu.memory_space<vmem>>) attributes {dimension_semantics = [#tpu.dimension_semantics<parallel>], iteration_bounds = array<i64: 2>, scalar_prefetch = 0 : i64, scratch_operands = 0 : i64, tpu.core_type = #tpu.core_type<tc>, window_params = [{transform_indices = @transform_0, window_bounds = array<i64: 256, 128>}, {transform_indices = @transform_1, window_bounds = array<i64: 256, 4>}, {pipeline_mode = #tpu.pipeline_mode<synchronous>, transform_indices = @transform_2, window_bounds = array<i64: 128, 128>}, {pipeline_mode = #tpu.pipeline_mode<synchronous>, transform_indices = @transform_3, window_bounds = array<i64: 4, 128>}, {pipeline_mode = #tpu.pipeline_mode<synchronous>, transform_indices = @transform_4, window_bounds = array<i64: 1, 128>}, {pipeline_mode = #tpu.pipeline_mode<synchronous>, transform_indices = @transform_5, window_bounds = array<i64: 1, 128>}, {transform_indices = @transform_6, window_bounds = array<i64: 256, 128>}, {transform_indices = @transform_7, window_bounds = array<i64: 1, 2, 128>}]} {
    %c0 = arith.constant 0 : index
    %c0_0 = arith.constant 0 : index
    %0 = vector.load %arg1[%c0, %c0_0] : memref<256x128xf32, #tpu.memory_space<vmem>>, vector<256x128xf32>
    %c0_1 = arith.constant 0 : index
    %c0_2 = arith.constant 0 : index
    %1 = vector.load %arg5[%c0_1, %c0_2] : memref<1x128xf32, #tpu.memory_space<vmem>>, vector<1x128xf32>
    %2 = vector.broadcast %1 : vector<1x128xf32> to vector<256x128xf32>
    %3 = arith.mulf %0, %2 : vector<256x128xf32>
    %c0_3 = arith.constant 0 : index
    %c0_4 = arith.constant 0 : index
    %4 = vector.load %arg6[%c0_3, %c0_4] : memref<1x128xf32, #tpu.memory_space<vmem>>, vector<1x128xf32>
    %5 = vector.broadcast %4 : vector<1x128xf32> to vector<256x128xf32>
    %6 = arith.addf %3, %5 : vector<256x128xf32>
    %cst = arith.constant 0.000000e+00 : f32
    %7 = vector.broadcast %cst : f32 to vector<256x128xf32>
    %8 = arith.maximumf %6, %7 : vector<256x128xf32>
    %9 = arith.truncf %8 : vector<256x128xf32> to vector<256x128xbf16>
    %c0_5 = arith.constant 0 : index
    %c0_6 = arith.constant 0 : index
    %10 = vector.load %arg3[%c0_5, %c0_6] : memref<128x128xbf16, #tpu.memory_space<vmem>>, vector<128x128xbf16>
    %cst_7 = arith.constant dense<0.000000e+00> : vector<256x128xf32>
    %11 = tpu.matmul %9, %10, %cst_7 {dimension_numbers = #tpu.dot_dimension_numbers<[1], [0], [0], [1], [0, 0, 1, 1], [], []>} : vector<256x128xbf16>, vector<128x128xbf16>, vector<256x128xf32> -> vector<256x128xf32>
    %c0_8 = arith.constant 0 : index
    %c0_9 = arith.constant 0 : index
    %12 = vector.load %arg2[%c0_8, %c0_9] : memref<256x4xf32, #tpu.memory_space<vmem>>, vector<256x4xf32>
    %13 = arith.truncf %12 : vector<256x4xf32> to vector<256x4xbf16>
    %c0_10 = arith.constant 0 : index
    %c0_11 = arith.constant 0 : index
    %14 = vector.load %arg4[%c0_10, %c0_11] : memref<4x128xbf16, #tpu.memory_space<vmem>>, vector<4x128xbf16>
    %cst_12 = arith.constant dense<0.000000e+00> : vector<256x128xf32>
    %15 = tpu.matmul %13, %14, %cst_12 {dimension_numbers = #tpu.dot_dimension_numbers<[1], [0], [0], [1], [0, 0, 1, 1], [], []>} : vector<256x4xbf16>, vector<4x128xbf16>, vector<256x128xf32> -> vector<256x128xf32>
    %16 = arith.addf %11, %15 : vector<256x128xf32>
    %c0_13 = arith.constant 0 : index
    %c0_14 = arith.constant 0 : index
    %17 = vector.load %arg7[%c0_13, %c0_14] : memref<256x128xf32, #tpu.memory_space<vmem>>, vector<256x128xf32>
    tpu.vector_store %arg7[%c0_13, %c0_14], %16 {strides = array<i32>} : memref<256x128xf32, #tpu.memory_space<vmem>>, vector<256x128xf32>,
    %cst_15 = arith.constant dense<0.000000e+00> : vector<128xf32>
    %18 = vector.multi_reduction <add>, %16, %cst_15 [0] : vector<256x128xf32> to vector<128xf32>
    %19 = vector.shape_cast %18 : vector<128xf32> to vector<1x128xf32>
    %c0_16 = arith.constant 0 : index
    %c0_17 = arith.constant 0 : index
    %c0_18 = arith.constant 0 : index
    %20 = vector.load %arg8[%c0_16, %c0_17, %c0_18] : memref<1x2x128xf32, #tpu.memory_space<vmem>>, vector<1x1x128xf32>
    %21 = vector.shape_cast %20 : vector<1x1x128xf32> to vector<1x128xf32>
    %22 = vector.shape_cast %19 : vector<1x128xf32> to vector<1x1x128xf32>
    tpu.vector_store %arg8[%c0_16, %c0_17, %c0_18], %22 {strides = array<i32>} : memref<1x2x128xf32, #tpu.memory_space<vmem>>, vector<1x1x128xf32>,
    %23 = arith.mulf %16, %16 : vector<256x128xf32>
    %cst_19 = arith.constant dense<0.000000e+00> : vector<128xf32>
    %24 = vector.multi_reduction <add>, %23, %cst_19 [0] : vector<256x128xf32> to vector<128xf32>
    %25 = vector.shape_cast %24 : vector<128xf32> to vector<1x128xf32>
    %c0_20 = arith.constant 0 : index
    %c1 = arith.constant 1 : index
    %c0_21 = arith.constant 0 : index
    %26 = vector.load %arg8[%c0_20, %c1, %c0_21] : memref<1x2x128xf32, #tpu.memory_space<vmem>>, vector<1x1x128xf32>
    %27 = vector.shape_cast %26 : vector<1x1x128xf32> to vector<1x128xf32>
    %28 = vector.shape_cast %25 : vector<1x128xf32> to vector<1x1x128xf32>
    tpu.vector_store %arg8[%c0_20, %c1, %c0_21], %28 {strides = array<i32>} : memref<1x2x128xf32, #tpu.memory_space<vmem>>, vector<1x1x128xf32>,
    return
  }
  func.func @transform_0(%arg0: i32) -> (i32, i32) {
    %c0_i32 = arith.constant 0 : i32
    %c0_i32_0 = arith.constant 0 : i32
    return %arg0, %c0_i32 : i32, i32
  }
  func.func @transform_1(%arg0: i32) -> (i32, i32) {
    %c0_i32 = arith.constant 0 : i32
    %c0_i32_0 = arith.constant 0 : i32
    return %arg0, %c0_i32 : i32, i32
  }
  func.func @transform_2(%arg0: i32) -> (i32, i32) {
    %c0_i32 = arith.constant 0 : i32
    %c0_i32_0 = arith.constant 0 : i32
    %c0_i32_1 = arith.constant 0 : i32
    return %c0_i32, %c0_i32_0 : i32, i32
  }
  func.func @transform_3(%arg0: i32) -> (i32, i32) {
    %c0_i32 = arith.constant 0 : i32
    %c0_i32_0 = arith.constant 0 : i32
    %c0_i32_1 = arith.constant 0 : i32
    return %c0_i32, %c0_i32_0 : i32, i32
  }
  func.func @transform_4(%arg0: i32) -> (i32, i32) {
    %c0_i32 = arith.constant 0 : i32
    %c0_i32_0 = arith.constant 0 : i32
    %c0_i32_1 = arith.constant 0 : i32
    return %c0_i32, %c0_i32_0 : i32, i32
  }
  func.func @transform_5(%arg0: i32) -> (i32, i32) {
    %c0_i32 = arith.constant 0 : i32
    %c0_i32_0 = arith.constant 0 : i32
    %c0_i32_1 = arith.constant 0 : i32
    return %c0_i32, %c0_i32_0 : i32, i32
  }
  func.func @transform_6(%arg0: i32) -> (i32, i32) {
    %c0_i32 = arith.constant 0 : i32
    %c0_i32_0 = arith.constant 0 : i32
    return %arg0, %c0_i32 : i32, i32
  }
  func.func @transform_7(%arg0: i32) -> (i32, i32, i32) {
    %c0_i32 = arith.constant 0 : i32
    %c0_i32_0 = arith.constant 0 : i32
    %c0_i32_1 = arith.constant 0 : i32
    return %arg0, %c0_i32, %c0_i32_0 : i32, i32, i32
  }
}

module attributes {stable_mosaic.version = 11 : i64} {
  func.func @_stage4_kernel(%arg0: i32, %arg1: memref<256x128xf32, #tpu.memory_space<vmem>>, %arg2: memref<1x128xf32, #tpu.memory_space<vmem>>, %arg3: memref<1x128xf32, #tpu.memory_space<vmem>>, %arg4: memref<256x16xf32, #tpu.memory_space<vmem>>) attributes {dimension_semantics = [#tpu.dimension_semantics<parallel>], iteration_bounds = array<i64: 2>, scalar_prefetch = 0 : i64, scratch_operands = 0 : i64, tpu.core_type = #tpu.core_type<tc>, window_params = [{transform_indices = @transform_0, window_bounds = array<i64: 256, 128>}, {pipeline_mode = #tpu.pipeline_mode<synchronous>, transform_indices = @transform_1, window_bounds = array<i64: 1, 128>}, {pipeline_mode = #tpu.pipeline_mode<synchronous>, transform_indices = @transform_2, window_bounds = array<i64: 1, 128>}, {transform_indices = @transform_3, window_bounds = array<i64: 256, 16>}]} {
    %c0 = arith.constant 0 : index
    %c0_0 = arith.constant 0 : index
    %0 = vector.load %arg1[%c0, %c0_0] : memref<256x128xf32, #tpu.memory_space<vmem>>, vector<256x128xf32>
    %c0_1 = arith.constant 0 : index
    %c0_2 = arith.constant 0 : index
    %1 = vector.load %arg2[%c0_1, %c0_2] : memref<1x128xf32, #tpu.memory_space<vmem>>, vector<1x128xf32>
    %2 = vector.broadcast %1 : vector<1x128xf32> to vector<256x128xf32>
    %3 = arith.mulf %0, %2 : vector<256x128xf32>
    %c0_3 = arith.constant 0 : index
    %c0_4 = arith.constant 0 : index
    %4 = vector.load %arg3[%c0_3, %c0_4] : memref<1x128xf32, #tpu.memory_space<vmem>>, vector<1x128xf32>
    %5 = vector.broadcast %4 : vector<1x128xf32> to vector<256x128xf32>
    %6 = arith.addf %3, %5 : vector<256x128xf32>
    %cst = arith.constant 0.000000e+00 : f32
    %7 = vector.broadcast %cst : f32 to vector<256x128xf32>
    %8 = arith.maximumf %6, %7 : vector<256x128xf32>
    %9 = vector.extract_strided_slice %8 {offsets = [0, 0], sizes = [256, 16], strides = [1, 1]} : vector<256x128xf32> to vector<256x16xf32>
    %c0_5 = arith.constant 0 : index
    %c0_6 = arith.constant 0 : index
    %10 = vector.load %arg4[%c0_5, %c0_6] : memref<256x16xf32, #tpu.memory_space<vmem>>, vector<256x16xf32>
    tpu.vector_store %arg4[%c0_5, %c0_6], %9 {strides = array<i32>} : memref<256x16xf32, #tpu.memory_space<vmem>>, vector<256x16xf32>,
    return
  }
  func.func @transform_0(%arg0: i32) -> (i32, i32) {
    %c0_i32 = arith.constant 0 : i32
    %c0_i32_0 = arith.constant 0 : i32
    return %arg0, %c0_i32 : i32, i32
  }
  func.func @transform_1(%arg0: i32) -> (i32, i32) {
    %c0_i32 = arith.constant 0 : i32
    %c0_i32_0 = arith.constant 0 : i32
    %c0_i32_1 = arith.constant 0 : i32
    return %c0_i32, %c0_i32_0 : i32, i32
  }
  func.func @transform_2(%arg0: i32) -> (i32, i32) {
    %c0_i32 = arith.constant 0 : i32
    %c0_i32_0 = arith.constant 0 : i32
    %c0_i32_1 = arith.constant 0 : i32
    return %c0_i32, %c0_i32_0 : i32, i32
  }
  func.func @transform_3(%arg0: i32) -> (i32, i32) {
    %c0_i32 = arith.constant 0 : i32
    %c0_i32_0 = arith.constant 0 : i32
    return %arg0, %c0_i32 : i32, i32
  }
}

</mosaic_0001>

<bundles_post_ra>
// kernel: residual_forward.4
= control target key start
LH: loop header
LB: loop body
LE: loop exit
PB: predicated region body
PF: predicated region fallthrough
CT: control target
= control target key end

     0   :  { %s681_s9 = smov 0   ;;  %s786_s0 = inlined_call_operand.vmem [shape: f32[512,4], index: 0, kind: input, shape index: {}]   ;;  %s787_s1 = inlined_call_operand.vmem [shape: bf16[4,128], index: 1, kind: input, shape index: {}]   ;;  %s788_s2 = inlined_call_operand.vmem [shape: f32[2,2,128], index: 2, kind: output, shape index: {}]  }
   0x1 LB: > { %s687_s10 = sadd.s32 4294967295, %s664_s9   ;;  %p573_p0 = scmp.ge.s32.totalorder %s664_s9, 1  ;;  %s664_s9 = sphi %s681_s9, %s12_s9  }
   0x2   : > { %p113_p1 = scmp.lt.s32.totalorder %s664_s9, 3 }
   0x4   : > { %p114_p2 = pnand %p573_p0, %p113_p1 }
   0x5   : > { %v193_v0 = vld [vmem:[%s787_s1] sm:$0x3] (!%p114_p2)  ;;  %vm243_vm0 = vcmask (!%p114_p2), 1041408   ;;  %s574_s13 = sshll.u32 (!%p114_p2), %s687_s10, 5  ;;  %vm194_vm1 = vcmask (!%p114_p2), 31744   ;;  %p140_p4 = scmp.lt.s32.totalorder (!%p114_p2), %s687_s10, 1 }
   0x6   : > { %117 = sbr.rel (%p114_p2) target bundleno = 312 (0x138), region = 28  ;;  %648 = vmatprep.subr.msk.bf16.mxu0 (!%p114_p2), %vm243_vm0, %v193_v0  ;;  %v245_v1 = vsel (!%p114_p2), %vm243_vm0, %v193_v0, 0  ;;  %p135_p3 = scmp.lt.s32.totalorder (!%p114_p2), %s574_s13, 63  ;;  %649 = vmatprep.subr.msk.bf16.mxu1 (!%p114_p2), %vm243_vm0, %v193_v0 }
   0x7   : > { %613 = vmatpush3.bf16.msra.mxu0 (!%p114_p2), %v245_v1  ;;  %647 = vmatpush3.bf16.msra.mxu1 (!%p114_p2), %v245_v1 }
   0xd   : > { %s790_s13 = smov (!%p135_p3, %s574_s13), 63  ;;  %s792_s10 = smov (!%p140_p4, %s687_s10), 1 }
   0xe   : > { %s575_s14 = sshll.u32 %s790_s13, 3  ;;  %s576_s18 = sshll.u32 %s792_s10, 1 }
   0xf   : > { %s698_s17 = scalar_lea.vmem %s786_s0, %s575_s14  ;;  %s143_s21 = scalar_lea.vmem %s788_s2, %s576_s18 }
  0x10   : > { %v145_v2 = vld [vmem:[%s698_s17] sm:$0xff]  ;;  %v146_v3 = vld [vmem:[%s698_s17 + $0x8] sm:$0xff]  ;;  %v147_v4 = vld [vmem:[%s698_s17 + $0x10] sm:$0xff] }
  0x11   : > { %v177_v5 = vpack.c.bf16 %v146_v3, %v145_v2  ;;  %v148_v6 = vld [vmem:[%s698_s17 + $0x18] sm:$0xff]  ;;  %v149_v7 = vld [vmem:[%s698_s17 + $0x20] sm:$0xff]  ;;  %v150_v8 = vld [vmem:[%s698_s17 + $0x28] sm:$0xff] }
  0x12   : > { %v178_v9 = vpack.c.bf16 %v148_v6, %v147_v4  ;;  %v179_v10 = vpack.c.bf16 %v150_v8, %v149_v7  ;;  %v151_v11 = vld [vmem:[%s698_s17 + $0x30] sm:$0xff]  ;;  %v152_v12 = vld [vmem:[%s698_s17 + $0x38] sm:$0xff]  ;;  %v153_v13 = vld [vmem:[%s698_s17 + $0x40] sm:$0xff] }
  0x13   : > { %614 = vmatprep.mubr.msk.bf16.mxu0 %vm194_vm1, %v177_v5  ;;  %v154_v14 = vld [vmem:[%s698_s17 + $0x48] sm:$0xff]  ;;  %v161_v15 = vld [vmem:[%s698_s17 + $0x80] sm:$0xff]  ;;  %v163_v18 = vld [vmem:[%s698_s17 + $0x90] sm:$0xff]  ;;  %v180_v23 = vpack.c.bf16 %v152_v12, %v151_v11 }
  0x14   : > { %615 = vmatmul.mubr.msk.bf16.vlgmr.msra.gmra.mrb[0].mxu0 %vm194_vm1, %v178_v9  ;;  %v162_v16 = vld [vmem:[%s698_s17 + $0x88] sm:$0xff]  ;;  %v164_v19 = vld [vmem:[%s698_s17 + $0x98] sm:$0xff]  ;;  %v165_v20 = vld [vmem:[%s698_s17 + $0xa0] sm:$0xff]  ;;  %v181_v25 = vpack.c.bf16 %v154_v14, %v153_v13 }
  0x15   : > { %618 = vmatprep.mubr.msk.bf16.mxu0 %vm194_vm1, %v179_v10  ;;  %v185_v17 = vpack.c.bf16 %v162_v16, %v161_v15  ;;  %v186_v21 = vpack.c.bf16 %v164_v19, %v163_v18  ;;  %v166_v22 = vld [vmem:[%s698_s17 + $0xa8] sm:$0xff]  ;;  %v167_v26 = vld [vmem:[%s698_s17 + $0xb0] sm:$0xff]  ;;  %v168_v27 = vld [vmem:[%s698_s17 + $0xb8] sm:$0xff] }
  0x16   : > { %v187_v24 = vpack.c.bf16 %v166_v22, %v165_v20  ;;  %v169_v28 = vld [vmem:[%s698_s17 + $0xc0] sm:$0xff]  ;;  %v170_v29 = vld [vmem:[%s698_s17 + $0xc8] sm:$0xff]  ;;  %v155_v30 = vld [vmem:[%s698_s17 + $0x50] sm:$0xff]  ;;  %v188_v32 = vpack.c.bf16 %v168_v27, %v167_v26 }
  0x17   : > { %630 = vmatprep.mubr.msk.bf16.mxu1 %vm194_vm1, %v185_v17  ;;  %v156_v31 = vld [vmem:[%s698_s17 + $0x58] sm:$0xff]  ;;  %v157_v33 = vld [vmem:[%s698_s17 + $0x60] sm:$0xff]  ;;  %v158_v34 = vld [vmem:[%s698_s17 + $0x68] sm:$0xff]  ;;  %v189_v35 = vpack.c.bf16 %v170_v29, %v169_v28 }
  0x18   : > { %631 = vmatmul.mubr.msk.bf16.vlgmr.msra.gmra.mrb[0].mxu1 %vm194_vm1, %v186_v21  ;;  %v182_v36 = vpack.c.bf16 %v156_v31, %v155_v30  ;;  %v183_v37 = vpack.c.bf16 %v158_v34, %v157_v33  ;;  %v171_v38 = vld [vmem:[%s698_s17 + $0xd0] sm:$0xff]  ;;  %v172_v39 = vld [vmem:[%s698_s17 + $0xd8] sm:$0xff]  ;;  %v173_v40 = vld [vmem:[%s698_s17 + $0xe0] sm:$0xff] }
  0x19   : > { %634 = vmatprep.mubr.msk.bf16.mxu1 %vm194_vm1, %v187_v24  ;;  %v174_v41 = vld [vmem:[%s698_s17 + $0xe8] sm:$0xff]  ;;  %v159_v42 = vld [vmem:[%s698_s17 + $0x70] sm:$0xff]  ;;  %v160_v43 = vld [vmem:[%s698_s17 + $0x78] sm:$0xff]  ;;  %v190_v44 = vpack.c.bf16 %v172_v39, %v171_v38 }
  0x1a   : > { %v191_v45 = vpack.c.bf16 %v174_v41, %v173_v40  ;;  %v184_v46 = vpack.c.bf16 %v160_v43, %v159_v42  ;;  %v175_v47 = vld [vmem:[%s698_s17 + $0xf0] sm:$0xff]  ;;  %v176_v48 = vld [vmem:[%s698_s17 + $0xf8] sm:$0xff] }
  0x1b   : > { %v192_v49 = vpack.c.bf16 %v176_v48, %v175_v47 }
  0x1c   : > { %619 = vmatmul.mubr.msk.bf16.gmra.mrb[4].mxu0 %vm194_vm1, %v180_v23 }
  0x1d   : > { %622 = vmatprep.mubr.msk.bf16.mxu0 %vm194_vm1, %v181_v25 }
  0x20   : > { %635 = vmatmul.mubr.msk.bf16.gmra.mrb[4].mxu1 %vm194_vm1, %v188_v32 }
  0x21   : > { %638 = vmatprep.mubr.msk.bf16.mxu1 %vm194_vm1, %v189_v35 }
  0x24   : > { %623 = vmatmul.mubr.msk.bf16.gmra.mrb[8].mxu0 %vm194_vm1, %v182_v36 }
  0x25   : > { %626 = vmatprep.mubr.msk.bf16.mxu0 %vm194_vm1, %v183_v37 }
  0x28   : > { %639 = vmatmul.mubr.msk.bf16.gmra.mrb[8].mxu1 %vm194_vm1, %v190_v44 }
  0x29   : > { %642 = vmatprep.mubr.msk.bf16.mxu1 %vm194_vm1, %v191_v45 }
  0x2c   : > { %627 = vmatmul.mubr.msk.bf16.gmra.mrb[12].mxu0 %vm194_vm1, %v184_v46 }
  0x30   : > { %643 = vmatmul.mubr.msk.bf16.gmra.mrb[12].mxu1 %vm194_vm1, %v192_v49 }
  0xe7   : > { %v616_v50 = vpop.f32.mrb[0].mxu0 }
  0xe8   : > { %v281_v51 = vpop.f32.mrb[1].mxu0  ;;  %v448_v58 = vmul.f32 %v616_v50, %v616_v50 }
  0xe9   : > { %v617_v52 = vpop.f32.mrb[2].mxu0  ;;  %v446_v54 = vmul.f32 %v281_v51, %v281_v51 }
  0xea   : > { %v284_v53 = vpop.f32.mrb[3].mxu0  ;;  %v449_v63 = vmul.f32 %v617_v52, %v617_v52 }
  0xeb   : > { %v408_v55 = vadd.f32 %v284_v53, %v281_v51  ;;  %v447_v56 = vmul.f32 %v284_v53, %v284_v53  ;;  %v748_v57 = vpop.f32.mrb[0].mxu1 }
  0xec   : > { %v750_v61 = vpop.f32.mrb[1].mxu1 }
  0xed   : > { %v409_v59 = vadd.f32 %v616_v50, %v408_v55  ;;  %v478_v60 = vadd.f32 %v447_v56, %v446_v54  ;;  %v752_v62 = vpop.f32.mrb[2].mxu1 }
  0xee   : > { %v754_v3 = vpop.f32.mrb[3].mxu1 }
  0xef   : > { %v479_v0 = vadd.f32 %v478_v60, %v448_v58  ;;  %v620_v1 = vpop.f32.mrb[4].mxu0  ;;  %v410_v2 = vadd.f32 %v617_v52, %v409_v59 }
  0xf0   : > { %v297_v4 = vpop.f32.mrb[5].mxu0  ;;  %v452_v14 = vmul.f32 %v620_v1, %v620_v1 }
  0xf1   : > { %v411_v5 = vadd.f32 %v410_v2, %v297_v4  ;;  %v450_v6 = vmul.f32 %v297_v4, %v297_v4  ;;  %v480_v7 = vadd.f32 %v479_v0, %v449_v63  ;;  %v621_v8 = vpop.f32.mrb[6].mxu0 }
  0xf2   : > { %v300_v9 = vpop.f32.mrb[7].mxu0  ;;  %v453_v19 = vmul.f32 %v621_v8, %v621_v8 }
  0xf3   : > { %v481_v10 = vadd.f32 %v480_v7, %v450_v6  ;;  %v412_v11 = vadd.f32 %v411_v5, %v300_v9  ;;  %v451_v12 = vmul.f32 %v300_v9, %v300_v9  ;;  %v756_v13 = vpop.f32.mrb[4].mxu1  ;;  %v464_v9 = vmul.f32 %v748_v57, %v748_v57 }
  0xf4   : > { %v361_v17 = vpop.f32.mrb[5].mxu1 }
  0xf5   : > { %v413_v15 = vadd.f32 %v620_v1, %v412_v11  ;;  %v482_v16 = vadd.f32 %v481_v10, %v451_v12  ;;  %v758_v18 = vpop.f32.mrb[6].mxu1  ;;  %v462_v1 = vmul.f32 %v750_v61, %v750_v61  ;;  %v465_v12 = vmul.f32 %v752_v62, %v752_v62 }
  0xf6   : > { %v364_v23 = vpop.f32.mrb[7].mxu1 }
  0xf7   : > { %v483_v20 = vadd.f32 %v482_v16, %v452_v14  ;;  %v624_v21 = vpop.f32.mrb[8].mxu0  ;;  %v414_v22 = vadd.f32 %v621_v8, %v413_v15  ;;  %v463_v8 = vmul.f32 %v754_v3, %v754_v3 }
  0xf8   : > { %v313_v24 = vpop.f32.mrb[9].mxu0  ;;  %v456_v34 = vmul.f32 %v624_v21, %v624_v21 }
  0xf9   : > { %v415_v25 = vadd.f32 %v414_v22, %v313_v24  ;;  %v454_v26 = vmul.f32 %v313_v24, %v313_v24  ;;  %v484_v27 = vadd.f32 %v483_v20, %v453_v19  ;;  %v625_v28 = vpop.f32.mrb[10].mxu0  ;;  %v467_v22 = vmul.f32 %v364_v23, %v364_v23 }
  0xfa   : > { %v316_v29 = vpop.f32.mrb[11].mxu0  ;;  %v457_v39 = vmul.f32 %v625_v28, %v625_v28 }
  0xfb   : > { %v485_v30 = vadd.f32 %v484_v27, %v454_v26  ;;  %v416_v31 = vadd.f32 %v415_v25, %v316_v29  ;;  %v455_v32 = vmul.f32 %v316_v29, %v316_v29  ;;  %v640_v33 = vpop.f32.mrb[8].mxu1 }
  0xfc   : > { %v377_v37 = vpop.f32.mrb[9].mxu1 }
  0xfd   : > { %v417_v35 = vadd.f32 %v624_v21, %v416_v31  ;;  %v486_v36 = vadd.f32 %v485_v30, %v455_v32  ;;  %v641_v38 = vpop.f32.mrb[10].mxu1  ;;  %v472_v32 = vmul.f32 %v640_v33, %v640_v33 }
  0xfe   : > { %v380_v43 = vpop.f32.mrb[11].mxu1 }
  0xff   : > { %v487_v40 = vadd.f32 %v486_v36, %v456_v34  ;;  %v628_v41 = vpop.f32.mrb[12].mxu0  ;;  %v418_v42 = vadd.f32 %v625_v28, %v417_v35  ;;  %v470_v28 = vmul.f32 %v377_v37, %v377_v37  ;;  %v471_v31 = vmul.f32 %v380_v43, %v380_v43 }
 0x100   : > { %v329_v44 = vpop.f32.mrb[13].mxu0  ;;  %v460_v54 = vmul.f32 %v628_v41, %v628_v41  ;;  %v473_v35 = vmul.f32 %v641_v38, %v641_v38 }
 0x101   : > { %v419_v45 = vadd.f32 %v418_v42, %v329_v44  ;;  %v458_v46 = vmul.f32 %v329_v44, %v329_v44  ;;  %v488_v47 = vadd.f32 %v487_v40, %v457_v39  ;;  %v629_v48 = vpop.f32.mrb[14].mxu0 }
 0x102   : > { %v332_v49 = vpop.f32.mrb[15].mxu0  ;;  %v461_v60 = vmul.f32 %v629_v48, %v629_v48 }
 0x103   : > { %v489_v50 = vadd.f32 %v488_v47, %v458_v46  ;;  %v420_v51 = vadd.f32 %v419_v45, %v332_v49  ;;  %v459_v52 = vmul.f32 %v332_v49, %v332_v49  ;;  %v644_v53 = vpop.f32.mrb[12].mxu1 }
 0x104   : > { %v393_v58 = vpop.f32.mrb[13].mxu1  ;;  %v476_v45 = vmul.f32 %v644_v53, %v644_v53 }
 0x105   : > { %v421_v55 = vadd.f32 %v628_v41, %v420_v51  ;;  %v490_v56 = vadd.f32 %v489_v50, %v459_v52  ;;  %v645_v59 = vpop.f32.mrb[14].mxu1  ;;  %v474_v39 = vmul.f32 %v393_v58, %v393_v58 }
 0x106   : > { %v396_v2 = vpop.f32.mrb[15].mxu1  ;;  %v477_v47 = vmul.f32 %v645_v59, %v645_v59 }
 0x107   : > { %v491_v63 = vadd.f32 %v490_v56, %v460_v54  ;;  %v422_v0 = vadd.f32 %v629_v48, %v421_v55 }
 0x109   : > { %v423_v4 = vadd.f32 %v422_v0, %v750_v61  ;;  %v492_v5 = vadd.f32 %v491_v63, %v461_v60  ;;  %v466_v61 = vmul.f32 %v361_v17, %v361_v17 }
 0x10b   : > { %v493_v6 = vadd.f32 %v492_v5, %v462_v1  ;;  %v424_v7 = vadd.f32 %v423_v4, %v754_v3  ;;  %v468_v3 = vmul.f32 %v756_v13, %v756_v13 }
 0x10d   : > { %v425_v10 = vadd.f32 %v748_v57, %v424_v7  ;;  %v494_v11 = vadd.f32 %v493_v6, %v463_v8  ;;  %v469_v57 = vmul.f32 %v758_v18, %v758_v18 }
 0x10f   : > { %v495_v14 = vadd.f32 %v494_v11, %v464_v9  ;;  %v426_v15 = vadd.f32 %v752_v62, %v425_v10 }
 0x111   : > { %v427_v16 = vadd.f32 %v426_v15, %v361_v17  ;;  %v496_v19 = vadd.f32 %v495_v14, %v465_v12 }
 0x113   : > { %v497_v20 = vadd.f32 %v496_v19, %v466_v61  ;;  %v428_v21 = vadd.f32 %v427_v16, %v364_v23 }
 0x115   : > { %v429_v24 = vadd.f32 %v756_v13, %v428_v21  ;;  %v498_v25 = vadd.f32 %v497_v20, %v467_v22 }
 0x117   : > { %v499_v26 = vadd.f32 %v498_v25, %v468_v3  ;;  %v430_v27 = vadd.f32 %v758_v18, %v429_v24  ;;  %v475_v18 = vmul.f32 %v396_v2, %v396_v2 }
 0x119   : > { %v431_v62 = vadd.f32 %v430_v27, %v377_v37  ;;  %v500_v29 = vadd.f32 %v499_v26, %v469_v57 }
 0x11b   : > { %v501_v17 = vadd.f32 %v500_v29, %v470_v28  ;;  %v432_v30 = vadd.f32 %v431_v62, %v380_v43 }
 0x11d   : > { %v433_v23 = vadd.f32 %v640_v33, %v432_v30  ;;  %v502_v34 = vadd.f32 %v501_v17, %v471_v31 }
 0x11f   : > { %v503_v36 = vadd.f32 %v502_v34, %v472_v32  ;;  %v434_v13 = vadd.f32 %v641_v38, %v433_v23 }
 0x121   : > { %v435_v40 = vadd.f32 %v434_v13, %v393_v58  ;;  %v504_v41 = vadd.f32 %v503_v36, %v473_v35 }
 0x123   : > { %v505_v42 = vadd.f32 %v504_v41, %v474_v39  ;;  %v436_v44 = vadd.f32 %v435_v40, %v396_v2 }
 0x125   : > { %v437_v37 = vadd.f32 %v644_v53, %v436_v44  ;;  %v506_v46 = vadd.f32 %v505_v42, %v475_v18 }
 0x127   : > { %v438_v43 = vadd.f32 %v645_v59, %v437_v37  ;;  %v507_v48 = vadd.f32 %v506_v46, %v476_v45 }
 0x129   : > { %v439_v49 = vrot.slane %v438_v43, 4  ;;  %v508_v33 = vadd.f32 %v507_v48, %v477_v47 }
 0x12b   : > { %v440_v50 = vadd.f32 %v439_v49, %v438_v43  ;;  %v509_v51 = vrot.slane %v508_v33, 4 }
 0x12d   : > { %v441_v38 = vrot.slane %v440_v50, 2  ;;  %v510_v52 = vadd.f32 %v509_v51, %v508_v33 }
 0x12f   : > { %v442_v54 = vadd.f32 %v441_v38, %v440_v50  ;;  %v511_v55 = vrot.slane %v510_v52, 2 }
 0x131   : > { %v443_v56 = vrot.slane %v442_v54, 1  ;;  %v512_v58 = vadd.f32 %v511_v55, %v510_v52 }
 0x133   : > { %v444_v53 = vadd.f32 %v443_v56, %v442_v54  ;;  %v513_v60 = vrot.slane %v512_v58, 1 }
 0x135   : > { %445 = vst [vmem:[%s143_s21] sm:$0x1] %v444_v53  ;;  %v514_v59 = vadd.f32 %v513_v60, %v512_v58 }
 0x137   : > { %515 = vst [vmem:[%s143_s21 + $0x1] sm:$0x1] %v514_v59 }
 0x138 PF: > { %s12_s9 = sadd.s32 1, %s664_s9  }
 0x139   : > { %p9_p5 = scmp.ge.s32.totalorder %s12_s9, 4  }
 0x13b   :  { %11 = sbr.rel (!%p9_p5) target bundleno = 1 (0x1), region = 58 }

// kernel: residual_forward.7
= control target key start
LH: loop header
LB: loop body
LE: loop exit
PB: predicated region body
PF: predicated region fallthrough
CT: control target
= control target key end

     0   :  { %s454_s12 = smov 0   ;;  %s645_s0 = inlined_call_operand.vmem [shape: f32[512,128], index: 0, kind: input, shape index: {}]   ;;  %s646_s1 = inlined_call_operand.vmem [shape: f32[1,128], index: 1, kind: input, shape index: {}]   ;;  %s647_s2 = inlined_call_operand.vmem [shape: f32[1,128], index: 2, kind: input, shape index: {}]   ;;  %s648_s3 = inlined_call_operand.vmem [shape: f32[512,16], index: 3, kind: output, shape index: {}]  }
   0x1 LB: > { %s405_s13 = sadd.s32 4294967295, %s432_s12   ;;  %p409_p0 = scmp.ge.s32.totalorder %s432_s12, 1  ;;  %s432_s12 = sphi %s454_s12, %s13_s12  }
   0x2   : > { %p138_p1 = scmp.lt.s32.totalorder %s432_s12, 3 }
   0x4   : > { %p139_p2 = pnand %p409_p0, %p138_p1 }
   0x5   : > { %s410_s14 = sshll.u32 (!%p139_p2), %s405_s13, 5  ;;  %v465_v0 = vld [vmem:[%s646_s1] ss:$0 sm:$0xff] (!%p139_p2)  ;;  %vm316_vm0 = vcmask (!%p139_p2), 130048  }
   0x6   : > { %142 = sbr.rel (%p139_p2) target bundleno = 46 (0x2e), region = 32  ;;  %p163_p3 = scmp.lt.s32.totalorder (!%p139_p2), %s410_s14, 63  ;;  %v475_v1 = vld [vmem:[%s647_s2] ss:$0 sm:$0xff] (!%p139_p2) }
   0xd   : > { %s650_s14 = smov (!%p163_p3, %s410_s14), 63 }
   0xe   : > { %s411_s15 = sshll.u32 %s650_s14, 3 }
   0xf   : > { %s470_s20 = scalar_lea.vmem %s645_s0, %s411_s15  ;;  %s498_s25 = scalar_lea.vmem %s648_s3, %s411_s15 }
  0x10   : > { %v174_v2 = vld [vmem:[%s470_s20] sm:$0xff]  ;;  %v175_v3 = vld [vmem:[%s470_s20 + $0x8] sm:$0xff]  ;;  %v176_v4 = vld [vmem:[%s470_s20 + $0x10] sm:$0xff] }
  0x11   : > { %v213_v5 = vmul.f32 %v465_v0, %v174_v2  ;;  %v214_v6 = vmul.f32 %v465_v0, %v175_v3  ;;  %v215_v7 = vmul.f32 %v465_v0, %v176_v4  ;;  %v177_v8 = vld [vmem:[%s470_s20 + $0x18] sm:$0xff]  ;;  %v178_v9 = vld [vmem:[%s470_s20 + $0x20] sm:$0xff]  ;;  %v179_v10 = vld [vmem:[%s470_s20 + $0x28] sm:$0xff] }
  0x12   : > { %v216_v11 = vmul.f32 %v465_v0, %v177_v8  ;;  %v217_v12 = vmul.f32 %v465_v0, %v178_v9  ;;  %v218_v13 = vmul.f32 %v465_v0, %v179_v10  ;;  %v180_v14 = vld [vmem:[%s470_s20 + $0x30] sm:$0xff]  ;;  %v181_v15 = vld [vmem:[%s470_s20 + $0x38] sm:$0xff]  ;;  %v182_v24 = vld [vmem:[%s470_s20 + $0x40] sm:$0xff] }
  0x13   : > { %v252_v16 = vadd.f32 %v475_v1, %v213_v5  ;;  %v253_v17 = vadd.f32 %v475_v1, %v214_v6  ;;  %v254_v18 = vadd.f32 %v475_v1, %v215_v7  ;;  %v219_v19 = vmul.f32 %v465_v0, %v180_v14  ;;  %v183_v25 = vld [vmem:[%s470_s20 + $0x48] sm:$0xff]  ;;  %v184_v26 = vld [vmem:[%s470_s20 + $0x50] sm:$0xff]  ;;  %v185_v31 = vld [vmem:[%s470_s20 + $0x58] sm:$0xff] }
  0x14   : > { %v255_v20 = vadd.f32 %v475_v1, %v216_v11  ;;  %v256_v21 = vadd.f32 %v475_v1, %v217_v12  ;;  %v257_v22 = vadd.f32 %v475_v1, %v218_v13  ;;  %v220_v23 = vmul.f32 %v465_v0, %v181_v15  ;;  %v186_v32 = vld [vmem:[%s470_s20 + $0x60] sm:$0xff]  ;;  %v187_v33 = vld [vmem:[%s470_s20 + $0x68] sm:$0xff]  ;;  %v188_v38 = vld [vmem:[%s470_s20 + $0x70] sm:$0xff] }
  0x15   : > { %v284_v27 = vmax.f32 %v252_v16, 0.0  ;;  %v285_v28 = vmax.f32 %v253_v17, 0.0  ;;  %v286_v29 = vmax.f32 %v254_v18, 0.0  ;;  %v258_v30 = vadd.f32 %v475_v1, %v219_v19  ;;  %v189_v43 = vld [vmem:[%s470_s20 + $0x78] sm:$0xff]  ;;  %v190_v56 = vld [vmem:[%s470_s20 + $0x80] sm:$0xff]  ;;  %v191_v57 = vld [vmem:[%s470_s20 + $0x88] sm:$0xff] }
  0x16   : > { %v287_v34 = vmax.f32 %v255_v20, 0.0  ;;  %v288_v35 = vmax.f32 %v256_v21, 0.0  ;;  %v289_v36 = vmax.f32 %v257_v22, 0.0  ;;  %v259_v37 = vadd.f32 %v475_v1, %v220_v23  ;;  %v192_v58 = vld [vmem:[%s470_s20 + $0x90] sm:$0xff]  ;;  %v193_v63 = vld [vmem:[%s470_s20 + $0x98] sm:$0xff]  ;;  %v194_v2 = vld [vmem:[%s470_s20 + $0xa0] sm:$0xff] }
  0x17   : > { %317 = vst.msk [vmem:[%s498_s25] sm:$0xff] %vm316_vm0, %v284_v27  ;;  %318 = vst.msk [vmem:[%s498_s25 + $0x8] sm:$0xff] %vm316_vm0, %v285_v28  ;;  %v290_v39 = vmax.f32 %v258_v30, 0.0  ;;  %v221_v40 = vmul.f32 %v465_v0, %v182_v24  ;;  %v222_v41 = vmul.f32 %v465_v0, %v183_v25  ;;  %v223_v42 = vmul.f32 %v465_v0, %v184_v26  ;;  %v195_v3 = vld [vmem:[%s470_s20 + $0xa8] sm:$0xff]  ;;  %v196_v8 = vld [vmem:[%s470_s20 + $0xb0] sm:$0xff] }
  0x18   : > { %319 = vst.msk [vmem:[%s498_s25 + $0x10] sm:$0xff] %vm316_vm0, %v286_v29  ;;  %320 = vst.msk [vmem:[%s498_s25 + $0x18] sm:$0xff] %vm316_vm0, %v287_v34  ;;  %v291_v44 = vmax.f32 %v259_v37, 0.0  ;;  %v224_v45 = vmul.f32 %v465_v0, %v185_v31  ;;  %v225_v46 = vmul.f32 %v465_v0, %v186_v32  ;;  %v226_v47 = vmul.f32 %v465_v0, %v187_v33  ;;  %v197_v13 = vld [vmem:[%s470_s20 + $0xb8] sm:$0xff]  ;;  %v198_v26 = vld [vmem:[%s470_s20 + $0xc0] sm:$0xff] }
  0x19   : > { %321 = vst.msk [vmem:[%s498_s25 + $0x20] sm:$0xff] %vm316_vm0, %v288_v35  ;;  %322 = vst.msk [vmem:[%s498_s25 + $0x28] sm:$0xff] %vm316_vm0, %v289_v36  ;;  %v260_v48 = vadd.f32 %v475_v1, %v221_v40  ;;  %v261_v49 = vadd.f32 %v475_v1, %v222_v41  ;;  %v262_v50 = vadd.f32 %v475_v1, %v223_v42  ;;  %v199_v27 = vld [vmem:[%s470_s20 + $0xc8] sm:$0xff]  ;;  %v200_v28 = vld [vmem:[%s470_s20 + $0xd0] sm:$0xff] }
  0x1a   : > { %323 = vst.msk [vmem:[%s498_s25 + $0x30] sm:$0xff] %vm316_vm0, %v290_v39  ;;  %v227_v51 = vmul.f32 %v465_v0, %v188_v38  ;;  %324 = vst.msk [vmem:[%s498_s25 + $0x38] sm:$0xff] %vm316_vm0, %v291_v44  ;;  %v263_v52 = vadd.f32 %v475_v1, %v224_v45  ;;  %v264_v53 = vadd.f32 %v475_v1, %v225_v46  ;;  %v201_v33 = vld [vmem:[%s470_s20 + $0xd8] sm:$0xff]  ;;  %v202_v34 = vld [vmem:[%s470_s20 + $0xe0] sm:$0xff] }
  0x1b   : > { %v265_v54 = vadd.f32 %v475_v1, %v226_v47  ;;  %v228_v55 = vmul.f32 %v465_v0, %v189_v43  ;;  %v292_v59 = vmax.f32 %v260_v48, 0.0  ;;  %v293_v60 = vmax.f32 %v261_v49, 0.0  ;;  %v203_v35 = vld [vmem:[%s470_s20 + $0xe8] sm:$0xff]  ;;  %v204_v40 = vld [vmem:[%s470_s20 + $0xf0] sm:$0xff]  ;;  %v205_v45 = vld [vmem:[%s470_s20 + $0xf8] sm:$0xff] }
  0x1c   : > { %v294_v61 = vmax.f32 %v262_v50, 0.0  ;;  %v266_v62 = vadd.f32 %v475_v1, %v227_v51  ;;  %v295_v4 = vmax.f32 %v263_v52, 0.0  ;;  %v296_v5 = vmax.f32 %v264_v53, 0.0 }
  0x1d   : > { %v297_v6 = vmax.f32 %v265_v54, 0.0  ;;  %v267_v7 = vadd.f32 %v475_v1, %v228_v55  ;;  %325 = vst.msk [vmem:[%s498_s25 + $0x40] sm:$0xff] %vm316_vm0, %v292_v59  ;;  %326 = vst.msk [vmem:[%s498_s25 + $0x48] sm:$0xff] %vm316_vm0, %v293_v60  ;;  %v229_v10 = vmul.f32 %v465_v0, %v190_v56  ;;  %v230_v11 = vmul.f32 %v465_v0, %v191_v57 }
  0x1e   : > { %327 = vst.msk [vmem:[%s498_s25 + $0x50] sm:$0xff] %vm316_vm0, %v294_v61  ;;  %v298_v9 = vmax.f32 %v266_v62, 0.0  ;;  %v231_v12 = vmul.f32 %v465_v0, %v192_v58  ;;  %328 = vst.msk [vmem:[%s498_s25 + $0x58] sm:$0xff] %vm316_vm0, %v295_v4  ;;  %v232_v15 = vmul.f32 %v465_v0, %v193_v63  ;;  %v233_v16 = vmul.f32 %v465_v0, %v194_v2 }
  0x1f   : > { %329 = vst.msk [vmem:[%s498_s25 + $0x60] sm:$0xff] %vm316_vm0, %v296_v5  ;;  %330 = vst.msk [vmem:[%s498_s25 + $0x68] sm:$0xff] %vm316_vm0, %v297_v6  ;;  %v299_v14 = vmax.f32 %v267_v7, 0.0  ;;  %v234_v17 = vmul.f32 %v465_v0, %v195_v3  ;;  %v268_v18 = vadd.f32 %v475_v1, %v229_v10  ;;  %v269_v19 = vadd.f32 %v475_v1, %v230_v11 }
  0x20   : > { %331 = vst.msk [vmem:[%s498_s25 + $0x70] sm:$0xff] %vm316_vm0, %v298_v9  ;;  %v270_v20 = vadd.f32 %v475_v1, %v231_v12  ;;  %v235_v21 = vmul.f32 %v465_v0, %v196_v8  ;;  %v271_v22 = vadd.f32 %v475_v1, %v232_v15  ;;  %v272_v23 = vadd.f32 %v475_v1, %v233_v16 }
  0x21   : > { %332 = vst.msk [vmem:[%s498_s25 + $0x78] sm:$0xff] %vm316_vm0, %v299_v14  ;;  %v273_v24 = vadd.f32 %v475_v1, %v234_v17  ;;  %v236_v25 = vmul.f32 %v465_v0, %v197_v13  ;;  %v300_v29 = vmax.f32 %v268_v18, 0.0  ;;  %v301_v30 = vmax.f32 %v269_v19, 0.0 }
  0x22   : > { %v302_v31 = vmax.f32 %v270_v20, 0.0  ;;  %v274_v32 = vadd.f32 %v475_v1, %v235_v21  ;;  %v303_v36 = vmax.f32 %v271_v22, 0.0  ;;  %v304_v37 = vmax.f32 %v272_v23, 0.0 }
  0x23   : > { %v305_v38 = vmax.f32 %v273_v24, 0.0  ;;  %v275_v39 = vadd.f32 %v475_v1, %v236_v25  ;;  %333 = vst.msk [vmem:[%s498_s25 + $0x80] sm:$0xff] %vm316_vm0, %v300_v29  ;;  %334 = vst.msk [vmem:[%s498_s25 + $0x88] sm:$0xff] %vm316_vm0, %v301_v30  ;;  %v237_v42 = vmul.f32 %v465_v0, %v198_v26  ;;  %v238_v43 = vmul.f32 %v465_v0, %v199_v27 }
  0x24   : > { %335 = vst.msk [vmem:[%s498_s25 + $0x90] sm:$0xff] %vm316_vm0, %v302_v31  ;;  %v306_v41 = vmax.f32 %v274_v32, 0.0  ;;  %v239_v44 = vmul.f32 %v465_v0, %v200_v28  ;;  %336 = vst.msk [vmem:[%s498_s25 + $0x98] sm:$0xff] %vm316_vm0, %v303_v36  ;;  %v240_v47 = vmul.f32 %v465_v0, %v201_v33  ;;  %v241_v48 = vmul.f32 %v465_v0, %v202_v34 }
  0x25   : > { %337 = vst.msk [vmem:[%s498_s25 + $0xa0] sm:$0xff] %vm316_vm0, %v304_v37  ;;  %338 = vst.msk [vmem:[%s498_s25 + $0xa8] sm:$0xff] %vm316_vm0, %v305_v38  ;;  %v307_v46 = vmax.f32 %v275_v39, 0.0  ;;  %v242_v49 = vmul.f32 %v465_v0, %v203_v35  ;;  %v276_v50 = vadd.f32 %v475_v1, %v237_v42  ;;  %v277_v51 = vadd.f32 %v475_v1, %v238_v43 }
  0x26   : > { %339 = vst.msk [vmem:[%s498_s25 + $0xb0] sm:$0xff] %vm316_vm0, %v306_v41  ;;  %v278_v52 = vadd.f32 %v475_v1, %v239_v44  ;;  %v243_v53 = vmul.f32 %v465_v0, %v204_v40  ;;  %v279_v54 = vadd.f32 %v475_v1, %v240_v47  ;;  %v280_v55 = vadd.f32 %v475_v1, %v241_v48 }
  0x27   : > { %340 = vst.msk [vmem:[%s498_s25 + $0xb8] sm:$0xff] %vm316_vm0, %v307_v46  ;;  %v281_v56 = vadd.f32 %v475_v1, %v242_v49  ;;  %v244_v57 = vmul.f32 %v465_v0, %v205_v45  ;;  %v308_v58 = vmax.f32 %v276_v50, 0.0  ;;  %v309_v59 = vmax.f32 %v277_v51, 0.0 }
  0x28   : > { %v310_v60 = vmax.f32 %v278_v52, 0.0  ;;  %v282_v61 = vadd.f32 %v475_v1, %v243_v53  ;;  %v311_v62 = vmax.f32 %v279_v54, 0.0  ;;  %v312_v63 = vmax.f32 %v280_v55, 0.0 }
  0x29   : > { %v313_v2 = vmax.f32 %v281_v56, 0.0  ;;  %v283_v3 = vadd.f32 %v475_v1, %v244_v57  ;;  %341 = vst.msk [vmem:[%s498_s25 + $0xc0] sm:$0xff] %vm316_vm0, %v308_v58  ;;  %342 = vst.msk [vmem:[%s498_s25 + $0xc8] sm:$0xff] %vm316_vm0, %v309_v59 }
  0x2a   : > { %343 = vst.msk [vmem:[%s498_s25 + $0xd0] sm:$0xff] %vm316_vm0, %v310_v60  ;;  %v314_v4 = vmax.f32 %v282_v61, 0.0  ;;  %344 = vst.msk [vmem:[%s498_s25 + $0xd8] sm:$0xff] %vm316_vm0, %v311_v62 }
  0x2b   : > { %345 = vst.msk [vmem:[%s498_s25 + $0xe0] sm:$0xff] %vm316_vm0, %v312_v63  ;;  %346 = vst.msk [vmem:[%s498_s25 + $0xe8] sm:$0xff] %vm316_vm0, %v313_v2  ;;  %v315_v0 = vmax.f32 %v283_v3, 0.0 }
  0x2c   : > { %347 = vst.msk [vmem:[%s498_s25 + $0xf0] sm:$0xff] %vm316_vm0, %v314_v4 }
  0x2d   : > { %348 = vst.msk [vmem:[%s498_s25 + $0xf8] sm:$0xff] %vm316_vm0, %v315_v0 }
  0x2e PF: > { %s13_s12 = sadd.s32 1, %s432_s12  }
  0x2f   : > { %p10_p4 = scmp.ge.s32.totalorder %s13_s12, 4  }
  0x31   :  { %12 = sbr.rel (!%p10_p4) target bundleno = 1 (0x1), region = 62 }

// kernel: residual_forward.6
= control target key start
LH: loop header
LB: loop body
LE: loop exit
PB: predicated region body
PF: predicated region fallthrough
CT: control target
= control target key end

     0   :  { %s1477_s24 = smov 0   ;;  %s1903_s0 = inlined_call_operand.vmem [shape: f32[512,128], index: 0, kind: input, shape index: {}]   ;;  %s1904_s1 = inlined_call_operand.vmem [shape: f32[512,4], index: 1, kind: input, shape index: {}]   ;;  %s1905_s2 = inlined_call_operand.vmem [shape: bf16[128,128], index: 2, kind: input, shape index: {}]   ;;  %s1906_s3 = inlined_call_operand.vmem [shape: bf16[4,128], index: 3, kind: input, shape index: {}]   ;;  %s1907_s4 = inlined_call_operand.vmem [shape: f32[1,128], index: 4, kind: input, shape index: {}]   ;;  %s1908_s5 = inlined_call_operand.vmem [shape: f32[1,128], index: 5, kind: input, shape index: {}]   ;;  %s1909_s6 = inlined_call_operand.vmem [shape: f32[512,128], index: 6, kind: output, shape index: {0}]   ;;  %s1910_s7 = inlined_call_operand.vmem [shape: f32[2,2,128], index: 7, kind: output, shape index: {1}]  }
   0x1 LB: > { %s1483_s25 = sadd.s32 4294967295, %s1435_s24   ;;  %p1205_p0 = scmp.ge.s32.totalorder %s1435_s24, 1  ;;  %s1435_s24 = sphi %s1477_s24, %s18_s24  }
   0x2   : > { %p252_p1 = scmp.lt.s32.totalorder %s1435_s24, 3 }
   0x4   : > { %p253_p2 = pnand %p1205_p0, %p252_p1 }
   0x5   : > { %v1421_v0 = vld [vmem:[%s1905_s2] sm:$0xff] (!%p253_p2)   ;;  %vm588_vm0 = vcmask (!%p253_p2), 1041408   ;;  %v1422_v3 = vld [vmem:[%s1905_s2 + $0x8] sm:$0xff] (!%p253_p2)   ;;  %s1206_s9 = sshll.u32 (!%p253_p2), %s1483_s25, 5  ;;  %v1423_v4 = vld [vmem:[%s1905_s2 + $0x10] sm:$0xff] (!%p253_p2)   ;;  %vm539_vm1 = vcmask (!%p253_p2), 31744  }
   0x6   : > { %256 = sbr.rel (%p253_p2) target bundleno = 376 (0x178), region = 44  ;;  %v538_v1 = vld [vmem:[%s1906_s3] sm:$0x3] (!%p253_p2)  ;;  %1364 = vmatprep.subr.bf16.mxu1 (!%p253_p2), %v1421_v0  ;;  %p294_p3 = scmp.lt.s32.totalorder (!%p253_p2), %s1206_s9, 63  ;;  %v1511_v5 = vld [vmem:[%s1905_s2 + $0x18] sm:$0xff] (!%p253_p2)   ;;  %v1559_v28 = vld [vmem:[%s1905_s2 + $0x28] sm:$0xff] (!%p253_p2)  }
   0x7   : > { %1412 = vmatprep.subr.msk.bf16.mxu0 (!%p253_p2), %vm588_vm0, %v538_v1  ;;  %v590_v2 = vsel (!%p253_p2), %vm588_vm0, %v538_v1, 0  ;;  %1372 = vmatpush3.bf16.msra.mxu1 (!%p253_p2), %v1421_v0  ;;  %v1528_v15 = vld [vmem:[%s1907_s4] ss:$0 sm:$0xff] (!%p253_p2)  ;;  %v1574_v41 = vld [vmem:[%s1905_s2 + $0x30] sm:$0xff] (!%p253_p2)   ;;  %v1594_v53 = vld [vmem:[%s1905_s2 + $0x38] sm:$0xff] (!%p253_p2)   ;;  %p311_p4 = scmp.lt.s32.totalorder (!%p253_p2), %s1483_s25, 1 }
   0x8   : > { %1283 = vmatpush3.bf16.msra.mxu0 (!%p253_p2), %v590_v2  ;;  %1365 = vmatprep.subr.bf16.mxu1 (!%p253_p2), %v1422_v3  ;;  %v1535_v16 = vld [vmem:[%s1905_s2 + $0x20] sm:$0xff] (!%p253_p2)  }
   0x9   : > { %1316 = vmatprep.subr.bf16.mxu0 (!%p253_p2), %v1421_v0  ;;  %v1548_v23 = vld [vmem:[%s1908_s5] ss:$0 sm:$0xff] (!%p253_p2) }
   0xb   : > { %1373 = vmatpush3.bf16.msra.mxu1 (!%p253_p2), %v1422_v3 }
   0xc   : > { %1366 = vmatprep.subr.bf16.mxu1 (!%p253_p2), %v1423_v4 }
   0xd   : > { %s1912_s9 = smov (!%p294_p3, %s1206_s9), 63  ;;  %s1914_s25 = smov (!%p311_p4, %s1483_s25), 1 }
   0xe   : > { %s1500_s12 = sshll.u32 %s1912_s9, 3 }
   0xf   : > { %s1506_s15 = scalar_lea.vmem %s1904_s1, %s1500_s12  ;;  %s1523_s20 = scalar_lea.vmem %s1903_s0, %s1500_s12  ;;  %1374 = vmatpush3.bf16.msra.mxu1 %v1423_v4 }
  0x10   : > { %v490_v6 = vld [vmem:[%s1506_s15] sm:$0xff]  ;;  %v491_v7 = vld [vmem:[%s1506_s15 + $0x8] sm:$0xff]  ;;  %v492_v8 = vld [vmem:[%s1506_s15 + $0x10] sm:$0xff]  ;;  %1367 = vmatprep.subr.bf16.mxu1 %v1511_v5 }
  0x11   : > { %v522_v9 = vpack.c.bf16 %v491_v7, %v490_v6  ;;  %v493_v10 = vld [vmem:[%s1506_s15 + $0x18] sm:$0xff]  ;;  %v494_v11 = vld [vmem:[%s1506_s15 + $0x20] sm:$0xff]  ;;  %v495_v12 = vld [vmem:[%s1506_s15 + $0x28] sm:$0xff] }
  0x12   : > { %v523_v13 = vpack.c.bf16 %v493_v10, %v492_v8  ;;  %v524_v14 = vpack.c.bf16 %v495_v12, %v494_v11  ;;  %v496_v17 = vld [vmem:[%s1506_s15 + $0x30] sm:$0xff]  ;;  %v497_v18 = vld [vmem:[%s1506_s15 + $0x38] sm:$0xff]  ;;  %v324_v19 = vld [vmem:[%s1523_s20 + $0x40] sm:$0xff] }
  0x13   : > { %1284 = vmatprep.mubr.msk.bf16.mxu0 %vm539_vm1, %v522_v9  ;;  %v498_v20 = vld [vmem:[%s1506_s15 + $0x40] sm:$0xff]  ;;  %v325_v21 = vld [vmem:[%s1523_s20 + $0x48] sm:$0xff]  ;;  %v363_v22 = vmul.f32 %v1528_v15, %v324_v19  ;;  %1375 = vmatpush3.bf16.msra.mxu1 %v1511_v5  ;;  %v326_v26 = vld [vmem:[%s1523_s20 + $0x50] sm:$0xff]  ;;  %v525_v31 = vpack.c.bf16 %v497_v18, %v496_v17 }
  0x14   : > { %1285 = vmatmul.mubr.msk.bf16.vlgmr.msra.gmra.mrb[0].mxu0 %vm539_vm1, %v523_v13  ;;  %v499_v24 = vld [vmem:[%s1506_s15 + $0x48] sm:$0xff]  ;;  %v364_v25 = vmul.f32 %v1528_v15, %v325_v21  ;;  %v327_v27 = vld [vmem:[%s1523_s20 + $0x58] sm:$0xff]  ;;  %1368 = vmatprep.subr.bf16.mxu1 %v1535_v16  ;;  %v328_v30 = vld [vmem:[%s1523_s20 + $0x60] sm:$0xff]  ;;  %v365_v36 = vmul.f32 %v1528_v15, %v326_v26 }
  0x15   : > { %1317 = vmatpush3.bf16.msra.mxu0 %v1421_v0  ;;  %1288 = vmatprep.mubr.msk.bf16.mxu0 %vm539_vm1, %v524_v14  ;;  %v402_v29 = vadd.f32 %v1548_v23, %v363_v22  ;;  %v329_v33 = vld [vmem:[%s1523_s20 + $0x68] sm:$0xff]  ;;  %v526_v34 = vpack.c.bf16 %v499_v24, %v498_v20  ;;  %v366_v37 = vmul.f32 %v1528_v15, %v327_v27  ;;  %v500_v42 = vld [vmem:[%s1506_s15 + $0x50] sm:$0xff]  ;;  %v501_v44 = vld [vmem:[%s1506_s15 + $0x58] sm:$0xff] }
  0x16   : > { %1318 = vmatprep.subr.bf16.mxu0 %v1422_v3  ;;  %v403_v32 = vadd.f32 %v1548_v23, %v364_v25  ;;  %v367_v39 = vmul.f32 %v1528_v15, %v328_v30  ;;  %v368_v40 = vmul.f32 %v1528_v15, %v329_v33  ;;  %v502_v45 = vld [vmem:[%s1506_s15 + $0x60] sm:$0xff]  ;;  %v503_v46 = vld [vmem:[%s1506_s15 + $0x68] sm:$0xff]  ;;  %v404_v47 = vadd.f32 %v1548_v23, %v365_v36  ;;  %v330_v51 = vld [vmem:[%s1523_s20 + $0x70] sm:$0xff] }
  0x17   : > { %v434_v35 = vmax.f32 %v402_v29, 0.0  ;;  %1376 = vmatpush3.bf16.msra.mxu1 %v1535_v16  ;;  %v405_v48 = vadd.f32 %v1548_v23, %v366_v37  ;;  %v331_v52 = vld [vmem:[%s1523_s20 + $0x78] sm:$0xff]  ;;  %v332_v54 = vld [vmem:[%s1523_s20 + $0x80] sm:$0xff]  ;;  %v333_v55 = vld [vmem:[%s1523_s20 + $0x88] sm:$0xff]  ;;  %v527_v56 = vpack.c.bf16 %v501_v44, %v500_v42  ;;  %v528_v57 = vpack.c.bf16 %v503_v46, %v502_v45 }
  0x18   : > { %v435_v38 = vmax.f32 %v403_v32, 0.0  ;;  %1369 = vmatprep.subr.bf16.mxu1 %v1559_v28  ;;  %v406_v49 = vadd.f32 %v1548_v23, %v367_v39  ;;  %v407_v50 = vadd.f32 %v1548_v23, %v368_v40  ;;  %v436_v58 = vmax.f32 %v404_v47, 0.0  ;;  %v504_v2 = vld [vmem:[%s1506_s15 + $0x70] sm:$0xff]  ;;  %v507_v6 = vld [vmem:[%s1506_s15 + $0x88] sm:$0xff]  ;;  %v335_v13 = vld [vmem:[%s1523_s20 + $0x98] sm:$0xff] }
  0x19   : > { %1319 = vmatpush3.bf16.msra.mxu0 %v1422_v3  ;;  %v437_v59 = vmax.f32 %v405_v48, 0.0  ;;  %v369_v60 = vmul.f32 %v1528_v15, %v330_v51  ;;  %v370_v61 = vmul.f32 %v1528_v15, %v331_v52  ;;  %v371_v0 = vmul.f32 %v1528_v15, %v332_v54  ;;  %v505_v3 = vld [vmem:[%s1506_s15 + $0x78] sm:$0xff]  ;;  %v334_v12 = vld [vmem:[%s1523_s20 + $0x90] sm:$0xff]  ;;  %v336_v14 = vld [vmem:[%s1523_s20 + $0xa0] sm:$0xff] }
  0x1a   : > { %1320 = vmatprep.subr.bf16.mxu0 %v1423_v4  ;;  %v462_v43 = vpack.c.bf16 %v435_v38, %v434_v35  ;;  %v438_v62 = vmax.f32 %v406_v49, 0.0  ;;  %v439_v63 = vmax.f32 %v407_v50, 0.0  ;;  %v372_v1 = vmul.f32 %v1528_v15, %v333_v55  ;;  %v337_v17 = vld [vmem:[%s1523_s20 + $0xa8] sm:$0xff]  ;;  %v508_v29 = vld [vmem:[%s1506_s15 + $0x90] sm:$0xff]  ;;  %v339_v39 = vld [vmem:[%s1523_s20 + $0xb8] sm:$0xff] }
  0x1b   : > { %1377 = vmatpush3.bf16.msra.mxu1 %v1559_v28  ;;  %v408_v7 = vadd.f32 %v1548_v23, %v369_v60  ;;  %v409_v8 = vadd.f32 %v1548_v23, %v370_v61  ;;  %v410_v10 = vadd.f32 %v1548_v23, %v371_v0  ;;  %v529_v18 = vpack.c.bf16 %v505_v3, %v504_v2  ;;  %v511_v32 = vld [vmem:[%s1506_s15 + $0xa8] sm:$0xff]  ;;  %v338_v38 = vld [vmem:[%s1523_s20 + $0xb0] sm:$0xff]  ;;  %v340_v40 = vld [vmem:[%s1523_s20 + $0xc0] sm:$0xff] }
  0x1c   : > { %1289 = vmatmul.mubr.msk.bf16.gmra.mrb[4].mxu0 %vm539_vm1, %v525_v31  ;;  %1370 = vmatprep.subr.bf16.mxu1 %v1574_v41  ;;  %v464_v9 = vpack.c.bf16 %v439_v63, %v438_v62  ;;  %v411_v11 = vadd.f32 %v1548_v23, %v372_v1  ;;  %v373_v21 = vmul.f32 %v1528_v15, %v334_v12  ;;  %v510_v31 = vld [vmem:[%s1506_s15 + $0xa0] sm:$0xff]  ;;  %v341_v42 = vld [vmem:[%s1523_s20 + $0xc8] sm:$0xff]  ;;  %v512_v52 = vld [vmem:[%s1506_s15 + $0xb0] sm:$0xff] }
  0x1d   : > { %1292 = vmatprep.mubr.msk.bf16.mxu0 %vm539_vm1, %v526_v34  ;;  %1321 = vmatpush3.bf16.msra.mxu0 %v1423_v4  ;;  %v463_v4 = vpack.c.bf16 %v437_v59, %v436_v58  ;;  %v440_v19 = vmax.f32 %v408_v7, 0.0  ;;  %v441_v20 = vmax.f32 %v409_v8, 0.0  ;;  %v374_v22 = vmul.f32 %v1528_v15, %v335_v13  ;;  %v513_v54 = vld [vmem:[%s1506_s15 + $0xb8] sm:$0xff]  ;;  %v514_v59 = vld [vmem:[%s1506_s15 + $0xc0] sm:$0xff]  ;;  %v515_v60 = vld [vmem:[%s1506_s15 + $0xc8] sm:$0xff] }
  0x1e   : > { %1322 = vmatprep.subr.bf16.mxu0 %v1511_v5  ;;  %1340 = vmatprep.mubr.bf16.mxu1 %v462_v43  ;;  %v442_v24 = vmax.f32 %v410_v10, 0.0  ;;  %v443_v25 = vmax.f32 %v411_v11, 0.0  ;;  %v375_v26 = vmul.f32 %v1528_v15, %v336_v14  ;;  %v376_v27 = vmul.f32 %v1528_v15, %v337_v17  ;;  %v343_v58 = vld [vmem:[%s1523_s20 + $0xd8] sm:$0xff]  ;;  %v344_v0 = vld [vmem:[%s1523_s20 + $0xe0] sm:$0xff]  ;;  %v345_v1 = vld [vmem:[%s1523_s20 + $0xe8] sm:$0xff] }
  0x1f   : > { %1378 = vmatpush3.bf16.msra.mxu1 %v1574_v41  ;;  %v465_v30 = vpack.c.bf16 %v441_v20, %v440_v19  ;;  %v412_v33 = vadd.f32 %v1548_v23, %v373_v21  ;;  %v413_v34 = vadd.f32 %v1548_v23, %v374_v22  ;;  %v532_v44 = vpack.c.bf16 %v511_v32, %v510_v31  ;;  %v316_v8 = vld [vmem:[%s1523_s20] sm:$0xff]  ;;  %v516_v14 = vld [vmem:[%s1506_s15 + $0xd0] sm:$0xff]  ;;  %v517_v17 = vld [vmem:[%s1506_s15 + $0xd8] sm:$0xff] }
  0x20   : > { %1371 = vmatprep.subr.bf16.mxu1 %v1594_v53  ;;  %v466_v35 = vpack.c.bf16 %v443_v25, %v442_v24  ;;  %v414_v36 = vadd.f32 %v1548_v23, %v375_v26  ;;  %v415_v37 = vadd.f32 %v1548_v23, %v376_v27  ;;  %v378_v47 = vmul.f32 %v1528_v15, %v339_v39  ;;  %v518_v22 = vld [vmem:[%s1506_s15 + $0xe0] sm:$0xff]  ;;  %v519_v24 = vld [vmem:[%s1506_s15 + $0xe8] sm:$0xff] }
  0x21   : > { %1323 = vmatpush3.bf16.msra.mxu0 %v1511_v5  ;;  %v506_v5 = vld [vmem:[%s1506_s15 + $0x80] sm:$0xff]  ;;  %v444_v45 = vmax.f32 %v412_v33, 0.0  ;;  %v445_v46 = vmax.f32 %v413_v34, 0.0  ;;  %v379_v50 = vmul.f32 %v1528_v15, %v340_v40  ;;  %v380_v51 = vmul.f32 %v1528_v15, %v341_v42 }
  0x22   : > { %1324 = vmatprep.subr.bf16.mxu0 %v1535_v16  ;;  %v446_v48 = vmax.f32 %v414_v36, 0.0  ;;  %v447_v49 = vmax.f32 %v415_v37, 0.0  ;;  %v533_v2 = vpack.c.bf16 %v513_v54, %v512_v52  ;;  %v383_v12 = vmul.f32 %v1528_v15, %v344_v0  ;;  %v319_v37 = vld [vmem:[%s1523_s20 + $0x18] sm:$0xff]  ;;  %v322_v0 = vld [vmem:[%s1523_s20 + $0x30] sm:$0xff] }
  0x23   : > { %1379 = vmatpush3.bf16.msra.mxu1 %v1594_v53  ;;  %v467_v55 = vpack.c.bf16 %v445_v46, %v444_v45  ;;  %v418_v62 = vadd.f32 %v1548_v23, %v379_v50  ;;  %v419_v63 = vadd.f32 %v1548_v23, %v380_v51  ;;  %v384_v13 = vmul.f32 %v1528_v15, %v345_v1  ;;  %v521_v50 = vld [vmem:[%s1506_s15 + $0xf8] sm:$0xff] }
  0x24   : > { %1293 = vmatmul.mubr.msk.bf16.gmra.mrb[8].mxu0 %vm539_vm1, %v527_v56  ;;  %v468_v61 = vpack.c.bf16 %v447_v49, %v446_v48  ;;  %v355_v19 = vmul.f32 %v1528_v15, %v316_v8  ;;  %v422_v26 = vadd.f32 %v1548_v23, %v383_v12  ;;  %v536_v36 = vpack.c.bf16 %v519_v24, %v518_v22  ;;  %v520_v49 = vld [vmem:[%s1506_s15 + $0xf0] sm:$0xff]  ;;  %v323_v1 = vld [vmem:[%s1523_s20 + $0x38] sm:$0xff] }
  0x25   : > { %1296 = vmatprep.mubr.msk.bf16.mxu0 %vm539_vm1, %v528_v57  ;;  %1325 = vmatpush3.bf16.msra.mxu0 %v1535_v16  ;;  %v530_v16 = vpack.c.bf16 %v507_v6, %v506_v5  ;;  %v342_v57 = vld [vmem:[%s1523_s20 + $0xd0] sm:$0xff]  ;;  %v534_v5 = vpack.c.bf16 %v515_v60, %v514_v59  ;;  %v450_v10 = vmax.f32 %v418_v62, 0.0  ;;  %v451_v11 = vmax.f32 %v419_v63, 0.0 }
  0x26   : > { %1326 = vmatprep.subr.bf16.mxu0 %v1559_v28  ;;  %1341 = vmatmul.mubr.bf16.vlgmr.msra.gmra.mrb[0].mxu1 %v463_v4  ;;  %v381_v3 = vmul.f32 %v1528_v15, %v342_v57  ;;  %v382_v4 = vmul.f32 %v1528_v15, %v343_v58  ;;  %v423_v27 = vadd.f32 %v1548_v23, %v384_v13  ;;  %v454_v40 = vmax.f32 %v422_v26, 0.0 }
  0x27   : > { %1344 = vmatprep.mubr.bf16.mxu1 %v464_v9  ;;  %v317_v9 = vld [vmem:[%s1523_s20 + $0x8] sm:$0xff]  ;;  %v470_v25 = vpack.c.bf16 %v451_v11, %v450_v10  ;;  %v394_v33 = vadd.f32 %v1548_v23, %v355_v19  ;;  %v358_v48 = vmul.f32 %v1528_v15, %v319_v37 }
  0x28   : > { %v356_v20 = vmul.f32 %v1528_v15, %v317_v9  ;;  %v455_v42 = vmax.f32 %v423_v27, 0.0 }
  0x29   : > { %1327 = vmatpush3.bf16.msra.mxu0 %v1559_v28  ;;  %v509_v28 = vld [vmem:[%s1506_s15 + $0x98] sm:$0xff]  ;;  %v397_v59 = vadd.f32 %v1548_v23, %v358_v48  ;;  %s1717_s15 = scalar_lea.vmem %s1909_s6, %s1500_s12  ;;  %s1212_s12 = sshll.u32 %s1914_s25, 1 }
  0x2a   : > { %1328 = vmatprep.subr.bf16.mxu0 %v1574_v41  ;;  %v531_v43 = vpack.c.bf16 %v509_v28, %v508_v29  ;;  %v346_v29 = vld [vmem:[%s1523_s20 + $0xf0] sm:$0xff]  ;;  %v347_v28 = vld [vmem:[%s1523_s20 + $0xf8] sm:$0xff]  ;;  %v395_v34 = vadd.f32 %v1548_v23, %v356_v20  ;;  %s314_s18 = scalar_lea.vmem %s1910_s7, %s1212_s12 }
  0x2b   : > { %v386_v39 = vmul.f32 %v1528_v15, %v347_v28 }
  0x2c   : > { %1297 = vmatmul.mubr.msk.bf16.gmra.mrb[12].mxu0 %vm539_vm1, %v529_v18  ;;  %v420_v18 = vadd.f32 %v1548_v23, %v381_v3  ;;  %v429_v3 = vmax.f32 %v397_v59, 0.0 }
  0x2d   : > { %1300 = vmatprep.mubr.msk.bf16.mxu0 %vm539_vm1, %v530_v16  ;;  %1329 = vmatpush3.bf16.msra.mxu0 %v1574_v41  ;;  %v377_v41 = vmul.f32 %v1528_v15, %v338_v38  ;;  %v421_v16 = vadd.f32 %v1548_v23, %v382_v4  ;;  %v385_v38 = vmul.f32 %v1528_v15, %v346_v29 }
  0x2e   : > { %1330 = vmatprep.subr.bf16.mxu0 %v1594_v53  ;;  %1345 = vmatmul.mubr.bf16.gmra.mrb[4].mxu1 %v465_v30  ;;  %v535_v30 = vpack.c.bf16 %v517_v17, %v516_v14  ;;  %v452_v31 = vmax.f32 %v420_v18, 0.0  ;;  %v425_v52 = vadd.f32 %v1548_v23, %v386_v39  ;;  %v361_v4 = vmul.f32 %v1528_v15, %v322_v0 }
  0x2f   : > { %1348 = vmatprep.mubr.bf16.mxu1 %v466_v35  ;;  %v416_v56 = vadd.f32 %v1548_v23, %v377_v41  ;;  %v453_v32 = vmax.f32 %v421_v16, 0.0  ;;  %v318_v35 = vld [vmem:[%s1523_s20 + $0x10] sm:$0xff]  ;;  %v426_v41 = vmax.f32 %v394_v33, 0.0  ;;  %v424_v51 = vadd.f32 %v1548_v23, %v385_v38 }
  0x30   : > { %v357_v45 = vmul.f32 %v1528_v15, %v318_v35  ;;  %v400_v10 = vadd.f32 %v1548_v23, %v361_v4 }
  0x31   : > { %1331 = vmatpush3.bf16.msra.mxu0 %v1594_v53  ;;  %v417_v53 = vadd.f32 %v1548_v23, %v378_v47  ;;  %v448_v6 = vmax.f32 %v416_v56, 0.0  ;;  %v471_v46 = vpack.c.bf16 %v453_v32, %v452_v31  ;;  %v427_v47 = vmax.f32 %v395_v34, 0.0 }
  0x32   : > { %v472_v56 = vpack.c.bf16 %v455_v42, %v454_v40  ;;  %v396_v58 = vadd.f32 %v1548_v23, %v357_v45  ;;  %v456_v60 = vmax.f32 %v424_v51, 0.0  ;;  %v432_v13 = vmax.f32 %v400_v10, 0.0 }
  0x33   : > { %v449_v7 = vmax.f32 %v417_v53, 0.0  ;;  %v537_v53 = vpack.c.bf16 %v521_v50, %v520_v49  ;;  %v458_v57 = vpack.c.bf16 %v427_v47, %v426_v41 }
  0x34   : > { %1301 = vmatmul.mubr.msk.bf16.gmra.mrb[16].mxu0 %vm539_vm1, %v531_v43  ;;  %v320_v43 = vld [vmem:[%s1523_s20 + $0x20] sm:$0xff] }
  0x35   : > { %1304 = vmatprep.mubr.msk.bf16.mxu0 %vm539_vm1, %v532_v44  ;;  %v469_v21 = vpack.c.bf16 %v449_v7, %v448_v6  ;;  %v321_v44 = vld [vmem:[%s1523_s20 + $0x28] sm:$0xff]  ;;  %v359_v54 = vmul.f32 %v1528_v15, %v320_v43 }
  0x36   : > { %1349 = vmatmul.mubr.bf16.gmra.mrb[8].mxu1 %v467_v55  ;;  %v360_v55 = vmul.f32 %v1528_v15, %v321_v44 }
  0x37   : > { %1352 = vmatprep.mubr.bf16.mxu1 %v468_v61  ;;  %v457_v61 = vmax.f32 %v425_v52, 0.0  ;;  %v398_v62 = vadd.f32 %v1548_v23, %v359_v54 }
  0x38   : > { %v399_v63 = vadd.f32 %v1548_v23, %v360_v55 }
  0x39   : > { %v473_v6 = vpack.c.bf16 %v457_v61, %v456_v60  ;;  %v430_v7 = vmax.f32 %v398_v62, 0.0 }
  0x3a   : > { %v431_v8 = vmax.f32 %v399_v63, 0.0 }
  0x3c   : > { %1305 = vmatmul.mubr.msk.bf16.gmra.mrb[20].mxu0 %vm539_vm1, %v533_v2  ;;  %v428_v2 = vmax.f32 %v396_v58, 0.0  ;;  %v460_v12 = vpack.c.bf16 %v431_v8, %v430_v7 }
  0x3d   : > { %1308 = vmatprep.mubr.msk.bf16.mxu0 %vm539_vm1, %v534_v5  ;;  %v362_v5 = vmul.f32 %v1528_v15, %v323_v1 }
  0x3e   : > { %1353 = vmatmul.mubr.bf16.gmra.mrb[12].mxu1 %v469_v21  ;;  %v459_v9 = vpack.c.bf16 %v429_v3, %v428_v2 }
  0x3f   : > { %1356 = vmatprep.mubr.bf16.mxu1 %v470_v25  ;;  %v401_v11 = vadd.f32 %v1548_v23, %v362_v5 }
  0x41   : > { %v433_v14 = vmax.f32 %v401_v11, 0.0 }
  0x43   : > { %v461_v17 = vpack.c.bf16 %v433_v14, %v432_v13 }
  0x44   : > { %1309 = vmatmul.mubr.msk.bf16.gmra.mrb[24].mxu0 %vm539_vm1, %v535_v30 }
  0x45   : > { %1312 = vmatprep.mubr.msk.bf16.mxu0 %vm539_vm1, %v536_v36 }
  0x46   : > { %1357 = vmatmul.mubr.bf16.gmra.mrb[16].mxu1 %v471_v46 }
  0x47   : > { %1360 = vmatprep.mubr.bf16.mxu1 %v472_v56 }
  0x4c   : > { %1313 = vmatmul.mubr.msk.bf16.gmra.mrb[28].mxu0 %vm539_vm1, %v537_v53 }
  0x4d   : > { %1332 = vmatprep.mubr.bf16.mxu0 %v458_v57 }
  0x4e   : > { %1361 = vmatmul.mubr.bf16.gmra.mrb[20].mxu1 %v473_v6 }
  0x54   : > { %1333 = vmatmul.mubr.bf16.vlgmr.msra.gmra.mrb[0].mxu0 %v459_v9 }
  0x55   : > { %1336 = vmatprep.mubr.bf16.mxu0 %v460_v12 }
  0x5c   : > { %1337 = vmatmul.mubr.bf16.gmra.mrb[4].mxu0 %v461_v17 }
  0xf7   : > { %v1294_v18 = vpop.f32.mrb[8].mxu0 }
  0xf8   : > { %v658_v15 = vpop.f32.mrb[9].mxu0 }
  0xf9   : > { %v1295_v16 = vpop.f32.mrb[10].mxu0  ;;  %v1342_v23 = vpop.f32.mrb[0].mxu1 }
  0xfa   : > { %v661_v19 = vpop.f32.mrb[11].mxu0  ;;  %v1719_v20 = vadd.f32 %v1342_v23, %v1294_v18  ;;  %v867_v21 = vpop.f32.mrb[1].mxu1 }
  0xfb   : > { %v1721_v22 = vadd.f32 %v867_v21, %v658_v15  ;;  %v1343_v24 = vpop.f32.mrb[2].mxu1 }
  0xfc   : > { %972 = vst [vmem:[%s1717_s15 + $0x50] sm:$0xff] %v1719_v20  ;;  %v1725_v26 = vadd.f32 %v1343_v24, %v1295_v16  ;;  %v870_v27 = vpop.f32.mrb[3].mxu1 }
  0xfd   : > { %970 = vst [vmem:[%s1717_s15 + $0x40] sm:$0xff] %v1721_v22  ;;  %v1729_v28 = vadd.f32 %v870_v27, %v661_v19 }
  0xfe   : > { %973 = vst [vmem:[%s1717_s15 + $0x58] sm:$0xff] %v1725_v26 }
  0xff   : > { %v1298_v25 = vpop.f32.mrb[12].mxu0  ;;  %971 = vst [vmem:[%s1717_s15 + $0x48] sm:$0xff] %v1729_v28 }
 0x100   : > { %v674_v29 = vpop.f32.mrb[13].mxu0 }
 0x101   : > { %v1299_v30 = vpop.f32.mrb[14].mxu0  ;;  %v1346_v32 = vpop.f32.mrb[4].mxu1 }
 0x102   : > { %v677_v31 = vpop.f32.mrb[15].mxu0  ;;  %v1735_v33 = vadd.f32 %v1346_v32, %v1298_v25  ;;  %v883_v34 = vpop.f32.mrb[5].mxu1 }
 0x103   : > { %v1737_v35 = vadd.f32 %v883_v34, %v674_v29  ;;  %v1347_v36 = vpop.f32.mrb[6].mxu1 }
 0x104   : > { %976 = vst [vmem:[%s1717_s15 + $0x70] sm:$0xff] %v1735_v33  ;;  %v1741_v38 = vadd.f32 %v1347_v36, %v1299_v30  ;;  %v886_v39 = vpop.f32.mrb[7].mxu1 }
 0x105   : > { %974 = vst [vmem:[%s1717_s15 + $0x60] sm:$0xff] %v1737_v35  ;;  %v1745_v42 = vadd.f32 %v886_v39, %v677_v31 }
 0x106   : > { %977 = vst [vmem:[%s1717_s15 + $0x78] sm:$0xff] %v1741_v38 }
 0x107   : > { %v1302_v37 = vpop.f32.mrb[16].mxu0  ;;  %975 = vst [vmem:[%s1717_s15 + $0x68] sm:$0xff] %v1745_v42 }
 0x108   : > { %v690_v40 = vpop.f32.mrb[17].mxu0 }
 0x109   : > { %v1303_v43 = vpop.f32.mrb[18].mxu0  ;;  %v1350_v45 = vpop.f32.mrb[8].mxu1 }
 0x10a   : > { %v693_v44 = vpop.f32.mrb[19].mxu0  ;;  %v1751_v46 = vadd.f32 %v1350_v45, %v1302_v37  ;;  %v899_v41 = vpop.f32.mrb[9].mxu1 }
 0x10b   : > { %v1753_v47 = vadd.f32 %v899_v41, %v690_v40  ;;  %v1351_v48 = vpop.f32.mrb[10].mxu1 }
 0x10c   : > { %980 = vst [vmem:[%s1717_s15 + $0x90] sm:$0xff] %v1751_v46  ;;  %v1757_v50 = vadd.f32 %v1351_v48, %v1303_v43  ;;  %v902_v51 = vpop.f32.mrb[11].mxu1 }
 0x10d   : > { %978 = vst [vmem:[%s1717_s15 + $0x80] sm:$0xff] %v1753_v47  ;;  %v1761_v54 = vadd.f32 %v902_v51, %v693_v44 }
 0x10e   : > { %981 = vst [vmem:[%s1717_s15 + $0x98] sm:$0xff] %v1757_v50 }
 0x10f   : > { %v1306_v49 = vpop.f32.mrb[20].mxu0  ;;  %979 = vst [vmem:[%s1717_s15 + $0x88] sm:$0xff] %v1761_v54 }
 0x110   : > { %v706_v52 = vpop.f32.mrb[21].mxu0 }
 0x111   : > { %v1307_v55 = vpop.f32.mrb[22].mxu0  ;;  %v1354_v53 = vpop.f32.mrb[12].mxu1 }
 0x112   : > { %v709_v56 = vpop.f32.mrb[23].mxu0  ;;  %v1767_v57 = vadd.f32 %v1354_v53, %v1306_v49  ;;  %v915_v58 = vpop.f32.mrb[13].mxu1 }
 0x113   : > { %v1769_v59 = vadd.f32 %v915_v58, %v706_v52  ;;  %v1355_v60 = vpop.f32.mrb[14].mxu1 }
 0x114   : > { %984 = vst [vmem:[%s1717_s15 + $0xb0] sm:$0xff] %v1767_v57  ;;  %v1773_v62 = vadd.f32 %v1355_v60, %v1307_v55  ;;  %v918_v63 = vpop.f32.mrb[15].mxu1 }
 0x115   : > { %982 = vst [vmem:[%s1717_s15 + $0xa0] sm:$0xff] %v1769_v59  ;;  %v1777_v1 = vadd.f32 %v918_v63, %v709_v56 }
 0x116   : > { %985 = vst [vmem:[%s1717_s15 + $0xb8] sm:$0xff] %v1773_v62 }
 0x117   : > { %v1310_v61 = vpop.f32.mrb[24].mxu0  ;;  %983 = vst [vmem:[%s1717_s15 + $0xa8] sm:$0xff] %v1777_v1 }
 0x118   : > { %v722_v0 = vpop.f32.mrb[25].mxu0 }
 0x119   : > { %v1311_v2 = vpop.f32.mrb[26].mxu0  ;;  %v1358_v4 = vpop.f32.mrb[16].mxu1 }
 0x11a   : > { %v725_v3 = vpop.f32.mrb[27].mxu0  ;;  %v1783_v5 = vadd.f32 %v1358_v4, %v1310_v61  ;;  %v931_v6 = vpop.f32.mrb[17].mxu1 }
 0x11b   : > { %v1785_v7 = vadd.f32 %v931_v6, %v722_v0  ;;  %v1359_v8 = vpop.f32.mrb[18].mxu1  ;;  %v1040_v6 = vmul.f32 %v1721_v22, %v1721_v22 }
 0x11c   : > { %988 = vst [vmem:[%s1717_s15 + $0xd0] sm:$0xff] %v1783_v5  ;;  %v1789_v10 = vadd.f32 %v1359_v8, %v1311_v2  ;;  %v934_v11 = vpop.f32.mrb[19].mxu1 }
 0x11d   : > { %986 = vst [vmem:[%s1717_s15 + $0xc0] sm:$0xff] %v1785_v7  ;;  %v1793_v13 = vadd.f32 %v934_v11, %v725_v3  ;;  %v1041_v11 = vmul.f32 %v1729_v28, %v1729_v28 }
 0x11e   : > { %989 = vst [vmem:[%s1717_s15 + $0xd8] sm:$0xff] %v1789_v10 }
 0x11f   : > { %v1314_v9 = vpop.f32.mrb[28].mxu0  ;;  %987 = vst [vmem:[%s1717_s15 + $0xc8] sm:$0xff] %v1793_v13 }
 0x120   : > { %v738_v12 = vpop.f32.mrb[29].mxu0 }
 0x121   : > { %v1315_v14 = vpop.f32.mrb[30].mxu0  ;;  %v1362_v18 = vpop.f32.mrb[20].mxu1 }
 0x122   : > { %v741_v17 = vpop.f32.mrb[31].mxu0  ;;  %v1799_v15 = vadd.f32 %v1362_v18, %v1314_v9  ;;  %v947_v16 = vpop.f32.mrb[21].mxu1 }
 0x123   : > { %v1801_v19 = vadd.f32 %v947_v16, %v738_v12  ;;  %v1363_v23 = vpop.f32.mrb[22].mxu1 }
 0x124   : > { %992 = vst [vmem:[%s1717_s15 + $0xf0] sm:$0xff] %v1799_v15  ;;  %v1805_v24 = vadd.f32 %v1363_v23, %v1315_v14  ;;  %v950_v25 = vpop.f32.mrb[23].mxu1  ;;  %v1043_v23 = vmul.f32 %v1725_v26, %v1725_v26 }
 0x125   : > { %990 = vst [vmem:[%s1717_s15 + $0xe0] sm:$0xff] %v1801_v19  ;;  %v1810_v29 = vadd.f32 %v950_v25, %v741_v17  ;;  %v1042_v17 = vmul.f32 %v1719_v20, %v1719_v20 }
 0x126   : > { %993 = vst [vmem:[%s1717_s15 + $0xf8] sm:$0xff] %v1805_v24 }
 0x127   : > { %v1334_v21 = vpop.f32.mrb[0].mxu0  ;;  %991 = vst [vmem:[%s1717_s15 + $0xe8] sm:$0xff] %v1810_v29 }
 0x128   : > { %964 = vst [vmem:[%s1717_s15 + $0x10] sm:$0xff] %v1334_v21  ;;  %v835_v27 = vpop.f32.mrb[1].mxu0  ;;  %v1034_v37 = vmul.f32 %v1334_v21, %v1334_v21 }
 0x129   : > { %962 = vst [vmem:[%s1717_s15] sm:$0xff] %v835_v27  ;;  %v1335_v30 = vpop.f32.mrb[2].mxu0  ;;  %v1032_v32 = vmul.f32 %v835_v27, %v835_v27 }
 0x12a   : > { %965 = vst [vmem:[%s1717_s15 + $0x18] sm:$0xff] %v1335_v30  ;;  %v838_v31 = vpop.f32.mrb[3].mxu0  ;;  %v1035_v43 = vmul.f32 %v1335_v30, %v1335_v30 }
 0x12b   : > { %963 = vst [vmem:[%s1717_s15 + $0x8] sm:$0xff] %v838_v31  ;;  %v994_v34 = vadd.f32 %v838_v31, %v835_v27  ;;  %v1033_v36 = vmul.f32 %v838_v31, %v838_v31 }
 0x12d   : > { %v995_v39 = vadd.f32 %v1334_v21, %v994_v34  ;;  %v1064_v40 = vadd.f32 %v1033_v36, %v1032_v32 }
 0x12f   : > { %v1065_v44 = vadd.f32 %v1064_v40, %v1034_v37  ;;  %v1338_v45 = vpop.f32.mrb[4].mxu0  ;;  %v996_v41 = vadd.f32 %v1335_v30, %v995_v39 }
 0x130   : > { %968 = vst [vmem:[%s1717_s15 + $0x30] sm:$0xff] %v1338_v45  ;;  %v851_v48 = vpop.f32.mrb[5].mxu0  ;;  %v1038_v61 = vmul.f32 %v1338_v45, %v1338_v45 }
 0x131   : > { %966 = vst [vmem:[%s1717_s15 + $0x20] sm:$0xff] %v851_v48  ;;  %v997_v49 = vadd.f32 %v996_v41, %v851_v48  ;;  %v1036_v51 = vmul.f32 %v851_v48, %v851_v48  ;;  %v1066_v52 = vadd.f32 %v1065_v44, %v1035_v43  ;;  %v1339_v55 = vpop.f32.mrb[6].mxu0 }
 0x132   : > { %969 = vst [vmem:[%s1717_s15 + $0x38] sm:$0xff] %v1339_v55  ;;  %v854_v56 = vpop.f32.mrb[7].mxu0  ;;  %v1039_v2 = vmul.f32 %v1339_v55, %v1339_v55 }
 0x133   : > { %v1067_v53 = vadd.f32 %v1066_v52, %v1036_v51  ;;  %967 = vst [vmem:[%s1717_s15 + $0x28] sm:$0xff] %v854_v56  ;;  %v998_v58 = vadd.f32 %v997_v49, %v854_v56  ;;  %v1037_v60 = vmul.f32 %v854_v56, %v854_v56 }
 0x135   : > { %v999_v63 = vadd.f32 %v1338_v45, %v998_v58  ;;  %v1068_v0 = vadd.f32 %v1067_v53, %v1037_v60 }
 0x137   : > { %v1000_v3 = vadd.f32 %v1339_v55, %v999_v63  ;;  %v1069_v4 = vadd.f32 %v1068_v0, %v1038_v61 }
 0x139   : > { %v1001_v8 = vadd.f32 %v1000_v3, %v1721_v22  ;;  %v1070_v9 = vadd.f32 %v1069_v4, %v1039_v2  ;;  %v1044_v22 = vmul.f32 %v1737_v35, %v1737_v35 }
 0x13b   : > { %v1002_v12 = vadd.f32 %v1001_v8, %v1729_v28  ;;  %v1071_v14 = vadd.f32 %v1070_v9, %v1040_v6  ;;  %v1045_v28 = vmul.f32 %v1745_v42, %v1745_v42  ;;  %v1059_v8 = vmul.f32 %v1789_v10, %v1789_v10 }
 0x13d   : > { %v1003_v18 = vadd.f32 %v1002_v12, %v1719_v20  ;;  %v1072_v16 = vadd.f32 %v1071_v14, %v1041_v11  ;;  %v1046_v20 = vmul.f32 %v1735_v33, %v1735_v33  ;;  %v1060_v11 = vmul.f32 %v1801_v19, %v1801_v19 }
 0x13e   : > { %v1061_v14 = vmul.f32 %v1810_v29, %v1810_v29 }
 0x13f   : > { %v1004_v21 = vadd.f32 %v1003_v18, %v1725_v26  ;;  %v1073_v25 = vadd.f32 %v1072_v16, %v1042_v17  ;;  %v1047_v26 = vmul.f32 %v1741_v38, %v1741_v38  ;;  %v1062_v18 = vmul.f32 %v1799_v15, %v1799_v15 }
 0x141   : > { %v1005_v27 = vadd.f32 %v1004_v21, %v1737_v35  ;;  %v1074_v30 = vadd.f32 %v1073_v25, %v1043_v23  ;;  %v1048_v35 = vmul.f32 %v1753_v47, %v1753_v47  ;;  %v1063_v23 = vmul.f32 %v1805_v24, %v1805_v24 }
 0x143   : > { %v1006_v31 = vadd.f32 %v1005_v27, %v1745_v42  ;;  %v1075_v32 = vadd.f32 %v1074_v30, %v1044_v22  ;;  %v1049_v42 = vmul.f32 %v1761_v54, %v1761_v54 }
 0x145   : > { %v1007_v34 = vadd.f32 %v1006_v31, %v1735_v33  ;;  %v1076_v36 = vadd.f32 %v1075_v32, %v1045_v28  ;;  %v1050_v33 = vmul.f32 %v1751_v46, %v1751_v46 }
 0x147   : > { %v1008_v37 = vadd.f32 %v1007_v34, %v1741_v38  ;;  %v1077_v39 = vadd.f32 %v1076_v36, %v1046_v20  ;;  %v1051_v38 = vmul.f32 %v1757_v50, %v1757_v50 }
 0x149   : > { %v1009_v40 = vadd.f32 %v1008_v37, %v1753_v47  ;;  %v1078_v43 = vadd.f32 %v1077_v39, %v1047_v26  ;;  %v1052_v47 = vmul.f32 %v1769_v59, %v1769_v59 }
 0x14b   : > { %v1010_v44 = vadd.f32 %v1009_v40, %v1761_v54  ;;  %v1079_v45 = vadd.f32 %v1078_v43, %v1048_v35  ;;  %v1053_v54 = vmul.f32 %v1777_v1, %v1777_v1 }
 0x14d   : > { %v1011_v41 = vadd.f32 %v1010_v44, %v1751_v46  ;;  %v1080_v48 = vadd.f32 %v1079_v45, %v1049_v42  ;;  %v1054_v46 = vmul.f32 %v1767_v57, %v1767_v57 }
 0x14f   : > { %v1012_v49 = vadd.f32 %v1011_v41, %v1757_v50  ;;  %v1081_v51 = vadd.f32 %v1080_v48, %v1050_v33  ;;  %v1055_v50 = vmul.f32 %v1773_v62, %v1773_v62 }
 0x151   : > { %v1013_v52 = vadd.f32 %v1012_v49, %v1769_v59  ;;  %v1082_v55 = vadd.f32 %v1081_v51, %v1051_v38  ;;  %v1056_v59 = vmul.f32 %v1785_v7, %v1785_v7 }
 0x153   : > { %v1014_v56 = vadd.f32 %v1013_v52, %v1777_v1  ;;  %v1083_v53 = vadd.f32 %v1082_v55, %v1052_v47  ;;  %v1057_v1 = vmul.f32 %v1793_v13, %v1793_v13 }
 0x155   : > { %v1015_v58 = vadd.f32 %v1014_v56, %v1767_v57  ;;  %v1084_v60 = vadd.f32 %v1083_v53, %v1053_v54  ;;  %v1058_v57 = vmul.f32 %v1783_v5, %v1783_v5 }
 0x157   : > { %v1016_v61 = vadd.f32 %v1015_v58, %v1773_v62  ;;  %v1085_v63 = vadd.f32 %v1084_v60, %v1054_v46 }
 0x159   : > { %v1017_v0 = vadd.f32 %v1016_v61, %v1785_v7  ;;  %v1086_v2 = vadd.f32 %v1085_v63, %v1055_v50 }
 0x15b   : > { %v1018_v3 = vadd.f32 %v1017_v0, %v1793_v13  ;;  %v1087_v4 = vadd.f32 %v1086_v2, %v1056_v59 }
 0x15d   : > { %v1019_v6 = vadd.f32 %v1018_v3, %v1783_v5  ;;  %v1088_v62 = vadd.f32 %v1087_v4, %v1057_v1 }
 0x15f   : > { %v1020_v9 = vadd.f32 %v1019_v6, %v1789_v10  ;;  %v1089_v7 = vadd.f32 %v1088_v62, %v1058_v57 }
 0x161   : > { %v1021_v13 = vadd.f32 %v1020_v9, %v1801_v19  ;;  %v1090_v12 = vadd.f32 %v1089_v7, %v1059_v8 }
 0x163   : > { %v1022_v17 = vadd.f32 %v1021_v13, %v1810_v29  ;;  %v1091_v5 = vadd.f32 %v1090_v12, %v1060_v11 }
 0x165   : > { %v1023_v16 = vadd.f32 %v1022_v17, %v1799_v15  ;;  %v1092_v10 = vadd.f32 %v1091_v5, %v1061_v14 }
 0x167   : > { %v1024_v21 = vadd.f32 %v1023_v16, %v1805_v24  ;;  %v1093_v19 = vadd.f32 %v1092_v10, %v1062_v18 }
 0x169   : > { %v1025_v25 = vrot.slane %v1024_v21, 4  ;;  %v1094_v22 = vadd.f32 %v1093_v19, %v1063_v23 }
 0x16b   : > { %v1026_v27 = vadd.f32 %v1025_v25, %v1024_v21  ;;  %v1095_v30 = vrot.slane %v1094_v22, 4 }
 0x16d   : > { %v1027_v29 = vrot.slane %v1026_v27, 2  ;;  %v1096_v28 = vadd.f32 %v1095_v30, %v1094_v22 }
 0x16f   : > { %v1028_v31 = vadd.f32 %v1027_v29, %v1026_v27  ;;  %v1097_v32 = vrot.slane %v1096_v28, 2 }
 0x171   : > { %v1029_v20 = vrot.slane %v1028_v31, 1  ;;  %v1098_v15 = vadd.f32 %v1097_v32, %v1096_v28 }
 0x173   : > { %v1030_v34 = vadd.f32 %v1029_v20, %v1028_v31  ;;  %v1099_v36 = vrot.slane %v1098_v15, 1 }
 0x175   : > { %1031 = vst [vmem:[%s314_s18] sm:$0x1] %v1030_v34  ;;  %v1100_v24 = vadd.f32 %v1099_v36, %v1098_v15 }
 0x177   : > { %1101 = vst [vmem:[%s314_s18 + $0x1] sm:$0x1] %v1100_v24 }
 0x178 PF: > { %s18_s24 = sadd.s32 1, %s1435_s24  }
 0x179   : > { %p15_p5 = scmp.ge.s32.totalorder %s18_s24, 4  }
 0x17b   :  { %17 = sbr.rel (!%p15_p5) target bundleno = 1 (0x1), region = 89 }

// kernel: residual_forward.5
= control target key start
LH: loop header
LB: loop body
LE: loop exit
PB: predicated region body
PF: predicated region fallthrough
CT: control target
= control target key end

     0   :  { %s5786_s21 = smov 0   ;;  %s7395_s0 = inlined_call_operand.vmem [shape: f32[512,4], index: 0, kind: input, shape index: {}]   ;;  %s7396_s1 = inlined_call_operand.vmem [shape: bf16[4,128], index: 1, kind: input, shape index: {}]   ;;  %s7397_s2 = inlined_call_operand.vmem [shape: bf16[9,128,128], index: 2, kind: input, shape index: {}]   ;;  %s7398_s3 = inlined_call_operand.vmem [shape: f32[1,128], index: 3, kind: input, shape index: {}]   ;;  %s7399_s4 = inlined_call_operand.vmem [shape: f32[1,128], index: 4, kind: input, shape index: {}]   ;;  %s7400_s5 = inlined_call_operand.vmem [shape: f32[512,128], index: 5, kind: output, shape index: {0}]   ;;  %s7401_s6 = inlined_call_operand.vmem [shape: f32[2,2,128], index: 6, kind: output, shape index: {1}]  }
   0x1 LB: > { %s5792_s22 = sadd.s32 4294967295, %s5747_s21   ;;  %p4177_p0 = scmp.ge.s32.totalorder %s5747_s21, 1  ;;  %s5747_s21 = sphi %s5786_s21, %s17_s21  }
   0x2   : > { %p216_p1 = scmp.lt.s32.totalorder %s5747_s21, 3 }
   0x4   : > { %p217_p2 = pnand %p4177_p0, %p216_p1 }
   0x6   : > { %220 = sbr.rel (%p217_p2) target bundleno = 805 (0x325), region = 40 }
   0xd   : > { %v315_v0 = vld [vmem:[%s7396_s1] sm:$0x3]  ;;  %vm365_vm0 = vcmask 1041408   ;;  %s4178_s25 = sshll.u32 %s5792_s22, 5  ;;  %vm316_vm1 = vcmask 31744   ;;  %v5662_v12 = vld [vmem:[%s7397_s2 + $0x48] sm:$0xff]  }
   0xe   : > { %v5661_v1 = vld [vmem:[%s7397_s2 + $0x40] sm:$0xff]   ;;  %5650 = vmatprep.subr.msk.bf16.mxu0 %vm365_vm0, %v315_v0  ;;  %v367_v2 = vsel %vm365_vm0, %v315_v0, 0  ;;  %p251_p3 = scmp.lt.s32.totalorder %s4178_s25, 63  ;;  %v5663_v17 = vld [vmem:[%s7397_s2 + $0x50] sm:$0xff]   ;;  %v5664_v20 = vld [vmem:[%s7397_s2 + $0x58] sm:$0xff]   ;;  %v7403_v0 = vmov 0  }
   0xf   : > { %4913 = vmatpush3.bf16.msra.mxu0 %v367_v2  ;;  %v5667_v23 = vld [vmem:[%s7397_s2 + $0x100] sm:$0xff]   ;;  %v5668_v26 = vld [vmem:[%s7397_s2 + $0x108] sm:$0xff]   ;;  %v5670_v28 = vld [vmem:[%s7397_s2 + $0x110] sm:$0xff]   ;;  %vm7421_vm9 = vmmov 1   ;;  %p262_p4 = scmp.lt.s32.totalorder %s5792_s22, 1 }
  0x10   : > { %s7697_s25 = smov (!%p251_p3, %s4178_s25), 63  ;;  %4946 = vmatprep.subr.bf16.mxu0 %v5661_v1  ;;  %v5665_v25 = vld [vmem:[%s7397_s2 + $0x60] sm:$0xff]   ;;  %5378 = vmatprep.subr.bf16.mxu1 %v5667_v23  ;;  %v5666_v30 = vld [vmem:[%s7397_s2 + $0x68] sm:$0xff]   ;;  %v5669_v36 = vld [vmem:[%s7397_s2 + $0x70] sm:$0xff]  }
  0x11   : > { %s4179_s28 = sshll.u32 %s7697_s25, 3  ;;  %5386 = vmatpush3.bf16.msra.mxu1 %v5667_v23  ;;  %v5671_v60 = vld [vmem:[%s7397_s2 + $0x118] sm:$0xff]   ;;  %v5673_v61 = vld [vmem:[%s7397_s2 + $0x120] sm:$0xff]   ;;  %v5674_v63 = vld [vmem:[%s7397_s2 + $0x128] sm:$0xff]   ;;  %s7699_s22 = smov (!%p262_p4, %s5792_s22), 1 }
  0x12   : > { %s5811_s7 = scalar_lea.vmem %s7395_s0, %s4179_s28  ;;  %5379 = vmatprep.subr.bf16.mxu1 %v5668_v26  ;;  %v5672_v62 = vld [vmem:[%s7397_s2 + $0x78] sm:$0xff]   ;;  %s7328_s12 = scalar_lea.vmem %s7400_s5, %s4179_s28 }
  0x13   : > { %v267_v3 = vld [vmem:[%s5811_s7] sm:$0xff]  ;;  %v268_v4 = vld [vmem:[%s5811_s7 + $0x8] sm:$0xff]  ;;  %v269_v5 = vld [vmem:[%s5811_s7 + $0x10] sm:$0xff]  ;;  %s4182_s25 = sshll.u32 %s7699_s22, 1 }
  0x14   : > { %v299_v6 = vpack.c.bf16 %v268_v4, %v267_v3  ;;  %v270_v7 = vld [vmem:[%s5811_s7 + $0x18] sm:$0xff]  ;;  %v271_v8 = vld [vmem:[%s5811_s7 + $0x20] sm:$0xff]  ;;  %v272_v9 = vld [vmem:[%s5811_s7 + $0x28] sm:$0xff]  ;;  %s265_s14 = scalar_lea.vmem %s7401_s6, %s4182_s25 }
  0x15   : > { %v300_v10 = vpack.c.bf16 %v270_v7, %v269_v5  ;;  %v301_v11 = vpack.c.bf16 %v272_v9, %v271_v8  ;;  %v273_v13 = vld [vmem:[%s5811_s7 + $0x30] sm:$0xff]  ;;  %v274_v14 = vld [vmem:[%s5811_s7 + $0x38] sm:$0xff]  ;;  %v275_v15 = vld [vmem:[%s5811_s7 + $0x40] sm:$0xff]  ;;  %5387 = vmatpush3.bf16.msra.mxu1 %v5668_v26  ;;  %v640_v5 = vlaneseq }
  0x16   : > { %4914 = vmatprep.mubr.msk.bf16.mxu0 %vm316_vm1, %v299_v6  ;;  %v276_v16 = vld [vmem:[%s5811_s7 + $0x48] sm:$0xff]  ;;  %v302_v18 = vpack.c.bf16 %v274_v14, %v273_v13  ;;  %v277_v21 = vld [vmem:[%s5811_s7 + $0x50] sm:$0xff]  ;;  %v278_v22 = vld [vmem:[%s5811_s7 + $0x58] sm:$0xff]  ;;  %5380 = vmatprep.subr.bf16.mxu1 %v5670_v28 }
  0x17   : > { %4915 = vmatmul.mubr.msk.bf16.vlgmr.msra.gmra.mrb[0].mxu0 %vm316_vm1, %v300_v10  ;;  %v303_v19 = vpack.c.bf16 %v276_v16, %v275_v15  ;;  %v279_v24 = vld [vmem:[%s5811_s7 + $0x60] sm:$0xff]  ;;  %v280_v27 = vld [vmem:[%s5811_s7 + $0x68] sm:$0xff]  ;;  %v304_v29 = vpack.c.bf16 %v278_v22, %v277_v21  ;;  %v281_v32 = vld [vmem:[%s5811_s7 + $0x70] sm:$0xff] }
  0x18   : > { %4918 = vmatprep.mubr.msk.bf16.mxu0 %vm316_vm1, %v301_v11  ;;  %4947 = vmatpush3.bf16.msra.mxu0 %v5661_v1  ;;  %v305_v31 = vpack.c.bf16 %v280_v27, %v279_v24  ;;  %v282_v33 = vld [vmem:[%s5811_s7 + $0x78] sm:$0xff]  ;;  %v283_v34 = vld [vmem:[%s5811_s7 + $0x80] sm:$0xff]  ;;  %v284_v35 = vld [vmem:[%s5811_s7 + $0x88] sm:$0xff]  ;;  %v5927_v11 = vshrl.u32 %v640_v5, 7 }
  0x19   : > { %4948 = vmatprep.subr.bf16.mxu0 %v5662_v12  ;;  %5388 = vmatpush3.bf16.msra.mxu1 %v5670_v28  ;;  %v306_v37 = vpack.c.bf16 %v282_v33, %v281_v32  ;;  %v307_v38 = vpack.c.bf16 %v284_v35, %v283_v34  ;;  %v285_v39 = vld [vmem:[%s5811_s7 + $0x90] sm:$0xff]  ;;  %v286_v40 = vld [vmem:[%s5811_s7 + $0x98] sm:$0xff]  ;;  %v287_v41 = vld [vmem:[%s5811_s7 + $0xa0] sm:$0xff] }
  0x1a   : > { %v288_v42 = vld [vmem:[%s5811_s7 + $0xa8] sm:$0xff]  ;;  %v308_v43 = vpack.c.bf16 %v286_v40, %v285_v39  ;;  %v289_v45 = vld [vmem:[%s5811_s7 + $0xb0] sm:$0xff]  ;;  %v290_v46 = vld [vmem:[%s5811_s7 + $0xb8] sm:$0xff]  ;;  %5381 = vmatprep.subr.bf16.mxu1 %v5671_v60  ;;  %vm1314_vm2 = vcmp.lt.s32.totalorder %v5927_v11, 7  ;;  %vm1121_vm3 = vcmp.lt.s32.totalorder %v5927_v11, 1 }
  0x1b   : > { %v309_v44 = vpack.c.bf16 %v288_v42, %v287_v41  ;;  %v291_v47 = vld [vmem:[%s5811_s7 + $0xc0] sm:$0xff]  ;;  %v292_v48 = vld [vmem:[%s5811_s7 + $0xc8] sm:$0xff]  ;;  %v310_v49 = vpack.c.bf16 %v290_v46, %v289_v45  ;;  %v293_v51 = vld [vmem:[%s5811_s7 + $0xd0] sm:$0xff] }
  0x1c   : > { %4949 = vmatpush3.bf16.msra.mxu0 %v5662_v12  ;;  %v311_v50 = vpack.c.bf16 %v292_v48, %v291_v47  ;;  %v294_v52 = vld [vmem:[%s5811_s7 + $0xd8] sm:$0xff]  ;;  %v295_v53 = vld [vmem:[%s5811_s7 + $0xe0] sm:$0xff]  ;;  %v296_v54 = vld [vmem:[%s5811_s7 + $0xe8] sm:$0xff] }
  0x1d   : > { %4950 = vmatprep.subr.bf16.mxu0 %v5663_v17  ;;  %v312_v55 = vpack.c.bf16 %v294_v52, %v293_v51  ;;  %v313_v56 = vpack.c.bf16 %v296_v54, %v295_v53  ;;  %v297_v57 = vld [vmem:[%s5811_s7 + $0xf0] sm:$0xff]  ;;  %v298_v58 = vld [vmem:[%s5811_s7 + $0xf8] sm:$0xff]  ;;  %5389 = vmatpush3.bf16.msra.mxu1 %v5671_v60  ;;  %v5675_v3 = vld [vmem:[%s7397_s2] sm:$0xff]  }
  0x1e   : > { %v314_v59 = vpack.c.bf16 %v298_v58, %v297_v57  ;;  %5382 = vmatprep.subr.bf16.mxu1 %v5673_v61  ;;  %v5676_v1 = vld [vmem:[%s7397_s2 + $0x130] sm:$0xff]   ;;  %v5677_v2 = vld [vmem:[%s7397_s2 + $0x138] sm:$0xff]   ;;  %v5913_v4 = vld [vmem:[%s7397_s2 + $0x140] sm:$0xff]  }
  0x1f   : > { %4919 = vmatmul.mubr.msk.bf16.gmra.mrb[4].mxu0 %vm316_vm1, %v302_v18  ;;  %v5919_v6 = vld [vmem:[%s7398_s3] ss:$0 sm:$0xff]  ;;  %v5678_v42 = vld [vmem:[%s7397_s2 + $0x8] sm:$0xff]   ;;  %v5681_v58 = vld [vmem:[%s7397_s2 + $0x10] sm:$0xff]  }
  0x20   : > { %4922 = vmatprep.mubr.msk.bf16.mxu0 %vm316_vm1, %v303_v19  ;;  %4951 = vmatpush3.bf16.msra.mxu0 %v5663_v17  ;;  %v5924_v8 = vld [vmem:[%s7399_s4] ss:$0 sm:$0xff]  ;;  %v5933_v17 = vadd.s32 8, %v5927_v11 }
  0x21   : > { %4952 = vmatprep.subr.bf16.mxu0 %v5664_v20  ;;  %5390 = vmatpush3.bf16.msra.mxu1 %v5673_v61 }
  0x22   : > { %5383 = vmatprep.subr.bf16.mxu1 %v5674_v63 }
  0x24   : > { %4953 = vmatpush3.bf16.msra.mxu0 %v5664_v20 }
  0x25   : > { %4954 = vmatprep.subr.bf16.mxu0 %v5665_v25  ;;  %5391 = vmatpush3.bf16.msra.mxu1 %v5674_v63  ;;  %v6004_v63 = vadd.s32 24, %v5927_v11 }
  0x26   : > { %5384 = vmatprep.subr.bf16.mxu1 %v5676_v1 }
  0x27   : > { %4923 = vmatmul.mubr.msk.bf16.gmra.mrb[8].mxu0 %vm316_vm1, %v304_v29 }
  0x28   : > { %4926 = vmatprep.mubr.msk.bf16.mxu0 %vm316_vm1, %v305_v31  ;;  %4955 = vmatpush3.bf16.msra.mxu0 %v5665_v25 }
  0x29   : > { %4956 = vmatprep.subr.bf16.mxu0 %v5666_v30  ;;  %5392 = vmatpush3.bf16.msra.mxu1 %v5676_v1  ;;  %v6007_v1 = vadd.s32 40, %v5927_v11 }
  0x2a   : > { %5385 = vmatprep.subr.bf16.mxu1 %v5677_v2 }
  0x2c   : > { %4957 = vmatpush3.bf16.msra.mxu0 %v5666_v30 }
  0x2d   : > { %4958 = vmatprep.subr.bf16.mxu0 %v5669_v36  ;;  %5393 = vmatpush3.bf16.msra.mxu1 %v5677_v2 }
  0x2e   : > { %5186 = vmatprep.subr.bf16.mxu1 %v5913_v4 }
  0x2f   : > { %4927 = vmatmul.mubr.msk.bf16.gmra.mrb[12].mxu0 %vm316_vm1, %v306_v37 }
  0x30   : > { %4930 = vmatprep.mubr.msk.bf16.mxu0 %vm316_vm1, %v307_v38  ;;  %4959 = vmatpush3.bf16.msra.mxu0 %v5669_v36 }
  0x31   : > { %4960 = vmatprep.subr.bf16.mxu0 %v5672_v62 }
  0x34   : > { %4961 = vmatpush3.bf16.msra.mxu0 %v5672_v62  ;;  %v6001_v62 = vadd.s32 16, %v5927_v11 }
  0x35   : > { %4994 = vmatprep.subr.bf16.mxu0 %v5675_v3 }
  0x37   : > { %4931 = vmatmul.mubr.msk.bf16.gmra.mrb[16].mxu0 %vm316_vm1, %v308_v43 }
  0x38   : > { %4934 = vmatprep.mubr.msk.bf16.mxu0 %vm316_vm1, %v309_v44 }
  0x3f   : > { %4935 = vmatmul.mubr.msk.bf16.gmra.mrb[20].mxu0 %vm316_vm1, %v310_v49 }
  0x40   : > { %4938 = vmatprep.mubr.msk.bf16.mxu0 %vm316_vm1, %v311_v50 }
  0x47   : > { %4939 = vmatmul.mubr.msk.bf16.gmra.mrb[24].mxu0 %vm316_vm1, %v312_v55 }
  0x48   : > { %4942 = vmatprep.mubr.msk.bf16.mxu0 %vm316_vm1, %v313_v56 }
  0x4f   : > { %4943 = vmatmul.mubr.msk.bf16.gmra.mrb[28].mxu0 %vm316_vm1, %v314_v59 }
  0x50   : > { %4962 = vmatprep.mubr.bf16.mxu0 %v7403_v0 }
  0xea   : > { %v4916_v7 = vpop.f32.mrb[0].mxu0 }
  0xeb   : > { %v539_v9 = vmul.f32 %v4916_v7, %v5919_v6  ;;  %v403_v10 = vpop.f32.mrb[1].mxu0 }
  0xec   : > { %v537_v12 = vmul.f32 %v5919_v6, %v403_v10  ;;  %v4917_v13 = vpop.f32.mrb[2].mxu0 }
  0xed   : > { %v578_v14 = vadd.f32 %v5924_v8, %v539_v9  ;;  %v540_v15 = vmul.f32 %v4917_v13, %v5919_v6  ;;  %v406_v16 = vpop.f32.mrb[3].mxu0 }
  0xee   : > { %v576_v18 = vadd.f32 %v5924_v8, %v537_v12  ;;  %v538_v19 = vmul.f32 %v5919_v6, %v406_v16 }
  0xef   : > { %v610_v20 = vmax.f32 %v578_v14, 0.0  ;;  %v579_v21 = vadd.f32 %v5924_v8, %v540_v15 }
  0xf0   : > { %v5938_v22 = vmax.f32 %v576_v18, 0.0  ;;  %v577_v23 = vadd.f32 %v5924_v8, %v538_v19 }
  0xf1   : > { %v1091_v24 = vrot.slane %v610_v20, 7  ;;  %v5942_v25 = vmax.f32 %v579_v21, 0.0  ;;  %v1284_v27 = vrot.slane %v610_v20, 1 }
  0xf2   : > { %v7405_v28 = vrot.slane %v5938_v22, 7  ;;  %v7402_v29 = vrot.slane %v5938_v22, 1  ;;  %v609_v30 = vmax.f32 %v577_v23, 0.0  ;;  %v4920_v31 = vpop.f32.mrb[4].mxu0 }
  0xf3   : > { %v1092_v32 = vrot.slane %v5942_v25, 7  ;;  %v1285_v33 = vrot.slane %v5942_v25, 1  ;;  %v543_v34 = vmul.f32 %v4920_v31, %v5919_v6  ;;  %v419_v35 = vpop.f32.mrb[5].mxu0  ;;  %v5952_v36 = vpack.c.bf16 %v5942_v25, %v610_v20 }
  0xf4   : > { %v1090_v37 = vrot.slane %v609_v30, 7  ;;  %v1283_v38 = vrot.slane %v609_v30, 1  ;;  %v5955_v39 = vpack.c.bf16 %v609_v30, %v5938_v22  ;;  %v541_v40 = vmul.f32 %v5919_v6, %v419_v35  ;;  %v4921_v41 = vpop.f32.mrb[6].mxu0 }
  0xf5   : > { %7479 = vst [vmem:[#allocation5_spill] sm:$0xff] %v5952_v36  ;;  %v1343_v43 = vsel %vm1314_vm2, %v1284_v27, %v1285_v33  ;;  %v582_v44 = vadd.f32 %v5924_v8, %v543_v34  ;;  %v544_v45 = vmul.f32 %v4921_v41, %v5919_v6  ;;  %v422_v46 = vpop.f32.mrb[7].mxu0  ;;  %v1150_v47 = vsel %vm1121_vm3, %v1091_v24, %v1092_v32 }
  0xf6   : > { %7480 = vst [vmem:[#allocation6_spill] sm:$0xff] %v5955_v39  ;;  %v5973_v48 = vsel %vm1121_vm3, %v7405_v28, %v1090_v37  ;;  %v580_v49 = vadd.f32 %v5924_v8, %v541_v40  ;;  %v542_v50 = vmul.f32 %v5919_v6, %v422_v46  ;;  %4963 = vmatmul.mubr.bf16.vlgmr.msra.gmra.mrb[32].mxu0 %v5955_v39 }
  0xf7   : > { %v1344_v51 = vsel %vm1314_vm2, %v1283_v38, %v1284_v27  ;;  %v5980_v52 = vmax.f32 %v582_v44, 0.0  ;;  %v583_v53 = vadd.f32 %v5924_v8, %v544_v45  ;;  %4966 = vmatprep.mubr.bf16.mxu0 %v5952_v36  ;;  %4995 = vmatpush3.bf16.msra.mxu0 %v5675_v3  ;;  %v1345_v54 = vsel %vm1314_vm2, %v7402_v29, %v1283_v38 }
  0xf8   : > { %v1151_v55 = vsel %vm1121_vm3, %v1090_v37, %v1091_v24  ;;  %v612_v56 = vmax.f32 %v580_v49, 0.0  ;;  %v581_v57 = vadd.f32 %v5924_v8, %v542_v50  ;;  %4996 = vmatprep.subr.bf16.mxu0 %v5678_v42  ;;  %v5994_v59 = vpack.c.bf16 %v1344_v51, %v1345_v54  ;;  %v5683_v37 = vld [vmem:[%s7397_s2 + $0x18] sm:$0xff]  }
  0xf9   : > { %v5996_v60 = vpack.c.bf16 %v1150_v47, %v1151_v55  ;;  %v5998_v61 = vmax.f32 %v583_v53, 0.0  ;;  %v1095_v2 = vrot.slane %v5980_v52, 7  ;;  %v1288_v3 = vrot.slane %v5980_v52, 1 }
  0xfa   : > { %v1286_v5 = vrot.slane %v612_v56, 1  ;;  %v613_v7 = vmax.f32 %v581_v57, 0.0  ;;  %v4924_v9 = vpop.f32.mrb[8].mxu0  ;;  %v1093_v10 = vrot.slane %v612_v56, 7  ;;  %v7605_v36 = vmov 0 }
  0xfb   : > { %v1096_v12 = vrot.slane %v5998_v61, 7  ;;  %v547_v13 = vmul.f32 %v4924_v9, %v5919_v6  ;;  %v435_v14 = vpop.f32.mrb[9].mxu0  ;;  %v6015_v15 = vpack.c.bf16 %v5998_v61, %v5980_v52  ;;  %4997 = vmatpush3.bf16.msra.mxu0 %v5678_v42 }
  0xfc   : > { %v1342_v16 = vsel %vm1314_vm2, %v1285_v33, %v1286_v5  ;;  %v1094_v18 = vrot.slane %v613_v7, 7  ;;  %v1287_v19 = vrot.slane %v613_v7, 1  ;;  %v545_v20 = vmul.f32 %v5919_v6, %v435_v14  ;;  %v4925_v21 = vpop.f32.mrb[10].mxu0  ;;  %4998 = vmatprep.subr.bf16.mxu0 %v5681_v58  ;;  %v5680_v33 = vld [vmem:[%s7397_s2 + $0x148] sm:$0xff]  }
  0xfd   : > { %7481 = vst [vmem:[#allocation7_spill] sm:$0xff] %v6015_v15  ;;  %v6020_v23 = vpack.c.bf16 %v1342_v16, %v1343_v43  ;;  %v586_v24 = vadd.f32 %v5924_v8, %v547_v13  ;;  %v548_v27 = vmul.f32 %v4925_v21, %v5919_v6  ;;  %v438_v30 = vpop.f32.mrb[11].mxu0  ;;  %v6024_v31 = vpack.c.bf16 %v613_v7, %v612_v56  ;;  %v5682_v56 = vld [vmem:[%s7397_s2 + $0x150] sm:$0xff]  }
  0xfe   : > { %v584_v34 = vadd.f32 %v5924_v8, %v545_v20  ;;  %v546_v35 = vmul.f32 %v5919_v6, %v438_v30  ;;  %v1340_v38 = vsel %vm1314_vm2, %v1287_v19, %v1288_v3  ;;  %v1341_v40 = vsel %vm1314_vm2, %v1286_v5, %v1287_v19 }
  0xff   : > { %7482 = vst [vmem:[#allocation8_spill] sm:$0xff] %v6024_v31  ;;  %v6040_v41 = vmax.f32 %v586_v24, 0.0  ;;  %v587_v42 = vadd.f32 %v5924_v8, %v548_v27  ;;  %4967 = vmatmul.mubr.bf16.gmra.mrb[36].mxu0 %v6024_v31  ;;  %5158 = vmatprep.mubr.bf16.mxu1 %v6024_v31  ;;  %v6045_v43 = vpack.c.bf16 %v1340_v38, %v1341_v40  ;;  %v5684_v40 = vld [vmem:[%s7397_s2 + $0x158] sm:$0xff]   ;;  %v7535_v31 = vrot.slane %v5938_v22, 7 }
 0x100   : > { %v1148_v44 = vsel %vm1121_vm3, %v1093_v10, %v1094_v18  ;;  %v6049_v45 = vmax.f32 %v584_v34, 0.0  ;;  %v585_v46 = vadd.f32 %v5924_v8, %v546_v35  ;;  %4970 = vmatprep.mubr.bf16.mxu0 %v6015_v15  ;;  %5159 = vmatmul.mubr.bf16.vlgmr.msra.gmra.mrb[0].mxu1 %v6015_v15  ;;  %v1149_v47 = vsel %vm1121_vm3, %v1092_v32, %v1093_v10  ;;  %v5685_v10 = vld [vmem:[%s7397_s2 + $0x20] sm:$0xff]  }
 0x101   : > { %v1146_v49 = vsel %vm1121_vm3, %v1095_v2, %v1096_v12  ;;  %v6062_v50 = vmax.f32 %v587_v42, 0.0  ;;  %5187 = vmatpush3.bf16.msra.mxu1 %v5913_v4  ;;  %4999 = vmatpush3.bf16.msra.mxu0 %v5681_v58  ;;  %v6067_v54 = vpack.c.bf16 %v1148_v44, %v1149_v47  ;;  %v1147_v57 = vsel %vm1121_vm3, %v1094_v18, %v1095_v2 }
 0x102   : > { %v1290_v25 = vrot.slane %v6049_v45, 1  ;;  %v6070_v55 = vmax.f32 %v585_v46, 0.0  ;;  %v4928_v32 = vpop.f32.mrb[12].mxu0  ;;  %5188 = vmatprep.subr.bf16.mxu1 %v5680_v33  ;;  %5000 = vmatprep.subr.bf16.mxu0 %v5683_v37  ;;  %v1289_v58 = vrot.slane %v5998_v61, 1  ;;  %v1292_v14 = vrot.slane %v6040_v41, 1  ;;  %v5691_v61 = vld [vmem:[%s7397_s2 + $0x38] sm:$0xff]  }
 0x103   : > { %v551_v5 = vmul.f32 %v4928_v32, %v5919_v6  ;;  %v451_v7 = vpop.f32.mrb[13].mxu0  ;;  %v6082_v9 = vpack.c.bf16 %v6062_v50, %v6040_v41  ;;  %v1097_v20 = vrot.slane %v6049_v45, 7  ;;  %v6098_v30 = vpack.c.bf16 %v1146_v49, %v1147_v57 }
 0x104   : > { %v1291_v16 = vrot.slane %v6070_v55, 1  ;;  %v549_v2 = vmul.f32 %v5919_v6, %v451_v7  ;;  %v4929_v18 = vpop.f32.mrb[14].mxu0  ;;  %v6093_v19 = vpack.c.bf16 %v6070_v55, %v6049_v45  ;;  %v1098_v34 = vrot.slane %v6070_v55, 7 }
 0x105   : > { %7483 = vst [vmem:[#allocation9_spill] sm:$0xff] %v6082_v9  ;;  %v590_v21 = vadd.f32 %v5924_v8, %v551_v5  ;;  %v552_v24 = vmul.f32 %v4929_v18, %v5919_v6  ;;  %v454_v27 = vpop.f32.mrb[15].mxu0  ;;  %5189 = vmatpush3.bf16.msra.mxu1 %v5680_v33  ;;  %5001 = vmatpush3.bf16.msra.mxu0 %v5683_v37  ;;  %v5687_v33 = vld [vmem:[%s7397_s2 + $0x28] sm:$0xff]   ;;  %v1099_v7 = vrot.slane %v6040_v41, 7 }
 0x106   : > { %7484 = vst [vmem:[#allocation10_spill] sm:$0xff] %v6093_v19  ;;  %v588_v35 = vadd.f32 %v5924_v8, %v549_v2  ;;  %v550_v38 = vmul.f32 %v5919_v6, %v454_v27  ;;  %5162 = vmatprep.mubr.bf16.mxu1 %v6093_v19  ;;  %5190 = vmatprep.subr.bf16.mxu1 %v5682_v56 }
 0x107   : > { %v1338_v37 = vsel %vm1314_vm2, %v1289_v58, %v1290_v25  ;;  %v6112_v42 = vmax.f32 %v590_v21, 0.0  ;;  %v591_v44 = vadd.f32 %v5924_v8, %v552_v24  ;;  %4971 = vmatmul.mubr.bf16.gmra.mrb[40].mxu0 %v6093_v19  ;;  %5002 = vmatprep.subr.bf16.mxu0 %v5685_v10  ;;  %v1339_v45 = vsel %vm1314_vm2, %v1288_v3, %v1289_v58 }
 0x108   : > { %v1336_v46 = vsel %vm1314_vm2, %v1291_v16, %v1292_v14  ;;  %v6124_v47 = vmax.f32 %v588_v35, 0.0  ;;  %v589_v49 = vadd.f32 %v5924_v8, %v550_v38  ;;  %4974 = vmatprep.mubr.bf16.mxu0 %v6082_v9  ;;  %5163 = vmatmul.mubr.bf16.gmra.mrb[4].mxu1 %v6082_v9  ;;  %v6129_v32 = vpack.c.bf16 %v1338_v37, %v1339_v45  ;;  %v5689_v38 = vld [vmem:[%s7397_s2 + $0x30] sm:$0xff]  }
 0x109   : > { %v1337_v52 = vsel %vm1314_vm2, %v1290_v25, %v1291_v16  ;;  %v6133_v57 = vmax.f32 %v591_v44, 0.0  ;;  %5191 = vmatpush3.bf16.msra.mxu1 %v5682_v56  ;;  %5003 = vmatpush3.bf16.msra.mxu0 %v5685_v10  ;;  %v6136_v3 = vadd.s32 32, %v5927_v11  ;;  %v6139_v58 = vadd.s32 48, %v5927_v11  ;;  %v5686_v25 = vld [vmem:[%s7397_s2 + $0x160] sm:$0xff]  }
 0x10a   : > { %v6141_v5 = vpack.c.bf16 %v1336_v46, %v1337_v52  ;;  %v6144_v2 = vmax.f32 %v589_v49, 0.0  ;;  %v4932_v18 = vpop.f32.mrb[16].mxu0  ;;  %5192 = vmatprep.subr.bf16.mxu1 %v5684_v40  ;;  %5004 = vmatprep.subr.bf16.mxu0 %v5687_v33  ;;  %v6150_v56 = vadd.s32 56, %v5927_v11  ;;  %v1144_v10 = vsel %vm1121_vm3, %v1097_v20, %v1098_v34 }
 0x10b   : > { %v1100_v16 = vrot.slane %v6062_v50, 7  ;;  %v1293_v21 = vrot.slane %v6062_v50, 1  ;;  %v555_v24 = vmul.f32 %v4932_v18, %v5919_v6  ;;  %v467_v27 = vpop.f32.mrb[17].mxu0  ;;  %v6161_v35 = vpack.c.bf16 %v6133_v57, %v6112_v42 }
 0x10c   : > { %v1103_v37 = vrot.slane %v6112_v42, 7  ;;  %v1294_v44 = vrot.slane %v6124_v47, 1  ;;  %v553_v45 = vmul.f32 %v5919_v6, %v467_v27  ;;  %v4933_v46 = vpop.f32.mrb[18].mxu0  ;;  %v6171_v49 = vpack.c.bf16 %v6144_v2, %v6124_v47 }
 0x10d   : > { %7485 = vst [vmem:[#allocation11_spill] sm:$0xff] %v6161_v35  ;;  %v7407_v52 = vrot.slane %v6112_v42, 1  ;;  %v594_v18 = vadd.f32 %v5924_v8, %v555_v24  ;;  %v556_v29 = vmul.f32 %v4933_v46, %v5919_v6  ;;  %v470_v0 = vpop.f32.mrb[19].mxu0  ;;  %5193 = vmatpush3.bf16.msra.mxu1 %v5684_v40  ;;  %5005 = vmatpush3.bf16.msra.mxu0 %v5687_v33  ;;  %v1101_v27 = vrot.slane %v6124_v47, 7  ;;  %v5688_v24 = vld [vmem:[%s7397_s2 + $0x168] sm:$0xff]  }
 0x10e   : > { %7486 = vst [vmem:[#allocation12_spill] sm:$0xff] %v6171_v49  ;;  %v1145_v28 = vsel %vm1121_vm3, %v1096_v12, %v1097_v20  ;;  %v592_v13 = vadd.f32 %v5924_v8, %v553_v45  ;;  %v554_v4 = vmul.f32 %v5919_v6, %v470_v0  ;;  %5166 = vmatprep.mubr.bf16.mxu1 %v6171_v49  ;;  %v7406_v55 = vrot.slane %v6133_v57, 7 }
 0x10f   : > { %5194 = vmatprep.subr.bf16.mxu1 %v5686_v25  ;;  %v6190_v40 = vpack.c.bf16 %v1144_v10, %v1145_v28  ;;  %v6192_v12 = vmax.f32 %v594_v18, 0.0  ;;  %v595_v20 = vadd.f32 %v5924_v8, %v556_v29  ;;  %4975 = vmatmul.mubr.bf16.gmra.mrb[44].mxu0 %v6171_v49  ;;  %v1142_v0 = vsel %vm1121_vm3, %v1099_v7, %v1100_v16 }
 0x110   : > { %5006 = vmatprep.subr.bf16.mxu0 %v5689_v38  ;;  %v1143_v33 = vsel %vm1121_vm3, %v1098_v34, %v1099_v7  ;;  %v6204_v45 = vmax.f32 %v592_v13, 0.0  ;;  %v593_v28 = vadd.f32 %v5924_v8, %v554_v4  ;;  %4978 = vmatprep.mubr.bf16.mxu0 %v6161_v35  ;;  %v1334_v10 = vsel %vm1314_vm2, %v1293_v21, %v1294_v44 }
 0x111   : > { %5167 = vmatmul.mubr.bf16.gmra.mrb[8].mxu1 %v6161_v35  ;;  %v6209_v29 = vpack.c.bf16 %v1142_v0, %v1143_v33  ;;  %v1295_v46 = vrot.slane %v6144_v2, 1  ;;  %v6217_v34 = vmax.f32 %v595_v20, 0.0  ;;  %5007 = vmatpush3.bf16.msra.mxu0 %v5689_v38  ;;  %v1335_v4 = vsel %vm1314_vm2, %v1292_v14, %v1293_v21  ;;  %v5690_v20 = vld [vmem:[%s7397_s2 + $0x170] sm:$0xff]   ;;  %v6242_v33 = vld [vmem:[%s7397_s2 + $0x80] sm:$0xff]  }
 0x112   : > { %5195 = vmatpush3.bf16.msra.mxu1 %v5686_v25  ;;  %v1102_v7 = vrot.slane %v6144_v2, 7  ;;  %v6225_v18 = vmax.f32 %v593_v28, 0.0  ;;  %v4936_v0 = vpop.f32.mrb[20].mxu0  ;;  %5008 = vmatprep.subr.bf16.mxu0 %v5691_v61  ;;  %v6230_v25 = vpack.c.bf16 %v1334_v10, %v1335_v4  ;;  %v7492_v50 = vrot.slane %v6133_v57, 1 }
 0x113   : > { %5196 = vmatprep.subr.bf16.mxu1 %v5688_v24  ;;  %v559_v14 = vmul.f32 %v4936_v0, %v5919_v6  ;;  %v483_v21 = vpop.f32.mrb[21].mxu0  ;;  %v6237_v2 = vpack.c.bf16 %v6217_v34, %v6192_v12  ;;  %v1332_v28 = vsel %vm1314_vm2, %v1295_v46, %v7407_v52  ;;  %v7491_v52 = vrot.slane %v6204_v45, 1 }
 0x114   : > { %v557_v4 = vmul.f32 %v5919_v6, %v483_v21  ;;  %v4937_v53 = vpop.f32.mrb[22].mxu0  ;;  %v6249_v0 = vpack.c.bf16 %v6225_v18, %v6204_v45  ;;  %v7511_v49 = vrot.slane %v6217_v34, 1  ;;  %v649_v19 = vadd.s32 64, %v5927_v11 }
 0x115   : > { %7487 = vst [vmem:[#allocation13_spill] sm:$0xff] %v6237_v2  ;;  %v598_v41 = vadd.f32 %v5924_v8, %v559_v14  ;;  %v560_v26 = vmul.f32 %v4937_v53, %v5919_v6  ;;  %v486_v38 = vpop.f32.mrb[23].mxu0  ;;  %5009 = vmatpush3.bf16.msra.mxu0 %v5691_v61  ;;  %v5692_v53 = vld [vmem:[%s7397_s2 + $0x178] sm:$0xff]  }
 0x116   : > { %7488 = vst [vmem:[#allocation14_spill] sm:$0xff] %v6249_v0  ;;  %5197 = vmatpush3.bf16.msra.mxu1 %v5688_v24  ;;  %v596_v13 = vadd.f32 %v5924_v8, %v557_v4  ;;  %v558_v10 = vmul.f32 %v5919_v6, %v486_v38  ;;  %5170 = vmatprep.mubr.bf16.mxu1 %v6249_v0 }
 0x117   : > { %5198 = vmatprep.subr.bf16.mxu1 %v5690_v20  ;;  %v1333_v24 = vsel %vm1314_vm2, %v1294_v44, %v1295_v46  ;;  %v6269_v61 = vmax.f32 %v598_v41, 0.0  ;;  %v599_v14 = vadd.f32 %v5924_v8, %v560_v26  ;;  %4979 = vmatmul.mubr.bf16.gmra.mrb[48].mxu0 %v6249_v0  ;;  %v1140_v4 = vsel %vm1121_vm3, %v1101_v27, %v1102_v7 }
 0x118   : > { %5042 = vmatprep.subr.bf16.mxu0 %v6242_v33  ;;  %v6274_v38 = vpack.c.bf16 %v1332_v28, %v1333_v24  ;;  %v6280_v21 = vmax.f32 %v596_v13, 0.0  ;;  %v597_v51 = vadd.f32 %v5924_v8, %v558_v10  ;;  %4982 = vmatprep.mubr.bf16.mxu0 %v6237_v2  ;;  %v1141_v26 = vsel %vm1121_vm3, %v1100_v16, %v1101_v27  ;;  %v6310_v10 = vld [vmem:[%s7397_s2 + $0x180] sm:$0xff]  }
 0x119   : > { %5171 = vmatmul.mubr.bf16.gmra.mrb[12].mxu1 %v6237_v2  ;;  %v1138_v44 = vsel %vm1121_vm3, %v1103_v37, %v7406_v55  ;;  %v1299_v13 = vrot.slane %v6225_v18, 1  ;;  %v6299_v41 = vmax.f32 %v599_v14, 0.0  ;;  %v6301_v47 = vpack.c.bf16 %v1140_v4, %v1141_v26 }
 0x11a   : > { %5199 = vmatpush3.bf16.msra.mxu1 %v5690_v20  ;;  %v6305_v27 = vmax.f32 %v597_v51, 0.0  ;;  %v4940_v28 = vpop.f32.mrb[24].mxu0  ;;  %v1139_v20 = vsel %vm1121_vm3, %v1102_v7, %v1103_v37  ;;  %v7500_v0 = vrot.slane %v6133_v57, 7  ;;  %v7507_v57 = vrot.slane %v6192_v12, 7 }
 0x11b   : > { %5200 = vmatprep.subr.bf16.mxu1 %v5692_v53  ;;  %v563_v4 = vmul.f32 %v4940_v28, %v5919_v6  ;;  %v499_v51 = vpop.f32.mrb[25].mxu0  ;;  %v6321_v26 = vpack.c.bf16 %v6299_v41, %v6269_v61  ;;  %v6332_v14 = vpack.c.bf16 %v1138_v44, %v1139_v20  ;;  %v7494_v44 = vrot.slane %v6112_v42, 1 }
 0x11c   : > { %v561_v55 = vmul.f32 %v5919_v6, %v499_v51  ;;  %v4941_v46 = vpop.f32.mrb[26].mxu0  ;;  %v6328_v37 = vpack.c.bf16 %v6305_v27, %v6280_v21  ;;  %v1330_v51 = vsel %vm1314_vm2, %v7492_v50, %v7491_v52 }
 0x11d   : > { %7489 = vst [vmem:[#allocation15_spill] sm:$0xff] %v6321_v26  ;;  %v602_v7 = vadd.f32 %v5924_v8, %v563_v4  ;;  %v564_v28 = vmul.f32 %v4941_v46, %v5919_v6  ;;  %v502_v24 = vpop.f32.mrb[27].mxu0 }
 0x11e   : > { %7490 = vst [vmem:[#allocation16_spill] sm:$0xff] %v6328_v37  ;;  %5201 = vmatpush3.bf16.msra.mxu1 %v5692_v53  ;;  %v600_v39 = vadd.f32 %v5924_v8, %v561_v55  ;;  %v562_v2 = vmul.f32 %v5919_v6, %v502_v24  ;;  %5174 = vmatprep.mubr.bf16.mxu1 %v6328_v37  ;;  %v7493_v53 = vmov %v7492_v50  ;;  %v7495_v50 = vrot.slane %v6192_v12, 1 }
 0x11f   : > { %5234 = vmatprep.subr.bf16.mxu1 %v6310_v10  ;;  %v1331_v46 = vsel %vm1314_vm2, %v7494_v44, %v7493_v53  ;;  %v6351_v20 = vmax.f32 %v602_v7, 0.0  ;;  %v603_v52 = vadd.f32 %v5924_v8, %v564_v28  ;;  %4983 = vmatmul.mubr.bf16.gmra.mrb[52].mxu0 %v6328_v37  ;;  %v7496_v7 = vrot.slane %v6204_v45, 1 }
 0x120   : > { %v6355_v55 = vpack.c.bf16 %v1330_v51, %v1331_v46  ;;  %v1328_v24 = vsel %vm1314_vm2, %v1299_v13, %v7495_v50  ;;  %v6361_v4 = vmax.f32 %v600_v39, 0.0  ;;  %v601_v42 = vadd.f32 %v5924_v8, %v562_v2  ;;  %4986 = vmatprep.mubr.bf16.mxu0 %v6321_v26 }
 0x121   : > { %5175 = vmatmul.mubr.bf16.gmra.mrb[16].mxu1 %v6321_v26  ;;  %v1329_v28 = vsel %vm1314_vm2, %v7496_v7, %v1299_v13  ;;  %v7497_v51 = vrot.slane %v6225_v18, 7  ;;  %v7498_v53 = vrot.slane %v6204_v45, 7  ;;  %v1303_v39 = vrot.slane %v6305_v27, 1 }
 0x122   : > { %v6378_v46 = vmax.f32 %v603_v52, 0.0  ;;  %v6380_v50 = vpack.c.bf16 %v1328_v24, %v1329_v28  ;;  %v6384_v13 = vmax.f32 %v601_v42, 0.0  ;;  %v4944_v7 = vpop.f32.mrb[28].mxu0  ;;  %v7502_v42 = vand.u32 15, %v5933_v17 }
 0x123   : > { %v1136_v44 = vsel %vm1121_vm3, %v7498_v53, %v7497_v51  ;;  %v7499_v37 = vmov %v7498_v53  ;;  %v567_v24 = vmul.f32 %v4944_v7, %v5919_v6  ;;  %v515_v28 = vpop.f32.mrb[29].mxu0  ;;  %v7506_v53 = vrot.slane %v6217_v34, 7 }
 0x124   : > { %v1137_v51 = vsel %vm1121_vm3, %v7500_v0, %v7499_v37  ;;  %v6397_v2 = vpack.c.bf16 %v6378_v46, %v6351_v20  ;;  %vm6401_vm4 = vcmp.le.s32.totalorder %v7502_v42, 14  ;;  %v565_v37 = vmul.f32 %v5919_v6, %v515_v28  ;;  %v4945_v52 = vpop.f32.mrb[30].mxu0 }
 0x125   : > { %v6410_v7 = vpack.c.bf16 %v6384_v13, %v6361_v4  ;;  %v606_v26 = vadd.f32 %v5924_v8, %v567_v24  ;;  %v568_v16 = vmul.f32 %v4945_v52, %v5919_v6  ;;  %v518_v17 = vpop.f32.mrb[31].mxu0  ;;  %v6414_v42 = vpack.c.bf16 %v1136_v44, %v1137_v51  ;;  %vm6532_vm10 = vmpackc.low %vm6401_vm4, %vm7421_vm9 }
 0x126   : > { %7501 = vst [vmem:[#allocation17_spill] sm:$0xff] %v6397_v2  ;;  %v1134_v0 = vsel %vm1121_vm3, %v7507_v57, %v7506_v53  ;;  %v604_v28 = vadd.f32 %v5924_v8, %v565_v37  ;;  %v566_v35 = vmul.f32 %v5919_v6, %v518_v17  ;;  %v7508_v24 = vmov %v7507_v57 }
 0x127   : > { %7505 = vst [vmem:[#allocation18_spill] sm:$0xff] %v6410_v7  ;;  %5178 = vmatprep.mubr.bf16.mxu1 %v6410_v7  ;;  %v7509_v52 = vrot.slane %v6225_v18, 7  ;;  %v7510_v51 = vrot.slane %v6280_v21, 1  ;;  %v6437_v57 = vmax.f32 %v606_v26, 0.0  ;;  %v607_v6 = vadd.f32 %v5924_v8, %v568_v16  ;;  %4987 = vmatmul.mubr.bf16.gmra.mrb[56].mxu0 %v6410_v7 }
 0x128   : > { %v7512_v18 = vmov %v7511_v49  ;;  %v7513_v17 = vrot.slane %v6192_v12, 1  ;;  %v605_v9 = vadd.f32 %v5924_v8, %v566_v35  ;;  %4990 = vmatprep.mubr.bf16.mxu0 %v6397_v2  ;;  %v7514_v16 = vrot.slane %v6269_v61, 1  ;;  %v5728_v8 = vld [vmem:[%s7397_s2 + $0x218] sm:$0xff]  }
 0x129   : > { %v1135_v44 = vsel %vm1121_vm3, %v7509_v52, %v7508_v24  ;;  %v1326_v53 = vsel %vm1314_vm2, %v7511_v49, %v7510_v51  ;;  %v636_v52 = vmax.f32 %v604_v28, 0.0  ;;  %5179 = vmatmul.mubr.bf16.gmra.mrb[20].mxu1 %v6397_v2  ;;  %v7515_v28 = vand.u32 15, %v5927_v11 }
 0x12a   : > { %v6441_v37 = vpack.c.bf16 %v1134_v0, %v1135_v44  ;;  %v1327_v24 = vsel %vm1314_vm2, %v7513_v17, %v7512_v18  ;;  %v1324_v26 = vsel %vm1314_vm2, %v1303_v39, %v7514_v16  ;;  %v1307_v0 = vrot.slane %v6384_v13, 1 }
 0x12b   : > { %v6452_v49 = vpack.c.bf16 %v1326_v53, %v1327_v24  ;;  %v639_v44 = vmax.f32 %v607_v6, 0.0  ;;  %vm6462_vm5 = vcmp.ge.s32.totalorder %v7515_v28, 1  ;;  %v7518_v35 = vmov %v7510_v51 }
 0x12c   : > { %v1325_v51 = vsel %vm1314_vm2, %v7518_v35, %v1303_v39  ;;  %v1117_v53 = vrot.slane %v636_v52, 7  ;;  %v1310_v18 = vrot.slane %v636_v52, 1  ;;  %v637_v17 = vmax.f32 %v605_v9, 0.0  ;;  %vm6626_vm11 = vmpackc.low %vm7421_vm9, %vm6462_vm5  ;;  %v5696_v39 = vld [vmem:[%s7397_s2 + $0x188] sm:$0xff]  }
 0x12d   : > { %v7519_v24 = vand.u32 15, %v6001_v62  ;;  %v6476_v6 = vpack.c.bf16 %v1324_v26, %v1325_v51  ;;  %v1120_v28 = vrot.slane %v639_v44, 7  ;;  %v1313_v12 = vrot.slane %v639_v44, 1 }
 0x12e   : > { %v6479_v2 = vpack.c.bf16 %v639_v44, %v6437_v57  ;;  %v7524_v7 = vand.u32 15, %v6004_v63  ;;  %v7527_v9 = vrot.slane %v6305_v27, 7  ;;  %v7528_v62 = vrot.slane %v6280_v21, 7 }
 0x12f   : > { %vm6472_vm6 = vcmp.ge.s32.totalorder %v7519_v24, 1  ;;  %7522 = vst [vmem:[#allocation19_spill] sm:$0xff] %v6476_v6  ;;  %v1118_v26 = vrot.slane %v637_v17, 7  ;;  %v1311_v51 = vrot.slane %v637_v17, 1  ;;  %v6493_v24 = vpack.c.bf16 %v637_v17, %v636_v52 }
 0x130   : > { %7523 = vst [vmem:[#allocation20_spill] sm:$0xff] %v6479_v2  ;;  %vm6483_vm7 = vcmp.le.s32.totalorder %v7524_v7, 14  ;;  %v1132_v35 = vsel %vm1121_vm3, %v7528_v62, %v7527_v9  ;;  %v7530_v44 = vand.u32 15, %v6007_v1  ;;  %v7533_v63 = vmov %v7528_v62  ;;  %vm6644_vm12 = vmpackc.low %vm7421_vm9, %vm6472_vm6 }
 0x131   : > { %7529 = vst [vmem:[#allocation21_spill] sm:$0xff] %v6493_v24  ;;  %v7534_v7 = vrot.slane %v6217_v34, 7  ;;  %v1153_v9 = vsel %vm1121_vm3, %v1120_v28, %v7535_v31  ;;  %v7536_v1 = vrot.slane %v6299_v41, 7  ;;  %v7537_v17 = vrot.slane %v6269_v61, 7  ;;  %5182 = vmatprep.mubr.bf16.mxu1 %v6493_v24  ;;  %4991 = vmatmul.mubr.bf16.gmra.mrb[60].mxu0 %v6493_v24  ;;  %vm6661_vm13 = vmpackc.low %vm6483_vm7, %vm7421_vm9 }
 0x132   : > { %vm6497_vm8 = vcmp.le.s32.totalorder %v7530_v44, 14  ;;  %v7539_v34 = vrot.slane %v6305_v27, 7  ;;  %v7543_v27 = vrot.slane %v6361_v4, 1  ;;  %5183 = vmatmul.mubr.bf16.gmra.mrb[24].mxu1 %v6479_v2  ;;  %v7571_v16 = vmov 0  ;;  %v5708_v2 = vld [vmem:[%s7397_s2 + $0x1b8] sm:$0xff]  }
 0x133   : > { %v1133_v15 = vsel %vm1121_vm3, %v7534_v7, %v7533_v63  ;;  %v1130_v62 = vsel %vm1121_vm3, %v7537_v17, %v7536_v1  ;;  %v7538_v21 = vmov %v7537_v17  ;;  %v6526_v63 = vpack.c.bf16 %v5973_v48, %v1153_v9  ;;  %5202 = vmatprep.mubr.msk.bf16.mxu1 %vm6532_vm10, %v5994_v59  ;;  %vm6674_vm14 = vmpackc.low %vm6497_vm8, %vm7421_vm9 }
 0x134   : > { %v6511_v52 = vpack.c.bf16 %v1132_v35, %v1133_v15  ;;  %v1131_v44 = vsel %vm1121_vm3, %v7539_v34, %v7538_v21  ;;  %v7544_v35 = vrot.slane %v6299_v41, 1  ;;  %v7546_v9 = vrot.slane %v6269_v61, 1  ;;  %v5713_v15 = vld [vmem:[%s7397_s2 + $0xd0] sm:$0xff]  }
 0x135   : > { %7540 = vst [vmem:[#allocation22_spill] sm:$0xff] %v6526_v63  ;;  %v6536_v31 = vpack.c.bf16 %v1130_v62, %v1131_v44  ;;  %v7547_v17 = vrot.slane %v6351_v20, 1  ;;  %v7548_v21 = vmov %v7543_v27  ;;  %v7549_v44 = vrot.slane %v6384_v13, 7 }
 0x136   : > { %v1322_v48 = vsel %vm1314_vm2, %v7544_v35, %v7543_v27  ;;  %v7545_v7 = vmov %v7544_v35  ;;  %v1321_v34 = vsel %vm1314_vm2, %v7548_v21, %v1307_v0  ;;  %v7550_v61 = vrot.slane %v6361_v4, 7 }
 0x137   : > { %v1323_v45 = vsel %vm1314_vm2, %v7546_v9, %v7545_v7  ;;  %v1320_v62 = vsel %vm1314_vm2, %v1307_v0, %v7547_v17  ;;  %v1312_v35 = vrot.slane %v6437_v57, 1  ;;  %v7554_v17 = vrot.slane %v6378_v46, 7 }
 0x138   : > { %v6551_v1 = vpack.c.bf16 %v1322_v48, %v1323_v45  ;;  %v1128_v27 = vsel %vm1121_vm3, %v7550_v61, %v7549_v44  ;;  %v7551_v48 = vmov 0   ;;  %v6570_v7 = vpack.c.bf16 %v1320_v62, %v1321_v34 }
 0x139   : > { %5010 = vmatprep.mubr.bf16.mxu0 %v7551_v48  ;;  %v7552_v9 = vmov %v7550_v61  ;;  %v7553_v45 = vrot.slane %v6299_v41, 7  ;;  %v7555_v21 = vrot.slane %v6351_v20, 7  ;;  %v7557_v41 = vrot.slane %v6384_v13, 7 }
 0x13a   : > { %v7558_v61 = vrot.slane %v6378_v46, 1  ;;  %v1316_v13 = vsel %vm1314_vm2, %v1311_v51, %v1312_v35  ;;  %v7572_v16 = vsel %vm6661_vm13, 4294967295, %v7571_v16  ;;  %5011 = vmatmul.mubr.msk.bf16.vlgmr.msra.gmra.mrb[32].mxu0 %vm6626_vm11, %v6526_v63  ;;  %5203 = vmatmul.mubr.msk.bf16.vlgmr.msra.gmra.mrb[28].mxu1 %vm6661_vm13, %v6020_v23  ;;  %v7601_v24 = vmov 0 }
 0x13b   : > { %v1129_v0 = vsel %vm1121_vm3, %v7553_v45, %v7552_v9  ;;  %v1126_v44 = vsel %vm1121_vm3, %v7555_v21, %v7554_v17  ;;  %v7556_v4 = vmov %v7555_v21  ;;  %v7560_v17 = vrot.slane %v6351_v20, 1  ;;  %5014 = vmatprep.mubr.msk.bf16.mxu0 %vm6644_vm12, %v5996_v60  ;;  %5043 = vmatpush3.bf16.msra.mxu0 %v6242_v33  ;;  %v5698_v33 = vld [vmem:[%s7397_s2 + $0x190] sm:$0xff]  }
 0x13c   : > { %v6587_v62 = vpack.c.bf16 %v1128_v27, %v1129_v0  ;;  %v1127_v34 = vsel %vm1121_vm3, %v7557_v41, %v7556_v4  ;;  %v1318_v9 = vsel %vm1314_vm2, %v7558_v61, %v1310_v18  ;;  %v7559_v45 = vmov %v7558_v61  ;;  %5235 = vmatpush3.bf16.msra.mxu1 %v6310_v10 }
 0x13d   : > { %v1319_v27 = vsel %vm1314_vm2, %v7560_v17, %v7559_v45  ;;  %v6605_v0 = vpack.c.bf16 %v1126_v44, %v1127_v34  ;;  %v1317_v4 = vsel %vm1314_vm2, %v1310_v18, %v1311_v51  ;;  %v1124_v61 = vsel %vm1121_vm3, %v1117_v53, %v1118_v26  ;;  %5206 = vmatprep.mubr.msk.bf16.mxu1 %vm6674_vm14, %v6045_v43 }
 0x13e   : > { %v6607_v21 = vpack.c.bf16 %v1318_v9, %v1319_v27  ;;  %v6613_v41 = vpack.c.bf16 %v1316_v13, %v1317_v4  ;;  %v7561_v20 = vrot.slane %v6378_v46, 7  ;;  %v1315_v44 = vsel %vm1314_vm2, %v1312_v35, %v1313_v12  ;;  %v5697_v4 = vld [vmem:[%s7397_s2 + $0x90] sm:$0xff]   ;;  %5236 = vmatprep.subr.bf16.mxu1 %v5696_v39 }
 0x13f   : > { %v7562_v34 = vmov 0  ;;  %v650_v18 = vadd.s32 72, %v5927_v11  ;;  %v7565_v9 = vrot.slane %v5938_v22, 1  ;;  %v705_v17 = vand.u32 15, %v6136_v3  ;;  %v5695_v22 = vld [vmem:[%s7397_s2 + $0x88] sm:$0xff]  }
 0x140   : > { %v1125_v45 = vsel %vm1121_vm3, %v7561_v20, %v1117_v53  ;;  %v7563_v34 = vsel %vm6626_vm11, 4294967295, %v7562_v34  ;;  %v7566_v53 = vrot.slane %v6437_v57, 7  ;;  %v719_v3 = vand.u32 15, %v6139_v58  ;;  %5044 = vmatprep.subr.bf16.mxu0 %v5695_v22  ;;  %5237 = vmatpush3.bf16.msra.mxu1 %v5696_v39  ;;  %v7663_v20 = vld [vmem:[#allocation10_spill] sm:$0xff] }
 0x141   : > { %7564 = vst [vmem:[#allocation23_spill] sm:$0xff] %v7563_v34  ;;  %v6631_v51 = vpack.c.bf16 %v1124_v61, %v1125_v45  ;;  %v1346_v46 = vsel %vm1314_vm2, %v1313_v12, %v7565_v9  ;;  %v7574_v57 = vmov 0  ;;  %v740_v58 = vand.u32 15, %v650_v18  ;;  %5045 = vmatpush3.bf16.msra.mxu0 %v5695_v22  ;;  %v5699_v18 = vld [vmem:[%s7397_s2 + $0x98] sm:$0xff]   ;;  %5238 = vmatprep.subr.bf16.mxu1 %v5698_v33  ;;  %v5730_v45 = vld [vmem:[%s7397_s2 + $0x228] sm:$0xff]  }
 0x142   : > { %v1122_v35 = vsel %vm1121_vm3, %v7566_v53, %v1120_v28  ;;  %v6652_v27 = vpack.c.bf16 %v1346_v46, %v1315_v44  ;;  %v7570_v12 = vmov %v7566_v53  ;;  %v7575_v57 = vsel %vm6674_vm14, 4294967295, %v7574_v57  ;;  %5046 = vmatprep.subr.bf16.mxu0 %v5697_v4 }
 0x143   : > { %v1123_v28 = vsel %vm1121_vm3, %v1118_v26, %v7570_v12  ;;  %v726_v26 = vand.u32 15, %v6150_v56  ;;  %vm1061_vm15 = vcmp.ge.s32.totalorder %v705_v17, 1  ;;  %vm1063_vm0 = vcmp.ge.s32.totalorder %v719_v3, 1  ;;  %v5700_v17 = vld [vmem:[%s7397_s2 + $0x198] sm:$0xff]  }
 0x144   : > { %7569 = vst [vmem:[#allocation24_spill] sm:$0xff] %v6652_v27  ;;  %v6666_v13 = vpack.c.bf16 %v1122_v35, %v1123_v28  ;;  %v651_v56 = vadd.s32 80, %v5927_v11  ;;  %v652_v61 = vadd.s32 88, %v5927_v11  ;;  %vm6703_vm2 = vmpackc.low %vm7421_vm9, %vm1061_vm15  ;;  %vm1259_vm3 = vcmp.le.s32.totalorder %v740_v58, 14  ;;  %v5701_v28 = vld [vmem:[%s7397_s2 + $0xa0] sm:$0xff]   ;;  %5239 = vmatpush3.bf16.msra.mxu1 %v5698_v33  ;;  %v5703_v33 = vld [vmem:[%s7397_s2 + $0xa8] sm:$0xff]  }
 0x145   : > { %vm1257_vm1 = vcmp.le.s32.totalorder %v726_v26, 14  ;;  %v654_v10 = vadd.s32 104, %v5927_v11  ;;  %vm6709_vm4 = vmpackc.low %vm7421_vm9, %vm1063_vm0  ;;  %v733_v44 = vand.u32 15, %v649_v19  ;;  %v7580_v9 = vmov 0  ;;  %5015 = vmatmul.mubr.msk.bf16.gmra.mrb[36].mxu0 %vm6703_vm2, %v6067_v54  ;;  %5240 = vmatprep.subr.bf16.mxu1 %v5700_v17  ;;  %v5702_v26 = vld [vmem:[%s7397_s2 + $0x1a0] sm:$0xff]  }
 0x146   : > { %7573 = vst [vmem:[#allocation25_spill] sm:$0xff] %v6666_v13  ;;  %vm6717_vm5 = vmpackc.low %vm1257_vm1, %vm7421_vm9  ;;  %v747_v46 = vand.u32 15, %v651_v56  ;;  %v7582_v53 = vmov 0  ;;  %v754_v35 = vand.u32 15, %v652_v61  ;;  %5018 = vmatprep.mubr.msk.bf16.mxu0 %vm6709_vm4, %v6098_v30  ;;  %5047 = vmatpush3.bf16.msra.mxu0 %v5697_v4  ;;  %v653_v12 = vadd.s32 96, %v5927_v11 }
 0x147   : > { %v7581_v9 = vsel %vm6717_vm5, 4294967295, %v7580_v9  ;;  %vm6725_vm6 = vmpackc.low %vm1259_vm3, %vm7421_vm9  ;;  %v768_v22 = vand.u32 15, %v654_v10  ;;  %5207 = vmatmul.mubr.msk.bf16.gmra.mrb[0].mxu1 %vm6717_vm5, %v6129_v32  ;;  %vm1065_vm7 = vcmp.ge.s32.totalorder %v733_v44, 1  ;;  %5048 = vmatprep.subr.bf16.mxu0 %v5699_v18  ;;  %v655_v3 = vadd.s32 112, %v5927_v11 }
 0x148   : > { %v7583_v53 = vsel %vm6725_vm6, 4294967295, %v7582_v53  ;;  %5210 = vmatprep.mubr.msk.bf16.mxu1 %vm6725_vm6, %v6141_v5  ;;  %vm1067_vm8 = vcmp.ge.s32.totalorder %v747_v46, 1  ;;  %vm1261_vm15 = vcmp.le.s32.totalorder %v754_v35, 14  ;;  %v656_v39 = vadd.s32 120, %v5927_v11  ;;  %vm6751_vm0 = vmpackc.low %vm7421_vm9, %vm1065_vm7  ;;  %5241 = vmatpush3.bf16.msra.mxu1 %v5700_v17  ;;  %v5704_v46 = vld [vmem:[%s7397_s2 + $0x1a8] sm:$0xff]  }
 0x149   : > { %v7584_v58 = vmov 0  ;;  %vm1263_vm1 = vcmp.le.s32.totalorder %v768_v22, 14  ;;  %v658_v19 = vadd.s32 136, %v5927_v11  ;;  %vm6757_vm3 = vmpackc.low %vm7421_vm9, %vm1067_vm8  ;;  %v7586_v4 = vmov 0  ;;  %5242 = vmatprep.subr.bf16.mxu1 %v5702_v26  ;;  %v5705_v22 = vld [vmem:[%s7397_s2 + $0xb0] sm:$0xff]  }
 0x14a   : > { %v7585_v58 = vsel %vm6751_vm0, 4294967295, %v7584_v58  ;;  %5049 = vmatpush3.bf16.msra.mxu0 %v5699_v18  ;;  %v7587_v4 = vsel %vm6757_vm3, 4294967295, %v7586_v4  ;;  %v761_v56 = vand.u32 15, %v653_v12  ;;  %vm6765_vm7 = vmpackc.low %vm1261_vm15, %vm7421_vm9  ;;  %v7588_v61 = vmov 0 }
 0x14b   : > { %5050 = vmatprep.subr.bf16.mxu0 %v5701_v28  ;;  %v7589_v61 = vsel %vm6765_vm7, 4294967295, %v7588_v61  ;;  %v775_v10 = vand.u32 15, %v655_v3  ;;  %vm6773_vm8 = vmpackc.low %vm1263_vm1, %vm7421_vm9  ;;  %v7590_v44 = vmov 0  ;;  %v782_v18 = vand.u32 15, %v656_v39  ;;  %v5706_v3 = vld [vmem:[%s7397_s2 + $0x1b0] sm:$0xff]  }
 0x14c   : > { %v7591_v44 = vsel %vm6773_vm8, 4294967295, %v7590_v44  ;;  %v796_v35 = vand.u32 15, %v658_v19  ;;  %vm1069_vm15 = vcmp.ge.s32.totalorder %v761_v56, 1  ;;  %v657_v17 = vadd.s32 128, %v5927_v11  ;;  %5243 = vmatpush3.bf16.msra.mxu1 %v5702_v26 }
 0x14d   : > { %5019 = vmatmul.mubr.msk.bf16.gmra.mrb[40].mxu0 %vm6751_vm0, %v6190_v40  ;;  %vm1071_vm1 = vcmp.ge.s32.totalorder %v775_v10, 1  ;;  %v659_v12 = vadd.s32 144, %v5927_v11  ;;  %vm1265_vm9 = vcmp.le.s32.totalorder %v782_v18, 14  ;;  %5244 = vmatprep.subr.bf16.mxu1 %v5704_v46  ;;  %vm7592_vm11 = vmmov 1   ;;  %v5707_v10 = vld [vmem:[%s7397_s2 + $0xb8] sm:$0xff]  }
 0x14e   : > { %5022 = vmatprep.mubr.msk.bf16.mxu0 %vm6757_vm3, %v6209_v29  ;;  %5051 = vmatpush3.bf16.msra.mxu0 %v5701_v28  ;;  %v660_v28 = vadd.s32 152, %v5927_v11  ;;  %v7593_v39 = vmov 0  ;;  %vm1267_vm6 = vcmp.le.s32.totalorder %v796_v35, 14  ;;  %v662_v19 = vadd.s32 168, %v5927_v11 }
 0x14f   : > { %5211 = vmatmul.mubr.msk.bf16.gmra.mrb[4].mxu1 %vm6765_vm7, %v6230_v25  ;;  %5052 = vmatprep.subr.bf16.mxu0 %v5703_v33  ;;  %vm6799_vm7 = vmpackc.low %vm7592_vm11, %vm1069_vm15  ;;  %v7595_v26 = vmov 0  ;;  %v789_v56 = vand.u32 15, %v657_v17  ;;  %v7597_v18 = vmov 0  ;;  %v803_v35 = vand.u32 15, %v659_v12 }
 0x150   : > { %5214 = vmatprep.mubr.msk.bf16.mxu1 %vm6773_vm8, %v6274_v38  ;;  %v7594_v39 = vsel %vm6799_vm7, 4294967295, %v7593_v39  ;;  %vm6805_vm8 = vmpackc.low %vm7592_vm11, %vm1071_vm1  ;;  %5245 = vmatpush3.bf16.msra.mxu1 %v5704_v46  ;;  %v810_v17 = vand.u32 15, %v660_v28  ;;  %v824_v46 = vand.u32 15, %v662_v19  ;;  %v661_v12 = vadd.s32 160, %v5927_v11  ;;  %v6838_v28 = vld [vmem:[%s7397_s2 + $0xc0] sm:$0xff]  }
 0x151   : > { %v7596_v26 = vsel %vm6805_vm8, 4294967295, %v7595_v26  ;;  %vm6813_vm15 = vmpackc.low %vm1265_vm9, %vm7592_vm11  ;;  %5246 = vmatprep.subr.bf16.mxu1 %v5706_v3  ;;  %vm1073_vm9 = vcmp.ge.s32.totalorder %v789_v56, 1  ;;  %v664_v19 = vadd.s32 184, %v5927_v11  ;;  %v6848_v56 = vld [vmem:[%s7397_s2 + $0x1c0] sm:$0xff]   ;;  %v7612_v63 = vmov 0 }
 0x152   : > { %5053 = vmatpush3.bf16.msra.mxu0 %v5703_v33  ;;  %v7598_v18 = vsel %vm6813_vm15, 4294967295, %v7597_v18  ;;  %vm6821_vm1 = vmpackc.low %vm1267_vm6, %vm7592_vm11  ;;  %v7599_v33 = vmov 0  ;;  %vm1075_vm6 = vcmp.ge.s32.totalorder %v803_v35, 1  ;;  %v666_v35 = vadd.s32 200, %v5927_v11 }
 0x153   : > { %5054 = vmatprep.subr.bf16.mxu0 %v5705_v22  ;;  %v7600_v33 = vsel %vm6821_vm1, 4294967295, %v7599_v33 }
 0x154   : > { %5247 = vmatpush3.bf16.msra.mxu1 %v5706_v3  ;;  %v7603_v3 = vmov 0 }
 0x155   : > { %5023 = vmatmul.mubr.msk.bf16.gmra.mrb[44].mxu0 %vm6799_vm7, %v6301_v47  ;;  %5248 = vmatprep.subr.bf16.mxu1 %v5708_v2  ;;  %vm1271_vm7 = vcmp.le.s32.totalorder %v824_v46, 14  ;;  %v838_v46 = vand.u32 15, %v664_v19  ;;  %v668_v19 = vadd.s32 216, %v5927_v11 }
 0x156   : > { %5026 = vmatprep.mubr.msk.bf16.mxu0 %vm6805_vm8, %v6332_v14  ;;  %5055 = vmatpush3.bf16.msra.mxu0 %v5705_v22  ;;  %v663_v22 = vadd.s32 176, %v5927_v11  ;;  %vm1269_vm8 = vcmp.le.s32.totalorder %v810_v17, 14  ;;  %v817_v17 = vand.u32 15, %v661_v12  ;;  %v852_v12 = vand.u32 15, %v666_v35 }
 0x157   : > { %5215 = vmatmul.mubr.msk.bf16.gmra.mrb[8].mxu1 %vm6813_vm15, %v6355_v55  ;;  %5056 = vmatprep.subr.bf16.mxu0 %v5707_v10  ;;  %vm6851_vm15 = vmpackc.low %vm7592_vm11, %vm1073_vm9  ;;  %v7610_v35 = vmov 0 }
 0x158   : > { %5218 = vmatprep.mubr.msk.bf16.mxu1 %vm6821_vm1, %v6380_v50  ;;  %v7602_v24 = vsel %vm6851_vm15, 4294967295, %v7601_v24  ;;  %vm6857_vm1 = vmpackc.low %vm7592_vm11, %vm1075_vm6  ;;  %v831_v34 = vand.u32 15, %v663_v22  ;;  %5249 = vmatpush3.bf16.msra.mxu1 %v5708_v2  ;;  %v665_v2 = vadd.s32 192, %v5927_v11  ;;  %v667_v22 = vadd.s32 208, %v5927_v11 }
 0x159   : > { %v7604_v3 = vsel %vm6857_vm1, 4294967295, %v7603_v3  ;;  %vm6863_vm3 = vmpackc.low %vm1269_vm8, %vm7592_vm11  ;;  %5282 = vmatprep.subr.bf16.mxu1 %v6848_v56  ;;  %vm1077_vm8 = vcmp.ge.s32.totalorder %v817_v17, 1  ;;  %vm1273_vm6 = vcmp.le.s32.totalorder %v838_v46, 14  ;;  %v670_v17 = vadd.s32 232, %v5927_v11 }
 0x15a   : > { %5057 = vmatpush3.bf16.msra.mxu0 %v5707_v10  ;;  %v7606_v36 = vsel %vm6863_vm3, 4294967295, %v7605_v36  ;;  %vm6871_vm9 = vmpackc.low %vm1271_vm7, %vm7592_vm11  ;;  %v7607_v10 = vmov 0  ;;  %vm1079_vm7 = vcmp.ge.s32.totalorder %v831_v34, 1  ;;  %v845_v13 = vand.u32 15, %v665_v2 }
 0x15b   : > { %5090 = vmatprep.subr.bf16.mxu0 %v6838_v28  ;;  %v7608_v10 = vsel %vm6871_vm9, 4294967295, %v7607_v10  ;;  %v7614_v34 = vmov 0  ;;  %v859_v46 = vand.u32 15, %v667_v22  ;;  %v880_v2 = vand.u32 15, %v670_v17 }
 0x15c   : > { %7609 = vst [vmem:[#allocation26_spill] sm:$0xff] %v7608_v10  ;;  %v866_v10 = vand.u32 15, %v668_v19  ;;  %v669_v22 = vadd.s32 224, %v5927_v11  ;;  %v672_v19 = vadd.s32 248, %v5927_v11 }
 0x15d   : > { %5027 = vmatmul.mubr.msk.bf16.gmra.mrb[48].mxu0 %vm6851_vm15, %v6414_v42  ;;  %vm1275_vm15 = vcmp.le.s32.totalorder %v852_v12, 14  ;;  %v7616_v12 = vmov 0 }
 0x15e   : > { %5030 = vmatprep.mubr.msk.bf16.mxu0 %vm6857_vm1, %v6441_v37  ;;  %vm6889_vm1 = vmpackc.low %vm7592_vm11, %vm1077_vm8 }
 0x15f   : > { %5219 = vmatmul.mubr.msk.bf16.gmra.mrb[12].mxu1 %vm6863_vm3, %v6452_v49  ;;  %v7611_v35 = vsel %vm6889_vm1, 4294967295, %v7610_v35  ;;  %vm6895_vm3 = vmpackc.low %vm7592_vm11, %vm1079_vm7  ;;  %vm1081_vm7 = vcmp.ge.s32.totalorder %v845_v13, 1  ;;  %v873_v13 = vand.u32 15, %v669_v22  ;;  %v7631_v22 = vmov 0 }
 0x160   : > { %5222 = vmatprep.mubr.msk.bf16.mxu1 %vm6871_vm9, %v6476_v6  ;;  %v7613_v63 = vsel %vm6895_vm3, 4294967295, %v7612_v63  ;;  %vm6900_vm9 = vmpackc.low %vm1273_vm6, %vm7592_vm11  ;;  %vm1277_vm6 = vcmp.le.s32.totalorder %v866_v10, 14  ;;  %v7626_v10 = vmov 0  ;;  %v7680_v6 = vld [vmem:[#allocation6_spill] sm:$0xff] }
 0x161   : > { %v7615_v34 = vsel %vm6900_vm9, 4294967295, %v7614_v34  ;;  %vm6908_vm8 = vmpackc.low %vm1275_vm15, %vm7592_vm11  ;;  %vm1083_vm15 = vcmp.ge.s32.totalorder %v859_v46, 1  ;;  %v894_v46 = vand.u32 15, %v672_v19  ;;  %v5711_v19 = vld [vmem:[%s7397_s2 + $0xc8] sm:$0xff]  }
 0x162   : > { %v7617_v12 = vsel %vm6908_vm8, 4294967295, %v7616_v12  ;;  %vm6929_vm0 = vmpackc.low %vm7592_vm11, %vm1083_vm15  ;;  %vm1085_vm15 = vcmp.ge.s32.totalorder %v873_v13, 1  ;;  %v5712_v13 = vld [vmem:[%s7397_s2 + $0x1c8] sm:$0xff]  }
 0x163   : > { %7618 = vst [vmem:[#allocation27_spill] sm:$0xff] %v7617_v12  ;;  %v7623_v12 = vmov 0 }
 0x165   : > { %5031 = vmatmul.mubr.msk.bf16.gmra.mrb[52].mxu0 %vm6889_vm1, %v6511_v52  ;;  %vm6924_vm1 = vmpackc.low %vm7592_vm11, %vm1081_vm7 }
 0x166   : > { %5034 = vmatprep.mubr.msk.bf16.mxu0 %vm6895_vm3, %v6536_v31  ;;  %vm1279_vm3 = vcmp.le.s32.totalorder %v880_v2, 14 }
 0x167   : > { %5223 = vmatmul.mubr.msk.bf16.gmra.mrb[16].mxu1 %vm6900_vm9, %v6551_v1  ;;  %vm6934_vm9 = vmpackc.low %vm1277_vm6, %vm7592_vm11  ;;  %vm1281_vm6 = vcmp.le.s32.totalorder %v894_v46, 14  ;;  %v5717_v46 = vld [vmem:[%s7397_s2 + $0xe0] sm:$0xff]  }
 0x168   : > { %5226 = vmatprep.mubr.msk.bf16.mxu1 %vm6908_vm8, %v6570_v7  ;;  %v7624_v12 = vsel %vm6934_vm9, 4294967295, %v7623_v12  ;;  %vm6942_vm7 = vmpackc.low %vm1279_vm3, %vm7592_vm11 }
 0x169   : > { %7625 = vst [vmem:[#allocation28_spill] sm:$0xff] %v7624_v12  ;;  %v7627_v10 = vsel %vm6942_vm7, 4294967295, %v7626_v10  ;;  %vm6956_vm3 = vmpackc.low %vm7592_vm11, %vm1085_vm15  ;;  %vm7635_vm15 = vnez %v7587_v4  ;;  %v5726_v12 = vld [vmem:[%s7397_s2 + $0x208] sm:$0xff]   ;;  %v5732_v4 = vld [vmem:[%s7397_s2 + $0x238] sm:$0xff]  }
 0x16a   : > { %7628 = vst [vmem:[#allocation29_spill] sm:$0xff] %v7627_v10  ;;  %vm6961_vm8 = vmpackc.low %vm1281_vm6, %vm7592_vm11  ;;  %vm7636_vm6 = vnez %v7583_v53  ;;  %v7661_v10 = vld [vmem:[#allocation8_spill] sm:$0xff] }
 0x16b   : > { %v7632_v22 = vsel %vm6961_vm8, 4294967295, %v7631_v22 }
 0x16c   : > { %7633 = vst [vmem:[#allocation30_spill] sm:$0xff] %v7632_v22  ;;  %v7658_v22 = vld [vmem:[#allocation23_spill] sm:$0xff] }
 0x16d   : > { %5035 = vmatmul.mubr.msk.bf16.gmra.mrb[56].mxu0 %vm6924_vm1, %v6587_v62 }
 0x16e   : > { %5038 = vmatprep.mubr.msk.bf16.mxu0 %vm6929_vm0, %v6605_v0 }
 0x16f   : > { %5227 = vmatmul.mubr.msk.bf16.gmra.mrb[20].mxu1 %vm6934_vm9, %v6607_v21 }
 0x170   : > { %5230 = vmatprep.mubr.msk.bf16.mxu1 %vm6942_vm7, %v6613_v41 }
 0x175   : > { %5039 = vmatmul.mubr.msk.bf16.gmra.mrb[60].mxu0 %vm6956_vm3, %v6631_v51 }
 0x176   : > { %5058 = vmatprep.mubr.bf16.mxu0 %v7551_v48 }
 0x177   : > { %5231 = vmatmul.mubr.msk.bf16.gmra.mrb[24].mxu1 %vm6961_vm8, %v6652_v27  ;;  %vm7637_vm8 = vnez %v7589_v61  ;;  %v7660_v27 = vld [vmem:[#allocation5_spill] sm:$0xff] }
 0x178   : > { %5250 = vmatprep.mubr.msk.bf16.mxu1 %vm6644_vm12, %v5996_v60 }
 0x17d   : > { %5059 = vmatmul.mubr.msk.bf16.vlgmr.msra.gmra.mrb[32].mxu0 %vm6532_vm10, %v5994_v59  ;;  %v5714_v59 = vld [vmem:[%s7397_s2 + $0x1d0] sm:$0xff]   ;;  %vm7634_vm10 = vnez %v7585_v58  ;;  %v7666_v58 = vld [vmem:[#allocation12_spill] sm:$0xff] }
 0x17e   : > { %5062 = vmatprep.mubr.msk.bf16.mxu0 %vm6661_vm13, %v6020_v23  ;;  %5091 = vmatpush3.bf16.msra.mxu0 %v6838_v28  ;;  %v5715_v28 = vld [vmem:[%s7397_s2 + $0xd8] sm:$0xff]   ;;  %vm7642_vm13 = vnez %v7602_v24 }
 0x17f   : > { %5251 = vmatmul.mubr.msk.bf16.vlgmr.msra.gmra.mrb[28].mxu1 %vm6703_vm2, %v6067_v54  ;;  %5092 = vmatprep.subr.bf16.mxu0 %v5711_v19 }
 0x180   : > { %5283 = vmatpush3.bf16.msra.mxu1 %v6848_v56  ;;  %5254 = vmatprep.mubr.msk.bf16.mxu1 %vm6709_vm4, %v6098_v30  ;;  %v5716_v56 = vld [vmem:[%s7397_s2 + $0x1d8] sm:$0xff]  }
 0x181   : > { %5284 = vmatprep.subr.bf16.mxu1 %v5712_v13 }
 0x182   : > { %5093 = vmatpush3.bf16.msra.mxu0 %v5711_v19  ;;  %v5718_v19 = vld [vmem:[%s7397_s2 + $0x1e0] sm:$0xff]  }
 0x183   : > { %5094 = vmatprep.subr.bf16.mxu0 %v5713_v15 }
 0x184   : > { %5285 = vmatpush3.bf16.msra.mxu1 %v5712_v13  ;;  %v5719_v13 = vld [vmem:[%s7397_s2 + $0xe8] sm:$0xff]  }
 0x185   : > { %5063 = vmatmul.mubr.msk.bf16.gmra.mrb[36].mxu0 %vm6674_vm14, %v6045_v43  ;;  %5286 = vmatprep.subr.bf16.mxu1 %v5714_v59  ;;  %vm7641_vm14 = vnez %v7598_v18 }
 0x186   : > { %5066 = vmatprep.mubr.msk.bf16.mxu0 %vm6717_vm5, %v6129_v32  ;;  %5095 = vmatpush3.bf16.msra.mxu0 %v5713_v15  ;;  %v5720_v15 = vld [vmem:[%s7397_s2 + $0x1e8] sm:$0xff]   ;;  %vm7638_vm5 = vnez %v7594_v39 }
 0x187   : > { %5255 = vmatmul.mubr.msk.bf16.gmra.mrb[0].mxu1 %vm7634_vm10, %v6190_v40  ;;  %5096 = vmatprep.subr.bf16.mxu0 %v5715_v28 }
 0x188   : > { %5258 = vmatprep.mubr.msk.bf16.mxu1 %vm7635_vm15, %v6209_v29  ;;  %5287 = vmatpush3.bf16.msra.mxu1 %v5714_v59  ;;  %v5721_v59 = vld [vmem:[%s7397_s2 + $0xf0] sm:$0xff]  }
 0x189   : > { %5288 = vmatprep.subr.bf16.mxu1 %v5716_v56 }
 0x18a   : > { %5097 = vmatpush3.bf16.msra.mxu0 %v5715_v28  ;;  %v5722_v28 = vld [vmem:[%s7397_s2 + $0x1f0] sm:$0xff]  }
 0x18b   : > { %5098 = vmatprep.subr.bf16.mxu0 %v5717_v46 }
 0x18c   : > { %5289 = vmatpush3.bf16.msra.mxu1 %v5716_v56  ;;  %v5723_v56 = vld [vmem:[%s7397_s2 + $0xf8] sm:$0xff]  }
 0x18d   : > { %5067 = vmatmul.mubr.msk.bf16.gmra.mrb[40].mxu0 %vm7636_vm6, %v6141_v5  ;;  %5290 = vmatprep.subr.bf16.mxu1 %v5718_v19  ;;  %vm7639_vm6 = vnez %v7596_v26 }
 0x18e   : > { %5070 = vmatprep.mubr.msk.bf16.mxu0 %vm7637_vm8, %v6230_v25  ;;  %5099 = vmatpush3.bf16.msra.mxu0 %v5717_v46  ;;  %vm7640_vm8 = vnez %v7591_v44  ;;  %v5724_v46 = vld [vmem:[%s7397_s2 + $0x1f8] sm:$0xff]  }
 0x18f   : > { %5259 = vmatmul.mubr.msk.bf16.gmra.mrb[4].mxu1 %vm7638_vm5, %v6301_v47  ;;  %5100 = vmatprep.subr.bf16.mxu0 %v5719_v13 }
 0x190   : > { %5262 = vmatprep.mubr.msk.bf16.mxu1 %vm7639_vm6, %v6332_v14  ;;  %5291 = vmatpush3.bf16.msra.mxu1 %v5718_v19  ;;  %vm7643_vm6 = vnez %v7604_v3  ;;  %v5725_v19 = vld [vmem:[%s7397_s2 + $0x200] sm:$0xff]  }
 0x191   : > { %5292 = vmatprep.subr.bf16.mxu1 %v5720_v15 }
 0x192   : > { %5101 = vmatpush3.bf16.msra.mxu0 %v5719_v13  ;;  %v5733_v13 = vld [vmem:[%s7397_s2 + $0x100] sm:$0xff]  }
 0x193   : > { %5102 = vmatprep.subr.bf16.mxu0 %v5721_v59 }
 0x194   : > { %5293 = vmatpush3.bf16.msra.mxu1 %v5720_v15  ;;  %v671_v15 = vadd.s32 240, %v5927_v11  ;;  %v7652_v11 = vld [vmem:[#allocation27_spill] sm:$0xff] }
 0x195   : > { %5071 = vmatmul.mubr.msk.bf16.gmra.mrb[44].mxu0 %vm7640_vm8, %v6274_v38  ;;  %5294 = vmatprep.subr.bf16.mxu1 %v5722_v28  ;;  %vm7645_vm8 = vnez %v7606_v36 }
 0x196   : > { %5074 = vmatprep.mubr.msk.bf16.mxu0 %vm7641_vm14, %v6355_v55  ;;  %5103 = vmatpush3.bf16.msra.mxu0 %v5721_v59  ;;  %vm7644_vm14 = vnez %v7600_v33  ;;  %v7648_v59 = vld [vmem:[#allocation19_spill] sm:$0xff] }
 0x197   : > { %5263 = vmatmul.mubr.msk.bf16.gmra.mrb[8].mxu1 %vm7642_vm13, %v6414_v42  ;;  %5104 = vmatprep.subr.bf16.mxu0 %v5723_v56  ;;  %vm7647_vm13 = vnez %v7613_v63 }
 0x198   : > { %5266 = vmatprep.mubr.msk.bf16.mxu1 %vm7643_vm6, %v6441_v37  ;;  %5295 = vmatpush3.bf16.msra.mxu1 %v5722_v28  ;;  %vm7646_vm6 = vnez %v7611_v35  ;;  %v7649_v28 = vld [vmem:[#allocation26_spill] sm:$0xff] }
 0x199   : > { %5296 = vmatprep.subr.bf16.mxu1 %v5724_v46  ;;  %vm7650_vm5 = vnez %v7649_v28 }
 0x19a   : > { %5105 = vmatpush3.bf16.msra.mxu0 %v5723_v56  ;;  %v887_v56 = vand.u32 15, %v671_v15  ;;  %v7656_v15 = vld [vmem:[#allocation25_spill] sm:$0xff] }
 0x19b   : > { %5138 = vmatprep.subr.bf16.mxu0 %v5733_v13 }
 0x19c   : > { %5297 = vmatpush3.bf16.msra.mxu1 %v5724_v46 }
 0x19d   : > { %5075 = vmatmul.mubr.msk.bf16.gmra.mrb[48].mxu0 %vm7644_vm14, %v6380_v50  ;;  %5330 = vmatprep.subr.bf16.mxu1 %v5725_v19  ;;  %vm7651_vm14 = vnez %v7615_v34 }
 0x19e   : > { %5078 = vmatprep.mubr.msk.bf16.mxu0 %vm7645_vm8, %v6452_v49  ;;  %vm1087_vm8 = vcmp.ge.s32.totalorder %v887_v56, 1  ;;  %v7657_v56 = vld [vmem:[#allocation22_spill] sm:$0xff] }
 0x19f   : > { %5267 = vmatmul.mubr.msk.bf16.gmra.mrb[12].mxu1 %vm7646_vm6, %v6511_v52 }
 0x1a0   : > { %5270 = vmatprep.mubr.msk.bf16.mxu1 %vm7647_vm13, %v6536_v31  ;;  %vm7653_vm13 = vnez %v7652_v11 }
 0x1a5   : > { %5079 = vmatmul.mubr.msk.bf16.gmra.mrb[52].mxu0 %vm7650_vm5, %v7648_v59  ;;  %vm7102_vm5 = vmpackc.low %vm7592_vm11, %vm1087_vm8  ;;  %vm7659_vm11 = vnez %v7658_v22  ;;  %v5734_v22 = vld [vmem:[%s7397_s2 + $0x108] sm:$0xff]   ;;  %vm7672_vm8 = vnez %v7604_v3 }
 0x1a6   : > { %5082 = vmatprep.mubr.msk.bf16.mxu0 %vm7651_vm14, %v6551_v1 }
 0x1a7   : > { %5271 = vmatmul.mubr.msk.bf16.gmra.mrb[16].mxu1 %vm6924_vm1, %v6587_v62 }
 0x1a8   : > { %5274 = vmatprep.mubr.msk.bf16.mxu1 %vm6929_vm0, %v6605_v0 }
 0x1ad   : > { %5083 = vmatmul.mubr.msk.bf16.gmra.mrb[56].mxu0 %vm7653_vm13, %v6570_v7 }
 0x1ae   : > { %5086 = vmatprep.mubr.msk.bf16.mxu0 %vm6934_vm9, %v6607_v21 }
 0x1af   : > { %5275 = vmatmul.mubr.msk.bf16.gmra.mrb[20].mxu1 %vm6956_vm3, %v6631_v51 }
 0x1b0   : > { %5278 = vmatprep.mubr.msk.bf16.mxu1 %vm7102_vm5, %v7656_v15 }
 0x1b5   : > { %5087 = vmatmul.mubr.msk.bf16.gmra.mrb[60].mxu0 %vm6942_vm7, %v6613_v41 }
 0x1b6   : > { %5106 = vmatprep.mubr.msk.bf16.mxu0 %vm7659_vm11, %v7657_v56  ;;  %v7662_v56 = vld [vmem:[#allocation7_spill] sm:$0xff]  ;;  %vm7687_vm11 = vnez %v7598_v18 }
 0x1b7   : > { %5279 = vmatmul.mubr.bf16.gmra.mrb[24].mxu1 %v7551_v48 }
 0x1b8   : > { %5298 = vmatprep.mubr.bf16.mxu1 %v7660_v27 }
 0x1bd   : > { %5107 = vmatmul.mubr.msk.bf16.vlgmr.msra.gmra.mrb[32].mxu0 %vm6644_vm12, %v5996_v60  ;;  %v5727_v60 = vld [vmem:[%s7397_s2 + $0x210] sm:$0xff]   ;;  %vm7665_vm12 = vnez %v7594_v39  ;;  %v7670_v39 = vld [vmem:[#allocation14_spill] sm:$0xff] }
 0x1be   : > { %5110 = vmatprep.mubr.msk.bf16.mxu0 %vm6703_vm2, %v6067_v54  ;;  %5139 = vmatpush3.bf16.msra.mxu0 %v5733_v13  ;;  %v5735_v54 = vld [vmem:[%s7397_s2 + $0x110] sm:$0xff]   ;;  %vm7668_vm2 = vnez %v7596_v26  ;;  %v7677_v26 = vld [vmem:[#allocation17_spill] sm:$0xff] }
 0x1bf   : > { %5299 = vmatmul.mubr.bf16.vlgmr.msra.gmra.mrb[28].mxu1 %v7661_v10  ;;  %5140 = vmatprep.subr.bf16.mxu0 %v5734_v22  ;;  %v7664_v10 = vld [vmem:[#allocation9_spill] sm:$0xff]  ;;  %v7667_v13 = vld [vmem:[#allocation11_spill] sm:$0xff] }
 0x1c0   : > { %5331 = vmatpush3.bf16.msra.mxu1 %v5725_v19  ;;  %5302 = vmatprep.mubr.bf16.mxu1 %v7662_v56  ;;  %v5738_v19 = vld [vmem:[%s7397_s2 + $0x128] sm:$0xff]   ;;  %v7671_v56 = vld [vmem:[#allocation13_spill] sm:$0xff] }
 0x1c1   : > { %5332 = vmatprep.subr.bf16.mxu1 %v5726_v12 }
 0x1c2   : > { %5141 = vmatpush3.bf16.msra.mxu0 %v5734_v22  ;;  %v5740_v22 = vld [vmem:[%s7397_s2 + $0x138] sm:$0xff]  }
 0x1c3   : > { %5142 = vmatprep.subr.bf16.mxu0 %v5735_v54 }
 0x1c4   : > { %5333 = vmatpush3.bf16.msra.mxu1 %v5726_v12  ;;  %v5736_v12 = vld [vmem:[%s7397_s2 + $0x118] sm:$0xff]  }
 0x1c5   : > { %5111 = vmatmul.mubr.msk.bf16.gmra.mrb[36].mxu0 %vm6709_vm4, %v6098_v30  ;;  %5334 = vmatprep.subr.bf16.mxu1 %v5727_v60  ;;  %v5729_v30 = vld [vmem:[%s7397_s2 + $0x220] sm:$0xff]   ;;  %vm7669_vm4 = vnez %v7602_v24  ;;  %v7676_v24 = vld [vmem:[#allocation18_spill] sm:$0xff] }
 0x1c6   : > { %5114 = vmatprep.mubr.msk.bf16.mxu0 %vm7634_vm10, %v6190_v40  ;;  %5143 = vmatpush3.bf16.msra.mxu0 %v5735_v54  ;;  %v5737_v40 = vld [vmem:[%s7397_s2 + $0x120] sm:$0xff]   ;;  %vm7675_vm10 = vnez %v7613_v63 }
 0x1c7   : > { %5303 = vmatmul.mubr.bf16.gmra.mrb[0].mxu1 %v7663_v20  ;;  %5144 = vmatprep.subr.bf16.mxu0 %v5736_v12 }
 0x1c8   : > { %5306 = vmatprep.mubr.bf16.mxu1 %v7664_v10  ;;  %5335 = vmatpush3.bf16.msra.mxu1 %v5727_v60 }
 0x1c9   : > { %5336 = vmatprep.subr.bf16.mxu1 %v5728_v8 }
 0x1ca   : > { %5145 = vmatpush3.bf16.msra.mxu0 %v5736_v12 }
 0x1cb   : > { %5146 = vmatprep.subr.bf16.mxu0 %v5737_v40 }
 0x1cc   : > { %5337 = vmatpush3.bf16.msra.mxu1 %v5728_v8 }
 0x1cd   : > { %5115 = vmatmul.mubr.msk.bf16.gmra.mrb[40].mxu0 %vm7635_vm15, %v6209_v29  ;;  %5338 = vmatprep.subr.bf16.mxu1 %v5729_v30  ;;  %v5731_v29 = vld [vmem:[%s7397_s2 + $0x230] sm:$0xff]   ;;  %vm7685_vm15 = vnez %v7589_v61 }
 0x1ce   : > { %5118 = vmatprep.mubr.msk.bf16.mxu0 %vm7665_vm12, %v6301_v47  ;;  %5147 = vmatpush3.bf16.msra.mxu0 %v5737_v40  ;;  %v5739_v47 = vld [vmem:[%s7397_s2 + $0x130] sm:$0xff]   ;;  %vm7688_vm12 = vnez %v7600_v33 }
 0x1cf   : > { %5307 = vmatmul.mubr.bf16.gmra.mrb[4].mxu1 %v7666_v58  ;;  %5148 = vmatprep.subr.bf16.mxu0 %v5738_v19 }
 0x1d0   : > { %5310 = vmatprep.mubr.bf16.mxu1 %v7667_v13  ;;  %5339 = vmatpush3.bf16.msra.mxu1 %v5729_v30 }
 0x1d1   : > { %5340 = vmatprep.subr.bf16.mxu1 %v5730_v45 }
 0x1d2   : > { %5149 = vmatpush3.bf16.msra.mxu0 %v5738_v19 }
 0x1d3   : > { %5150 = vmatprep.subr.bf16.mxu0 %v5739_v47 }
 0x1d4   : > { %5341 = vmatpush3.bf16.msra.mxu1 %v5730_v45 }
 0x1d5   : > { %5119 = vmatmul.mubr.msk.bf16.gmra.mrb[44].mxu0 %vm7668_vm2, %v6332_v14  ;;  %5342 = vmatprep.subr.bf16.mxu1 %v5731_v29  ;;  %v7673_v14 = vld [vmem:[#allocation16_spill] sm:$0xff]  ;;  %vm7689_vm2 = vnez %v7606_v36 }
 0x1d6   : > { %5122 = vmatprep.mubr.msk.bf16.mxu0 %vm7669_vm4, %v6414_v42  ;;  %5151 = vmatpush3.bf16.msra.mxu0 %v5739_v47  ;;  %v7674_v42 = vld [vmem:[#allocation15_spill] sm:$0xff]  ;;  %vm7690_vm4 = vnez %v7649_v28  ;;  %v7693_v36 = vld [vmem:[#allocation24_spill] sm:$0xff] }
 0x1d7   : > { %5311 = vmatmul.mubr.bf16.gmra.mrb[8].mxu1 %v7670_v39  ;;  %5152 = vmatprep.subr.bf16.mxu0 %v5740_v22 }
 0x1d8   : > { %5314 = vmatprep.mubr.bf16.mxu1 %v7671_v56  ;;  %5343 = vmatpush3.bf16.msra.mxu1 %v5731_v29 }
 0x1d9   : > { %5344 = vmatprep.subr.bf16.mxu1 %v5732_v4 }
 0x1da   : > { %5153 = vmatpush3.bf16.msra.mxu0 %v5740_v22 }
 0x1dc   : > { %5345 = vmatpush3.bf16.msra.mxu1 %v5732_v4 }
 0x1dd   : > { %5123 = vmatmul.mubr.msk.bf16.gmra.mrb[48].mxu0 %vm7672_vm8, %v6441_v37  ;;  %v7678_v37 = vld [vmem:[#allocation21_spill] sm:$0xff] }
 0x1de   : > { %5126 = vmatprep.mubr.msk.bf16.mxu0 %vm7646_vm6, %v6511_v52  ;;  %v7679_v52 = vld [vmem:[#allocation20_spill] sm:$0xff]  ;;  %vm7686_vm6 = vnez %v7591_v44 }
 0x1df   : > { %5315 = vmatmul.mubr.bf16.gmra.mrb[12].mxu1 %v7673_v14 }
 0x1e0   : > { %5318 = vmatprep.mubr.bf16.mxu1 %v7674_v42 }
 0x1e5   : > { %5127 = vmatmul.mubr.msk.bf16.gmra.mrb[52].mxu0 %vm7675_vm10, %v6536_v31 }
 0x1e6   : > { %5130 = vmatprep.mubr.msk.bf16.mxu0 %vm6924_vm1, %v6587_v62  ;;  %vm7681_vm1 = vnez %v7572_v16 }
 0x1e7   : > { %5319 = vmatmul.mubr.bf16.gmra.mrb[16].mxu1 %v7676_v24 }
 0x1e8   : > { %5322 = vmatprep.mubr.bf16.mxu1 %v7677_v26 }
 0x1ed   : > { %5131 = vmatmul.mubr.msk.bf16.gmra.mrb[56].mxu0 %vm6929_vm0, %v6605_v0  ;;  %vm7682_vm0 = vnez %v7575_v57 }
 0x1ee   : > { %5134 = vmatprep.mubr.msk.bf16.mxu0 %vm6956_vm3, %v6631_v51  ;;  %vm7683_vm3 = vnez %v7581_v9 }
 0x1ef   : > { %5323 = vmatmul.mubr.bf16.gmra.mrb[20].mxu1 %v7678_v37 }
 0x1f0   : > { %5326 = vmatprep.mubr.bf16.mxu1 %v7679_v52 }
 0x1f5   : > { %5135 = vmatmul.mubr.msk.bf16.gmra.mrb[60].mxu0 %vm7102_vm5, %v7656_v15  ;;  %vm7684_vm5 = vnez %v7583_v53 }
 0x1f6   : > { %5154 = vmatprep.mubr.bf16.mxu0 %v7680_v6 }
 0x1f7   : > { %5327 = vmatmul.mubr.bf16.gmra.mrb[24].mxu1 %v7551_v48 }
 0x1f8   : > { %5346 = vmatprep.mubr.msk.bf16.mxu1 %vm7681_vm1, %v6020_v23 }
 0x1fd   : > { %5155 = vmatmul.mubr.bf16.vlgmr.msra.gmra.mrb[32].mxu0 %v7660_v27 }
 0x1ff   : > { %5347 = vmatmul.mubr.msk.bf16.vlgmr.msra.gmra.mrb[28].mxu1 %vm7682_vm0, %v6045_v43 }
 0x200   : > { %5350 = vmatprep.mubr.msk.bf16.mxu1 %vm7683_vm3, %v6129_v32  ;;  %v7694_v32 = vld [vmem:[#allocation30_spill] sm:$0xff] }
 0x201   : > { %vm7695_vm8 = vnez %v7694_v32 }
 0x207   : > { %5351 = vmatmul.mubr.msk.bf16.gmra.mrb[0].mxu1 %vm7684_vm5, %v6141_v5 }
 0x208   : > { %5354 = vmatprep.mubr.msk.bf16.mxu1 %vm7685_vm15, %v6230_v25 }
 0x20f   : > { %5355 = vmatmul.mubr.msk.bf16.gmra.mrb[4].mxu1 %vm7686_vm6, %v6274_v38 }
 0x210   : > { %5358 = vmatprep.mubr.msk.bf16.mxu1 %vm7687_vm11, %v6355_v55 }
 0x217   : > { %5359 = vmatmul.mubr.msk.bf16.gmra.mrb[8].mxu1 %vm7688_vm12, %v6380_v50 }
 0x218   : > { %5362 = vmatprep.mubr.msk.bf16.mxu1 %vm7689_vm2, %v6452_v49 }
 0x21f   : > { %5363 = vmatmul.mubr.msk.bf16.gmra.mrb[12].mxu1 %vm7690_vm4, %v7648_v59 }
 0x220   : > { %5366 = vmatprep.mubr.msk.bf16.mxu1 %vm7651_vm14, %v6551_v1 }
 0x227   : > { %5367 = vmatmul.mubr.msk.bf16.gmra.mrb[16].mxu1 %vm7653_vm13, %v6570_v7 }
 0x228   : > { %5370 = vmatprep.mubr.msk.bf16.mxu1 %vm6934_vm9, %v6607_v21 }
 0x22f   : > { %5371 = vmatmul.mubr.msk.bf16.gmra.mrb[20].mxu1 %vm6942_vm7, %v6613_v41 }
 0x230   : > { %5374 = vmatprep.mubr.msk.bf16.mxu1 %vm7695_vm8, %v7693_v36 }
 0x237   : > { %5375 = vmatmul.mubr.bf16.gmra.mrb[24].mxu1 %v7551_v48 }
 0x298   : > { %v5112_v5 = vpop.f32.mrb[36].mxu0 }
 0x299   : > { %v2433_v25 = vpop.f32.mrb[37].mxu0 }
 0x29a   : > { %v5113_v38 = vpop.f32.mrb[38].mxu0 }
 0x29b   : > { %v7273_v55 = vpop.f32.mrb[39].mxu0 }
 0x2a0   : > { %v7275_v50 = vpop.f32.mrb[40].mxu0 }
 0x2a1   : > { %v7277_v49 = vpop.f32.mrb[41].mxu0 }
 0x2a2   : > { %v7279_v63 = vpop.f32.mrb[42].mxu0 }
 0x2a3   : > { %v7281_v31 = vpop.f32.mrb[43].mxu0 }
 0x2a8   : > { %v7283_v1 = vpop.f32.mrb[44].mxu0 }
 0x2a9   : > { %v7285_v7 = vpop.f32.mrb[45].mxu0 }
 0x2aa   : > { %v7287_v62 = vpop.f32.mrb[46].mxu0 }
 0x2ab   : > { %v7289_v48 = vpop.f32.mrb[47].mxu0 }
 0x2b0   : > { %v7291_v0 = vpop.f32.mrb[48].mxu0 }
 0x2b1   : > { %v7293_v21 = vpop.f32.mrb[49].mxu0 }
 0x2b2   : > { %v7295_v41 = vpop.f32.mrb[50].mxu0 }
 0x2b3   : > { %v7297_v51 = vpop.f32.mrb[51].mxu0 }
 0x2b8   : > { %v7299_v27 = vpop.f32.mrb[52].mxu0 }
 0x2b9   : > { %v7301_v16 = vpop.f32.mrb[53].mxu0 }
 0x2ba   : > { %v7303_v57 = vpop.f32.mrb[54].mxu0 }
 0x2bb   : > { %v7305_v9 = vpop.f32.mrb[55].mxu0 }
 0x2c0   : > { %v7307_v53 = vpop.f32.mrb[56].mxu0 }
 0x2c1   : > { %v7309_v61 = vpop.f32.mrb[57].mxu0 }
 0x2c2   : > { %v7311_v44 = vpop.f32.mrb[58].mxu0 }
 0x2c3   : > { %v7313_v18 = vpop.f32.mrb[59].mxu0 }
 0x2c8   : > { %v7315_v33 = vpop.f32.mrb[60].mxu0 }
 0x2c9   : > { %v7317_v3 = vpop.f32.mrb[61].mxu0 }
 0x2ca   : > { %v7319_v35 = vpop.f32.mrb[62].mxu0 }
 0x2cb   : > { %v7321_v34 = vpop.f32.mrb[63].mxu0 }
 0x2d0   : > { %v5156_v17 = vpop.f32.mrb[32].mxu0 }
 0x2d1   : > { %v2691_v2 = vpop.f32.mrb[33].mxu0 }
 0x2d2   : > { %v5348_v59 = vpop.f32.mrb[28].mxu1  ;;  %v5157_v28 = vpop.f32.mrb[34].mxu0 }
 0x2d3   : > { %v5394_v11 = vadd.f32 %v5348_v59, %v5156_v17  ;;  %v3787_v46 = vpop.f32.mrb[29].mxu1  ;;  %v2694_v15 = vpop.f32.mrb[35].mxu0 }
 0x2d4   : > { %v5395_v60 = vadd.f32 %v3787_v46, %v2691_v2  ;;  %v5349_v54 = vpop.f32.mrb[30].mxu1 }
 0x2d5   : > { %3948 = vst [vmem:[%s7328_s12 + $0x10] sm:$0xff] %v5394_v11  ;;  %v5396_v8 = vadd.f32 %v5349_v54, %v5157_v28  ;;  %v3790_v20 = vpop.f32.mrb[31].mxu1  ;;  %v4018_v45 = vmul.f32 %v5394_v11, %v5394_v11 }
 0x2d6   : > { %3946 = vst [vmem:[%s7328_s12] sm:$0xff] %v5395_v60  ;;  %v5397_v12 = vadd.f32 %v3790_v20, %v2694_v15  ;;  %v4016_v10 = vmul.f32 %v5395_v60, %v5395_v60 }
 0x2d7   : > { %3949 = vst [vmem:[%s7328_s12 + $0x18] sm:$0xff] %v5396_v8  ;;  %v4019_v4 = vmul.f32 %v5396_v8, %v5396_v8 }
 0x2d8   : > { %3947 = vst [vmem:[%s7328_s12 + $0x8] sm:$0xff] %v5397_v12  ;;  %v3978_v30 = vadd.f32 %v5397_v12, %v5395_v60  ;;  %v4017_v40 = vmul.f32 %v5397_v12, %v5397_v12 }
 0x2da   : > { %v3979_v58 = vadd.f32 %v5394_v11, %v3978_v30  ;;  %v4048_v19 = vadd.f32 %v4017_v40, %v4016_v10  ;;  %v5352_v13 = vpop.f32.mrb[0].mxu1 }
 0x2db   : > { %v5398_v29 = vadd.f32 %v5352_v13, %v5112_v5  ;;  %v3803_v47 = vpop.f32.mrb[1].mxu1 }
 0x2dc   : > { %v4049_v39 = vadd.f32 %v4048_v19, %v4018_v45  ;;  %v5399_v22 = vadd.f32 %v3803_v47, %v2433_v25  ;;  %v3980_v56 = vadd.f32 %v5396_v8, %v3979_v58  ;;  %v5353_v14 = vpop.f32.mrb[2].mxu1 }
 0x2dd   : > { %3952 = vst [vmem:[%s7328_s12 + $0x30] sm:$0xff] %v5398_v29  ;;  %v5400_v42 = vadd.f32 %v5353_v14, %v5113_v38  ;;  %v3806_v24 = vpop.f32.mrb[3].mxu1  ;;  %v4022_v32 = vmul.f32 %v5398_v29, %v5398_v29 }
 0x2de   : > { %3950 = vst [vmem:[%s7328_s12 + $0x20] sm:$0xff] %v5399_v22  ;;  %v3981_v26 = vadd.f32 %v5399_v22, %v3980_v56  ;;  %v4020_v37 = vmul.f32 %v5399_v22, %v5399_v22  ;;  %v4050_v52 = vadd.f32 %v4049_v39, %v4019_v4  ;;  %v5401_v6 = vadd.f32 %v3806_v24, %v7273_v55 }
 0x2df   : > { %3953 = vst [vmem:[%s7328_s12 + $0x38] sm:$0xff] %v5400_v42  ;;  %v4023_v59 = vmul.f32 %v5400_v42, %v5400_v42 }
 0x2e0   : > { %v4051_v23 = vadd.f32 %v4050_v52, %v4020_v37  ;;  %3951 = vst [vmem:[%s7328_s12 + $0x28] sm:$0xff] %v5401_v6  ;;  %v3982_v43 = vadd.f32 %v5401_v6, %v3981_v26  ;;  %v4021_v36 = vmul.f32 %v5401_v6, %v5401_v6 }
 0x2e2   : > { %v3983_v5 = vadd.f32 %v5398_v29, %v3982_v43  ;;  %v4052_v25 = vadd.f32 %v4051_v23, %v4021_v36  ;;  %v5356_v17 = vpop.f32.mrb[4].mxu1 }
 0x2e3   : > { %v5402_v38 = vadd.f32 %v5356_v17, %v7275_v50  ;;  %v3819_v2 = vpop.f32.mrb[5].mxu1 }
 0x2e4   : > { %v4053_v28 = vadd.f32 %v4052_v25, %v4022_v32  ;;  %v5403_v55 = vadd.f32 %v3819_v2, %v7277_v49  ;;  %v3984_v11 = vadd.f32 %v5400_v42, %v3983_v5  ;;  %v5357_v46 = vpop.f32.mrb[6].mxu1 }
 0x2e5   : > { %3956 = vst [vmem:[%s7328_s12 + $0x50] sm:$0xff] %v5402_v38  ;;  %v5404_v15 = vadd.f32 %v5357_v46, %v7279_v63  ;;  %v3822_v60 = vpop.f32.mrb[7].mxu1  ;;  %v4026_v49 = vmul.f32 %v5402_v38, %v5402_v38 }
 0x2e6   : > { %3954 = vst [vmem:[%s7328_s12 + $0x40] sm:$0xff] %v5403_v55  ;;  %v3985_v54 = vadd.f32 %v5403_v55, %v3984_v11  ;;  %v4024_v8 = vmul.f32 %v5403_v55, %v5403_v55  ;;  %v4054_v20 = vadd.f32 %v4053_v28, %v4023_v59  ;;  %v5405_v12 = vadd.f32 %v3822_v60, %v7281_v31 }
 0x2e7   : > { %3957 = vst [vmem:[%s7328_s12 + $0x58] sm:$0xff] %v5404_v15  ;;  %v4027_v13 = vmul.f32 %v5404_v15, %v5404_v15 }
 0x2e8   : > { %v4055_v50 = vadd.f32 %v4054_v20, %v4024_v8  ;;  %3955 = vst [vmem:[%s7328_s12 + $0x48] sm:$0xff] %v5405_v12  ;;  %v3986_v10 = vadd.f32 %v5405_v12, %v3985_v54  ;;  %v4025_v30 = vmul.f32 %v5405_v12, %v5405_v12 }
 0x2ea   : > { %v3987_v40 = vadd.f32 %v5402_v38, %v3986_v10  ;;  %v4056_v45 = vadd.f32 %v4055_v50, %v4025_v30  ;;  %v5360_v58 = vpop.f32.mrb[8].mxu1 }
 0x2eb   : > { %v5406_v63 = vadd.f32 %v5360_v58, %v7283_v1  ;;  %v3835_v19 = vpop.f32.mrb[9].mxu1 }
 0x2ec   : > { %v4057_v29 = vadd.f32 %v4056_v45, %v4026_v49  ;;  %v5407_v31 = vadd.f32 %v3835_v19, %v7285_v7  ;;  %v3988_v47 = vadd.f32 %v5404_v15, %v3987_v40  ;;  %v5361_v4 = vpop.f32.mrb[10].mxu1 }
 0x2ed   : > { %3960 = vst [vmem:[%s7328_s12 + $0x70] sm:$0xff] %v5406_v63  ;;  %v5408_v39 = vadd.f32 %v5361_v4, %v7287_v62  ;;  %v3838_v22 = vpop.f32.mrb[11].mxu1  ;;  %v4030_v7 = vmul.f32 %v5406_v63, %v5406_v63 }
 0x2ee   : > { %3958 = vst [vmem:[%s7328_s12 + $0x60] sm:$0xff] %v5407_v31  ;;  %v3989_v56 = vadd.f32 %v5407_v31, %v3988_v47  ;;  %v4028_v14 = vmul.f32 %v5407_v31, %v5407_v31  ;;  %v4058_v42 = vadd.f32 %v4057_v29, %v4027_v13  ;;  %v5409_v24 = vadd.f32 %v3838_v22, %v7289_v48 }
 0x2ef   : > { %3961 = vst [vmem:[%s7328_s12 + $0x78] sm:$0xff] %v5408_v39  ;;  %v4031_v36 = vmul.f32 %v5408_v39, %v5408_v39 }
 0x2f0   : > { %v4059_v1 = vadd.f32 %v4058_v42, %v4028_v14  ;;  %3959 = vst [vmem:[%s7328_s12 + $0x68] sm:$0xff] %v5409_v24  ;;  %v3990_v26 = vadd.f32 %v5409_v24, %v3989_v56  ;;  %v4029_v37 = vmul.f32 %v5409_v24, %v5409_v24 }
 0x2f2   : > { %v3991_v52 = vadd.f32 %v5406_v63, %v3990_v26  ;;  %v4060_v6 = vadd.f32 %v4059_v1, %v4029_v37  ;;  %v5364_v23 = vpop.f32.mrb[12].mxu1 }
 0x2f3   : > { %v5410_v62 = vadd.f32 %v5364_v23, %v7291_v0  ;;  %v3851_v43 = vpop.f32.mrb[13].mxu1 }
 0x2f4   : > { %v4061_v32 = vadd.f32 %v4060_v6, %v4030_v7  ;;  %v5411_v48 = vadd.f32 %v3851_v43, %v7293_v21  ;;  %v3992_v5 = vadd.f32 %v5408_v39, %v3991_v52  ;;  %v5365_v25 = vpop.f32.mrb[14].mxu1 }
 0x2f5   : > { %3964 = vst [vmem:[%s7328_s12 + $0x90] sm:$0xff] %v5410_v62  ;;  %v5412_v17 = vadd.f32 %v5365_v25, %v7295_v41  ;;  %v3854_v38 = vpop.f32.mrb[15].mxu1  ;;  %v4034_v21 = vmul.f32 %v5410_v62, %v5410_v62 }
 0x2f6   : > { %3962 = vst [vmem:[%s7328_s12 + $0x80] sm:$0xff] %v5411_v48  ;;  %v3993_v2 = vadd.f32 %v5411_v48, %v3992_v5  ;;  %v4032_v59 = vmul.f32 %v5411_v48, %v5411_v48  ;;  %v4062_v28 = vadd.f32 %v4061_v32, %v4031_v36  ;;  %v5413_v55 = vadd.f32 %v3854_v38, %v7297_v51 }
 0x2f7   : > { %3965 = vst [vmem:[%s7328_s12 + $0x98] sm:$0xff] %v5412_v17  ;;  %v4035_v20 = vmul.f32 %v5412_v17, %v5412_v17 }
 0x2f8   : > { %v4063_v0 = vadd.f32 %v4062_v28, %v4032_v59  ;;  %3963 = vst [vmem:[%s7328_s12 + $0x88] sm:$0xff] %v5413_v55  ;;  %v3994_v11 = vadd.f32 %v5413_v55, %v3993_v2  ;;  %v4033_v46 = vmul.f32 %v5413_v55, %v5413_v55 }
 0x2fa   : > { %v3995_v15 = vadd.f32 %v5410_v62, %v3994_v11  ;;  %v4064_v60 = vadd.f32 %v4063_v0, %v4033_v46  ;;  %v5368_v54 = vpop.f32.mrb[16].mxu1 }
 0x2fb   : > { %v5414_v41 = vadd.f32 %v5368_v54, %v7299_v27  ;;  %v3867_v8 = vpop.f32.mrb[17].mxu1 }
 0x2fc   : > { %v4065_v12 = vadd.f32 %v4064_v60, %v4034_v21  ;;  %v5415_v51 = vadd.f32 %v3867_v8, %v7301_v16  ;;  %v3996_v50 = vadd.f32 %v5412_v17, %v3995_v15  ;;  %v5369_v10 = vpop.f32.mrb[18].mxu1 }
 0x2fd   : > { %3968 = vst [vmem:[%s7328_s12 + $0xb0] sm:$0xff] %v5414_v41  ;;  %v5416_v30 = vadd.f32 %v5369_v10, %v7303_v57  ;;  %v3870_v49 = vpop.f32.mrb[19].mxu1  ;;  %v4038_v16 = vmul.f32 %v5414_v41, %v5414_v41 }
 0x2fe   : > { %3966 = vst [vmem:[%s7328_s12 + $0xa0] sm:$0xff] %v5415_v51  ;;  %v3997_v40 = vadd.f32 %v5415_v51, %v3996_v50  ;;  %v4036_v45 = vmul.f32 %v5415_v51, %v5415_v51  ;;  %v4066_v58 = vadd.f32 %v4065_v12, %v4035_v20  ;;  %v5417_v63 = vadd.f32 %v3870_v49, %v7305_v9 }
 0x2ff   : > { %3969 = vst [vmem:[%s7328_s12 + $0xb8] sm:$0xff] %v5416_v30  ;;  %v4039_v39 = vmul.f32 %v5416_v30, %v5416_v30 }
 0x300   : > { %v4067_v27 = vadd.f32 %v4066_v58, %v4036_v45  ;;  %3967 = vst [vmem:[%s7328_s12 + $0xa8] sm:$0xff] %v5417_v63  ;;  %v3998_v19 = vadd.f32 %v5417_v63, %v3997_v40  ;;  %v4037_v13 = vmul.f32 %v5417_v63, %v5417_v63 }
 0x302   : > { %v3999_v29 = vadd.f32 %v5414_v41, %v3998_v19  ;;  %v4068_v31 = vadd.f32 %v4067_v27, %v4037_v13  ;;  %v5372_v47 = vpop.f32.mrb[20].mxu1 }
 0x303   : > { %v5418_v57 = vadd.f32 %v5372_v47, %v7307_v53  ;;  %v3883_v4 = vpop.f32.mrb[21].mxu1 }
 0x304   : > { %v4069_v22 = vadd.f32 %v4068_v31, %v4038_v16  ;;  %v5419_v9 = vadd.f32 %v3883_v4, %v7309_v61  ;;  %v4000_v56 = vadd.f32 %v5416_v30, %v3999_v29  ;;  %v5373_v14 = vpop.f32.mrb[22].mxu1 }
 0x305   : > { %3972 = vst [vmem:[%s7328_s12 + $0xd0] sm:$0xff] %v5418_v57  ;;  %v5420_v42 = vadd.f32 %v5373_v14, %v7311_v44  ;;  %v3886_v24 = vpop.f32.mrb[23].mxu1  ;;  %v4042_v61 = vmul.f32 %v5418_v57, %v5418_v57 }
 0x306   : > { %3970 = vst [vmem:[%s7328_s12 + $0xc0] sm:$0xff] %v5419_v9  ;;  %v4001_v1 = vadd.f32 %v5419_v9, %v4000_v56  ;;  %v4040_v26 = vmul.f32 %v5419_v9, %v5419_v9  ;;  %v4070_v37 = vadd.f32 %v4069_v22, %v4039_v39  ;;  %v5421_v7 = vadd.f32 %v3886_v24, %v7313_v18 }
 0x307   : > { %3973 = vst [vmem:[%s7328_s12 + $0xd8] sm:$0xff] %v5420_v42  ;;  %v4043_v32 = vmul.f32 %v5420_v42, %v5420_v42 }
 0x308   : > { %v4071_v53 = vadd.f32 %v4070_v37, %v4040_v26  ;;  %3971 = vst [vmem:[%s7328_s12 + $0xc8] sm:$0xff] %v5421_v7  ;;  %v4002_v52 = vadd.f32 %v5421_v7, %v4001_v1  ;;  %v4041_v6 = vmul.f32 %v5421_v7, %v5421_v7 }
 0x30a   : > { %v4003_v23 = vadd.f32 %v5418_v57, %v4002_v52  ;;  %v4072_v62 = vadd.f32 %v4071_v53, %v4041_v6  ;;  %v5376_v43 = vpop.f32.mrb[24].mxu1 }
 0x30b   : > { %v5422_v44 = vadd.f32 %v5376_v43, %v7315_v33  ;;  %v3899_v36 = vpop.f32.mrb[25].mxu1 }
 0x30c   : > { %v4073_v48 = vadd.f32 %v4072_v62, %v4042_v61  ;;  %v5423_v18 = vadd.f32 %v3899_v36, %v7317_v3  ;;  %v4004_v5 = vadd.f32 %v5420_v42, %v4003_v23  ;;  %v5377_v25 = vpop.f32.mrb[26].mxu1 }
 0x30d   : > { %3976 = vst [vmem:[%s7328_s12 + $0xf0] sm:$0xff] %v5422_v44  ;;  %v5424_v17 = vadd.f32 %v5377_v25, %v7319_v35  ;;  %v3902_v38 = vpop.f32.mrb[27].mxu1  ;;  %v4046_v3 = vmul.f32 %v5422_v44, %v5422_v44 }
 0x30e   : > { %3974 = vst [vmem:[%s7328_s12 + $0xe0] sm:$0xff] %v5423_v18  ;;  %v4005_v2 = vadd.f32 %v5423_v18, %v4004_v5  ;;  %v4044_v59 = vmul.f32 %v5423_v18, %v5423_v18  ;;  %v4074_v28 = vadd.f32 %v4073_v48, %v4043_v32  ;;  %v5425_v33 = vadd.f32 %v3902_v38, %v7321_v34 }
 0x30f   : > { %3977 = vst [vmem:[%s7328_s12 + $0xf8] sm:$0xff] %v5424_v17  ;;  %v4047_v15 = vmul.f32 %v5424_v17, %v5424_v17 }
 0x310   : > { %v4075_v55 = vadd.f32 %v4074_v28, %v4044_v59  ;;  %3975 = vst [vmem:[%s7328_s12 + $0xe8] sm:$0xff] %v5425_v33  ;;  %v4006_v0 = vadd.f32 %v5425_v33, %v4005_v2  ;;  %v4045_v11 = vmul.f32 %v5425_v33, %v5425_v33 }
 0x312   : > { %v4007_v46 = vadd.f32 %v5422_v44, %v4006_v0  ;;  %v4076_v21 = vadd.f32 %v4075_v55, %v4045_v11 }
 0x314   : > { %v4008_v35 = vadd.f32 %v5424_v17, %v4007_v46  ;;  %v4077_v60 = vadd.f32 %v4076_v21, %v4046_v3 }
 0x316   : > { %v4009_v54 = vrot.slane %v4008_v35, 4  ;;  %v4078_v41 = vadd.f32 %v4077_v60, %v4047_v15 }
 0x318   : > { %v4010_v8 = vadd.f32 %v4009_v54, %v4008_v35  ;;  %v4079_v20 = vrot.slane %v4078_v41, 4 }
 0x31a   : > { %v4011_v12 = vrot.slane %v4010_v8, 2  ;;  %v4080_v51 = vadd.f32 %v4079_v20, %v4078_v41 }
 0x31c   : > { %v4012_v34 = vadd.f32 %v4011_v12, %v4010_v8  ;;  %v4081_v50 = vrot.slane %v4080_v51, 2 }
 0x31e   : > { %v4013_v10 = vrot.slane %v4012_v34, 1  ;;  %v4082_v30 = vadd.f32 %v4081_v50, %v4080_v51 }
 0x320   : > { %v4014_v49 = vadd.f32 %v4013_v10, %v4012_v34  ;;  %v4083_v40 = vrot.slane %v4082_v30, 1 }
 0x322   : > { %4015 = vst [vmem:[%s265_s14] sm:$0x1] %v4014_v49  ;;  %v4084_v45 = vadd.f32 %v4083_v40, %v4082_v30 }
 0x324   : > { %4085 = vst [vmem:[%s265_s14 + $0x1] sm:$0x1] %v4084_v45 }
 0x325 PF: > { %s17_s21 = sadd.s32 1, %s5747_s21  }
 0x326   : > { %p14_p5 = scmp.ge.s32.totalorder %s17_s21, 4  }
 0x328   :  { %16 = sbr.rel (!%p14_p5) target bundleno = 1 (0x1), region = 90 }

</bundles_post_ra>
